<compile_context>
chip_gen: v7x
topology: tpu7x:2x2x1
jax: 0.10.0
libtpu: 0.0.40
codegen_flags: <defaults>
</compile_context>

<pallas_src>
import jax
import jax.numpy as jnp
from jax.experimental import pallas as pl
from jax.experimental.pallas import tpu as pltpu

FEATURE = 256
N_BRANCH = 6
H_COMBINED = 1024
H_FC2 = 128
_LN_EPS = 1e-5
_BN_EPS = 1e-5
_TAIL_LEN = H_COMBINED + 3 * H_FC2  # 1408 = bc(1024) | b2(128) | w3row(128) | b3 | pad


def _gelu_exact(v):
    # F.gelu default (erf-based, exact) gelu.
    return 0.5 * v * (1.0 + jax.lax.erf(v * jnp.float32(0.7071067811865476)))


def _vhp_kernel(
    x_ref,      # (6, TB, Dp)   bf16  branch inputs, one batch tile (zero-padded)
    w1_ref,     # (6, Dp, F)    bf16  fc1_k weights (eval-BN folded for k<4)
    b1_ref,     # (6, 1, F)     f32   fc1_k biases
    lng_ref,    # (2, 1, F)     f32   LayerNorm gamma (branches 5,6)
    lnb_ref,    # (2, 1, F)     f32   LayerNorm beta
    wc_ref,     # (6F, 1024)    bf16  fc_combined weight (eval-BN folded)
    w2_ref,     # (1024, 128)   bf16  fc2 weight (eval-BN folded)
    tail_ref,   # (1, 1408)     f32   [bc | b2 | w3 row | b3 | pad]
    out_ref,    # (TB, 1)       f32
    f_scratch,  # (TB, 6F)      bf16  staged gelu outputs ("concat" buffer)
):
    # Per-branch fc1 -> norm -> gelu, statically unrolled; LayerNorm is emitted
    # only for the two branches that actually use it.
    for k in range(N_BRANCH):
        y = (
            jnp.dot(x_ref[k], w1_ref[k], preferred_element_type=jnp.float32)
            + b1_ref[k]
        )
        if k >= 4:  # branches 5,6: LayerNorm over the feature dim
            mu = jnp.mean(y, axis=-1, keepdims=True)
            var = jnp.mean(jnp.square(y - mu), axis=-1, keepdims=True)
            y = (y - mu) * jax.lax.rsqrt(var + _LN_EPS) * lng_ref[k - 4] + lnb_ref[k - 4]
        # (branches 1-4: eval-mode BatchNorm already folded into w1/b1)
        f_scratch[:, k * FEATURE:(k + 1) * FEATURE] = _gelu_exact(y).astype(jnp.bfloat16)

    bc = tail_ref[:, 0:H_COMBINED]                                    # (1,1024)
    b2 = tail_ref[:, H_COMBINED:H_COMBINED + H_FC2]                   # (1,128)
    w3r = tail_ref[:, H_COMBINED + H_FC2:H_COMBINED + 2 * H_FC2]      # (1,128)
    b3 = tail_ref[:, H_COMBINED + 2 * H_FC2:H_COMBINED + 2 * H_FC2 + 1]

    # relu(bn_combined(fc_combined(concat)))   (dropout2 = identity in eval)
    h = jnp.maximum(
        jnp.dot(f_scratch[...], wc_ref[...], preferred_element_type=jnp.float32) + bc,
        0.0,
    )                                                                 # (TB,1024)
    # relu(bn2(fc2(.)))                        (dropout3 = identity in eval)
    h2 = jnp.maximum(
        jnp.dot(h.astype(jnp.bfloat16), w2_ref[...], preferred_element_type=jnp.float32)
        + b2,
        0.0,
    )                                                                 # (TB,128)
    # fc3 (128 -> 1): VPU multiply + cross-lane reduce.
    out_ref[...] = jnp.sum(h2 * w3r, axis=-1, keepdims=True) + b3


def init_params(key, feature_sizes, feature=FEATURE):
    """Deterministic init matching the module's _initialize_weights().

    Weights are stored transposed (in_features, out_features), lane-padded on
    the branch-input dim, stacked per-branch, and cast to bf16.  Eval-mode
    BatchNorm at default running stats folds into the preceding Linear as the
    constant scale 1/sqrt(1+eps).
    """
    n = len(feature_sizes)
    d_pad = ((max(feature_sizes) + 127) // 128) * 128
    ks = jax.random.split(key, n + 3)
    bn_scale = 1.0 / (1.0 + _BN_EPS) ** 0.5

    def kaiming(k, fan_in, shape):
        std = (2.0 / fan_in) ** 0.5  # kaiming_normal_, fan_in, relu
        return jax.random.normal(k, shape, jnp.float32) * std

    w1 = jnp.zeros((n, d_pad, feature), jnp.float32)
    b1 = jnp.zeros((n, 1, feature), jnp.float32)
    for i, fs in enumerate(feature_sizes):
        w = kaiming(ks[i], fs, (fs, feature))
        if i < 4:  # fold eval-mode BatchNorm1d (default running stats)
            w = w * bn_scale
        w1 = w1.at[i, :fs, :].set(w)

    ln_g = jnp.ones((2, 1, feature), jnp.float32)
    ln_b = jnp.zeros((2, 1, feature), jnp.float32)

    # fc_combined: (6*feature, 1024) kaiming (fan_in = 6*feature), BN folded.
    wc = kaiming(ks[n], n * feature, (n * feature, H_COMBINED)) * bn_scale
    bc = jnp.zeros((H_COMBINED,), jnp.float32)
    w2 = kaiming(ks[n + 1], H_COMBINED, (H_COMBINED, H_FC2)) * bn_scale
    b2 = jnp.zeros((H_FC2,), jnp.float32)
    w3 = kaiming(ks[n + 2], H_FC2, (H_FC2,))
    b3 = jnp.zeros((1,), jnp.float32)

    tail = jnp.concatenate(
        [bc, b2, w3, b3, jnp.zeros((H_FC2 - 1,), jnp.float32)]
    )[None, :]  # (1, 1408), lane-aligned packed small params

    return {
        "w1": w1.astype(jnp.bfloat16),
        "b1": b1,
        "ln_g": ln_g,
        "ln_b": ln_b,
        "wc": wc.astype(jnp.bfloat16),
        "w2": w2.astype(jnp.bfloat16),
        "tail": tail,
    }


def _pick_batch_tile(B):
    """Batch tile: multiple of 8, capped at 512, >=2 tiles when B > 8
    (so v7x's two TensorCores both get work on the parallel axis)."""
    if B <= 8:
        return ((B + 7) // 8) * 8
    half = -(-B // 2)
    return min(512, ((half + 7) // 8) * 8)


def video_heart_predictor(features, params):
    """features: list of 6 arrays (B, C_i, T) -> output (B, 1) float32."""
    flat = [f.reshape(f.shape[0], -1) for f in features]
    B = flat[0].shape[0]
    n, d_pad, feature = params["w1"].shape

    tb = _pick_batch_tile(B)
    nb = -(-B // tb)
    b_pad = nb * tb

    # Cast to bf16 on the host (the MXU consumes bf16 anyway), pad batch and
    # input dims, stack branches -> (6, B_pad, Dp).
    x_stacked = jnp.stack(
        [
            jnp.pad(x.astype(jnp.bfloat16), ((0, b_pad - B), (0, d_pad - x.shape[1])))
            for x in flat
        ],
        axis=0,
    )

    out = pl.pallas_call(
        _vhp_kernel,
        out_shape=jax.ShapeDtypeStruct((b_pad, 1), jnp.float32),
        grid_spec=pltpu.PrefetchScalarGridSpec(
            num_scalar_prefetch=0,
            grid=(nb,),  # batch tiles only; branches are unrolled in-kernel
            in_specs=[
                pl.BlockSpec((n, tb, d_pad), lambda i: (0, i, 0)),            # x
                pl.BlockSpec((n, d_pad, feature), lambda i: (0, 0, 0)),       # w1
                pl.BlockSpec((n, 1, feature), lambda i: (0, 0, 0)),           # b1
                pl.BlockSpec((2, 1, feature), lambda i: (0, 0, 0)),           # ln_g
                pl.BlockSpec((2, 1, feature), lambda i: (0, 0, 0)),           # ln_b
                pl.BlockSpec((n * feature, H_COMBINED), lambda i: (0, 0)),    # wc
                pl.BlockSpec((H_COMBINED, H_FC2), lambda i: (0, 0)),          # w2
                pl.BlockSpec((1, _TAIL_LEN), lambda i: (0, 0)),               # tail
            ],
            out_specs=pl.BlockSpec((tb, 1), lambda i: (i, 0)),
            scratch_shapes=[pltpu.VMEM((tb, n * feature), jnp.bfloat16)],
        ),
        compiler_params=pltpu.CompilerParams(
            dimension_semantics=("parallel",),
            # ~17 MiB peak at tb=512 (x/w double buffers + concat scratch +
            # fused-layer temps); raise above v5e's 16 MiB default scoped limit.
            vmem_limit_bytes=40 * 1024 * 1024,
        ),
    )(
        x_stacked,
        params["w1"],
        params["b1"],
        params["ln_g"],
        params["ln_b"],
        params["wc"],
        params["w2"],
        params["tail"],
    )
    return out[:B]


if __name__ == "__main__":
    key = jax.random.PRNGKey(0)
    B = 2
    # feature_i has shape (B, C_i, 16); flattened size C_i*16 per branch.
    in_shapes = [
        (B, 4, 16),   # 64
        (B, 6, 16),   # 96
        (B, 8, 16),   # 128
        (B, 10, 16),  # 160
        (B, 12, 16),  # 192
        (B, 14, 16),  # 224
    ]
    feature_sizes = [s[1] * s[2] for s in in_shapes]

    keys = jax.random.split(key, len(in_shapes) + 1)
    feats = [
        jax.random.normal(keys[i], s, jnp.float32) for i, s in enumerate(in_shapes)
    ]
    params = init_params(keys[-1], feature_sizes, FEATURE)

    out = video_heart_predictor(feats, params)
    out = jax.block_until_ready(out)
    assert out.shape == (B, 1) and out.dtype == jnp.float32
    assert bool(jnp.all(jnp.isfinite(out)))
    print("KERNEL_OK")
</pallas_src>

<mosaic_0001>
module attributes {stable_mosaic.version = 11 : i64} {
  func.func @_vhp_kernel(%arg0: i32, %arg1: memref<6x8x256xbf16, #tpu.memory_space<vmem>>, %arg2: memref<6x256x256xbf16, #tpu.memory_space<vmem>>, %arg3: memref<6x1x256xf32, #tpu.memory_space<vmem>>, %arg4: memref<2x1x256xf32, #tpu.memory_space<vmem>>, %arg5: memref<2x1x256xf32, #tpu.memory_space<vmem>>, %arg6: memref<1536x1024xbf16, #tpu.memory_space<vmem>>, %arg7: memref<1024x128xbf16, #tpu.memory_space<vmem>>, %arg8: memref<1x1408xf32, #tpu.memory_space<vmem>>, %arg9: memref<8x1xf32, #tpu.memory_space<vmem>>, %arg10: memref<8x1536xbf16, #tpu.memory_space<vmem>>) attributes {dimension_semantics = [#tpu.dimension_semantics<parallel>], iteration_bounds = array<i64: 1>, scalar_prefetch = 0 : i64, scratch_operands = 1 : i64, tpu.core_type = #tpu.core_type<tc>, window_params = [{transform_indices = @transform_0, window_bounds = array<i64: 6, 8, 256>}, {pipeline_mode = #tpu.pipeline_mode<synchronous>, transform_indices = @transform_1, window_bounds = array<i64: 6, 256, 256>}, {pipeline_mode = #tpu.pipeline_mode<synchronous>, transform_indices = @transform_2, window_bounds = array<i64: 6, 1, 256>}, {pipeline_mode = #tpu.pipeline_mode<synchronous>, transform_indices = @transform_3, window_bounds = array<i64: 2, 1, 256>}, {pipeline_mode = #tpu.pipeline_mode<synchronous>, transform_indices = @transform_4, window_bounds = array<i64: 2, 1, 256>}, {pipeline_mode = #tpu.pipeline_mode<synchronous>, transform_indices = @transform_5, window_bounds = array<i64: 1536, 1024>}, {pipeline_mode = #tpu.pipeline_mode<synchronous>, transform_indices = @transform_6, window_bounds = array<i64: 1024, 128>}, {pipeline_mode = #tpu.pipeline_mode<synchronous>, transform_indices = @transform_7, window_bounds = array<i64: 1, 1408>}, {transform_indices = @transform_8, window_bounds = array<i64: 8, 1>}]} {
    %c0 = arith.constant 0 : index
    %c0_0 = arith.constant 0 : index
    %c0_1 = arith.constant 0 : index
    %0 = vector.load %arg1[%c0, %c0_0, %c0_1] : memref<6x8x256xbf16, #tpu.memory_space<vmem>>, vector<1x8x256xbf16>
    %1 = vector.shape_cast %0 : vector<1x8x256xbf16> to vector<8x256xbf16>
    %c0_2 = arith.constant 0 : index
    %c0_3 = arith.constant 0 : index
    %c0_4 = arith.constant 0 : index
    %2 = vector.load %arg2[%c0_2, %c0_3, %c0_4] : memref<6x256x256xbf16, #tpu.memory_space<vmem>>, vector<1x256x256xbf16>
    %3 = vector.shape_cast %2 : vector<1x256x256xbf16> to vector<256x256xbf16>
    %cst = arith.constant dense<0.000000e+00> : vector<8x256xf32>
    %4 = tpu.matmul %1, %3, %cst {dimension_numbers = #tpu.dot_dimension_numbers<[1], [0], [0], [1], [0, 0, 1, 1], [], []>} : vector<8x256xbf16>, vector<256x256xbf16>, vector<8x256xf32> -> vector<8x256xf32>
    %c0_5 = arith.constant 0 : index
    %c0_6 = arith.constant 0 : index
    %c0_7 = arith.constant 0 : index
    %5 = vector.load %arg3[%c0_5, %c0_6, %c0_7] : memref<6x1x256xf32, #tpu.memory_space<vmem>>, vector<1x1x256xf32>
    %6 = vector.shape_cast %5 : vector<1x1x256xf32> to vector<1x256xf32>
    %7 = vector.broadcast %6 : vector<1x256xf32> to vector<8x256xf32>
    %8 = arith.addf %4, %7 : vector<8x256xf32>
    %cst_8 = arith.constant 5.000000e-01 : f32
    %9 = vector.broadcast %cst_8 : f32 to vector<8x256xf32>
    %10 = arith.mulf %9, %8 : vector<8x256xf32>
    %cst_9 = arith.constant 0.707106769 : f32
    %11 = vector.broadcast %cst_9 : f32 to vector<8x256xf32>
    %12 = arith.mulf %8, %11 : vector<8x256xf32>
    %13 = math.erf %12 : vector<8x256xf32>
    %cst_10 = arith.constant 1.000000e+00 : f32
    %14 = vector.broadcast %cst_10 : f32 to vector<8x256xf32>
    %15 = arith.addf %14, %13 : vector<8x256xf32>
    %16 = arith.mulf %10, %15 : vector<8x256xf32>
    %17 = arith.truncf %16 : vector<8x256xf32> to vector<8x256xbf16>
    %c0_11 = arith.constant 0 : index
    %c0_12 = arith.constant 0 : index
    %18 = vector.load %arg10[%c0_11, %c0_12] : memref<8x1536xbf16, #tpu.memory_space<vmem>>, vector<8x256xbf16>
    tpu.vector_store %arg10[%c0_11, %c0_12], %17 {strides = array<i32>} : memref<8x1536xbf16, #tpu.memory_space<vmem>>, vector<8x256xbf16>,
    %c1 = arith.constant 1 : index
    %c0_13 = arith.constant 0 : index
    %c0_14 = arith.constant 0 : index
    %19 = vector.load %arg1[%c1, %c0_13, %c0_14] : memref<6x8x256xbf16, #tpu.memory_space<vmem>>, vector<1x8x256xbf16>
    %20 = vector.shape_cast %19 : vector<1x8x256xbf16> to vector<8x256xbf16>
    %c1_15 = arith.constant 1 : index
    %c0_16 = arith.constant 0 : index
    %c0_17 = arith.constant 0 : index
    %21 = vector.load %arg2[%c1_15, %c0_16, %c0_17] : memref<6x256x256xbf16, #tpu.memory_space<vmem>>, vector<1x256x256xbf16>
    %22 = vector.shape_cast %21 : vector<1x256x256xbf16> to vector<256x256xbf16>
    %cst_18 = arith.constant dense<0.000000e+00> : vector<8x256xf32>
    %23 = tpu.matmul %20, %22, %cst_18 {dimension_numbers = #tpu.dot_dimension_numbers<[1], [0], [0], [1], [0, 0, 1, 1], [], []>} : vector<8x256xbf16>, vector<256x256xbf16>, vector<8x256xf32> -> vector<8x256xf32>
    %c1_19 = arith.constant 1 : index
    %c0_20 = arith.constant 0 : index
    %c0_21 = arith.constant 0 : index
    %24 = vector.load %arg3[%c1_19, %c0_20, %c0_21] : memref<6x1x256xf32, #tpu.memory_space<vmem>>, vector<1x1x256xf32>
    %25 = vector.shape_cast %24 : vector<1x1x256xf32> to vector<1x256xf32>
    %26 = vector.broadcast %25 : vector<1x256xf32> to vector<8x256xf32>
    %27 = arith.addf %23, %26 : vector<8x256xf32>
    %cst_22 = arith.constant 5.000000e-01 : f32
    %28 = vector.broadcast %cst_22 : f32 to vector<8x256xf32>
    %29 = arith.mulf %28, %27 : vector<8x256xf32>
    %cst_23 = arith.constant 0.707106769 : f32
    %30 = vector.broadcast %cst_23 : f32 to vector<8x256xf32>
    %31 = arith.mulf %27, %30 : vector<8x256xf32>
    %32 = math.erf %31 : vector<8x256xf32>
    %cst_24 = arith.constant 1.000000e+00 : f32
    %33 = vector.broadcast %cst_24 : f32 to vector<8x256xf32>
    %34 = arith.addf %33, %32 : vector<8x256xf32>
    %35 = arith.mulf %29, %34 : vector<8x256xf32>
    %36 = arith.truncf %35 : vector<8x256xf32> to vector<8x256xbf16>
    %c0_25 = arith.constant 0 : index
    %c256 = arith.constant 256 : index
    %37 = vector.load %arg10[%c0_25, %c256] : memref<8x1536xbf16, #tpu.memory_space<vmem>>, vector<8x256xbf16>
    tpu.vector_store %arg10[%c0_25, %c256], %36 {strides = array<i32>} : memref<8x1536xbf16, #tpu.memory_space<vmem>>, vector<8x256xbf16>,
    %c2 = arith.constant 2 : index
    %c0_26 = arith.constant 0 : index
    %c0_27 = arith.constant 0 : index
    %38 = vector.load %arg1[%c2, %c0_26, %c0_27] : memref<6x8x256xbf16, #tpu.memory_space<vmem>>, vector<1x8x256xbf16>
    %39 = vector.shape_cast %38 : vector<1x8x256xbf16> to vector<8x256xbf16>
    %c2_28 = arith.constant 2 : index
    %c0_29 = arith.constant 0 : index
    %c0_30 = arith.constant 0 : index
    %40 = vector.load %arg2[%c2_28, %c0_29, %c0_30] : memref<6x256x256xbf16, #tpu.memory_space<vmem>>, vector<1x256x256xbf16>
    %41 = vector.shape_cast %40 : vector<1x256x256xbf16> to vector<256x256xbf16>
    %cst_31 = arith.constant dense<0.000000e+00> : vector<8x256xf32>
    %42 = tpu.matmul %39, %41, %cst_31 {dimension_numbers = #tpu.dot_dimension_numbers<[1], [0], [0], [1], [0, 0, 1, 1], [], []>} : vector<8x256xbf16>, vector<256x256xbf16>, vector<8x256xf32> -> vector<8x256xf32>
    %c2_32 = arith.constant 2 : index
    %c0_33 = arith.constant 0 : index
    %c0_34 = arith.constant 0 : index
    %43 = vector.load %arg3[%c2_32, %c0_33, %c0_34] : memref<6x1x256xf32, #tpu.memory_space<vmem>>, vector<1x1x256xf32>
    %44 = vector.shape_cast %43 : vector<1x1x256xf32> to vector<1x256xf32>
    %45 = vector.broadcast %44 : vector<1x256xf32> to vector<8x256xf32>
    %46 = arith.addf %42, %45 : vector<8x256xf32>
    %cst_35 = arith.constant 5.000000e-01 : f32
    %47 = vector.broadcast %cst_35 : f32 to vector<8x256xf32>
    %48 = arith.mulf %47, %46 : vector<8x256xf32>
    %cst_36 = arith.constant 0.707106769 : f32
    %49 = vector.broadcast %cst_36 : f32 to vector<8x256xf32>
    %50 = arith.mulf %46, %49 : vector<8x256xf32>
    %51 = math.erf %50 : vector<8x256xf32>
    %cst_37 = arith.constant 1.000000e+00 : f32
    %52 = vector.broadcast %cst_37 : f32 to vector<8x256xf32>
    %53 = arith.addf %52, %51 : vector<8x256xf32>
    %54 = arith.mulf %48, %53 : vector<8x256xf32>
    %55 = arith.truncf %54 : vector<8x256xf32> to vector<8x256xbf16>
    %c0_38 = arith.constant 0 : index
    %c512 = arith.constant 512 : index
    %56 = vector.load %arg10[%c0_38, %c512] : memref<8x1536xbf16, #tpu.memory_space<vmem>>, vector<8x256xbf16>
    tpu.vector_store %arg10[%c0_38, %c512], %55 {strides = array<i32>} : memref<8x1536xbf16, #tpu.memory_space<vmem>>, vector<8x256xbf16>,
    %c3 = arith.constant 3 : index
    %c0_39 = arith.constant 0 : index
    %c0_40 = arith.constant 0 : index
    %57 = vector.load %arg1[%c3, %c0_39, %c0_40] : memref<6x8x256xbf16, #tpu.memory_space<vmem>>, vector<1x8x256xbf16>
    %58 = vector.shape_cast %57 : vector<1x8x256xbf16> to vector<8x256xbf16>
    %c3_41 = arith.constant 3 : index
    %c0_42 = arith.constant 0 : index
    %c0_43 = arith.constant 0 : index
    %59 = vector.load %arg2[%c3_41, %c0_42, %c0_43] : memref<6x256x256xbf16, #tpu.memory_space<vmem>>, vector<1x256x256xbf16>
    %60 = vector.shape_cast %59 : vector<1x256x256xbf16> to vector<256x256xbf16>
    %cst_44 = arith.constant dense<0.000000e+00> : vector<8x256xf32>
    %61 = tpu.matmul %58, %60, %cst_44 {dimension_numbers = #tpu.dot_dimension_numbers<[1], [0], [0], [1], [0, 0, 1, 1], [], []>} : vector<8x256xbf16>, vector<256x256xbf16>, vector<8x256xf32> -> vector<8x256xf32>
    %c3_45 = arith.constant 3 : index
    %c0_46 = arith.constant 0 : index
    %c0_47 = arith.constant 0 : index
    %62 = vector.load %arg3[%c3_45, %c0_46, %c0_47] : memref<6x1x256xf32, #tpu.memory_space<vmem>>, vector<1x1x256xf32>
    %63 = vector.shape_cast %62 : vector<1x1x256xf32> to vector<1x256xf32>
    %64 = vector.broadcast %63 : vector<1x256xf32> to vector<8x256xf32>
    %65 = arith.addf %61, %64 : vector<8x256xf32>
    %cst_48 = arith.constant 5.000000e-01 : f32
    %66 = vector.broadcast %cst_48 : f32 to vector<8x256xf32>
    %67 = arith.mulf %66, %65 : vector<8x256xf32>
    %cst_49 = arith.constant 0.707106769 : f32
    %68 = vector.broadcast %cst_49 : f32 to vector<8x256xf32>
    %69 = arith.mulf %65, %68 : vector<8x256xf32>
    %70 = math.erf %69 : vector<8x256xf32>
    %cst_50 = arith.constant 1.000000e+00 : f32
    %71 = vector.broadcast %cst_50 : f32 to vector<8x256xf32>
    %72 = arith.addf %71, %70 : vector<8x256xf32>
    %73 = arith.mulf %67, %72 : vector<8x256xf32>
    %74 = arith.truncf %73 : vector<8x256xf32> to vector<8x256xbf16>
    %c0_51 = arith.constant 0 : index
    %c768 = arith.constant 768 : index
    %75 = vector.load %arg10[%c0_51, %c768] : memref<8x1536xbf16, #tpu.memory_space<vmem>>, vector<8x256xbf16>
    tpu.vector_store %arg10[%c0_51, %c768], %74 {strides = array<i32>} : memref<8x1536xbf16, #tpu.memory_space<vmem>>, vector<8x256xbf16>,
    %c4 = arith.constant 4 : index
    %c0_52 = arith.constant 0 : index
    %c0_53 = arith.constant 0 : index
    %76 = vector.load %arg1[%c4, %c0_52, %c0_53] : memref<6x8x256xbf16, #tpu.memory_space<vmem>>, vector<1x8x256xbf16>
    %77 = vector.shape_cast %76 : vector<1x8x256xbf16> to vector<8x256xbf16>
    %c4_54 = arith.constant 4 : index
    %c0_55 = arith.constant 0 : index
    %c0_56 = arith.constant 0 : index
    %78 = vector.load %arg2[%c4_54, %c0_55, %c0_56] : memref<6x256x256xbf16, #tpu.memory_space<vmem>>, vector<1x256x256xbf16>
    %79 = vector.shape_cast %78 : vector<1x256x256xbf16> to vector<256x256xbf16>
    %cst_57 = arith.constant dense<0.000000e+00> : vector<8x256xf32>
    %80 = tpu.matmul %77, %79, %cst_57 {dimension_numbers = #tpu.dot_dimension_numbers<[1], [0], [0], [1], [0, 0, 1, 1], [], []>} : vector<8x256xbf16>, vector<256x256xbf16>, vector<8x256xf32> -> vector<8x256xf32>
    %c4_58 = arith.constant 4 : index
    %c0_59 = arith.constant 0 : index
    %c0_60 = arith.constant 0 : index
    %81 = vector.load %arg3[%c4_58, %c0_59, %c0_60] : memref<6x1x256xf32, #tpu.memory_space<vmem>>, vector<1x1x256xf32>
    %82 = vector.shape_cast %81 : vector<1x1x256xf32> to vector<1x256xf32>
    %83 = vector.broadcast %82 : vector<1x256xf32> to vector<8x256xf32>
    %84 = arith.addf %80, %83 : vector<8x256xf32>
    %cst_61 = arith.constant dense<0.000000e+00> : vector<8xf32>
    %85 = vector.multi_reduction <add>, %84, %cst_61 [1] : vector<8x256xf32> to vector<8xf32>
    %86 = vector.shape_cast %85 : vector<8xf32> to vector<8x1xf32>
    %cst_62 = arith.constant 2.560000e+02 : f32
    %87 = vector.broadcast %cst_62 : f32 to vector<8x1xf32>
    %88 = arith.divf %86, %87 : vector<8x1xf32>
    %89 = vector.broadcast %88 : vector<8x1xf32> to vector<8x256xf32>
    %90 = arith.subf %84, %89 : vector<8x256xf32>
    %91 = arith.mulf %90, %90 : vector<8x256xf32>
    %cst_63 = arith.constant dense<0.000000e+00> : vector<8xf32>
    %92 = vector.multi_reduction <add>, %91, %cst_63 [1] : vector<8x256xf32> to vector<8xf32>
    %93 = vector.shape_cast %92 : vector<8xf32> to vector<8x1xf32>
    %cst_64 = arith.constant 2.560000e+02 : f32
    %94 = vector.broadcast %cst_64 : f32 to vector<8x1xf32>
    %95 = arith.divf %93, %94 : vector<8x1xf32>
    %96 = vector.broadcast %88 : vector<8x1xf32> to vector<8x256xf32>
    %97 = arith.subf %84, %96 : vector<8x256xf32>
    %cst_65 = arith.constant 9.99999974E-6 : f32
    %98 = vector.broadcast %cst_65 : f32 to vector<8x1xf32>
    %99 = arith.addf %95, %98 : vector<8x1xf32>
    %100 = math.rsqrt %99 : vector<8x1xf32>
    %101 = vector.broadcast %100 : vector<8x1xf32> to vector<8x256xf32>
    %102 = arith.mulf %97, %101 : vector<8x256xf32>
    %c0_66 = arith.constant 0 : index
    %c0_67 = arith.constant 0 : index
    %c0_68 = arith.constant 0 : index
    %103 = vector.load %arg4[%c0_66, %c0_67, %c0_68] : memref<2x1x256xf32, #tpu.memory_space<vmem>>, vector<1x1x256xf32>
    %104 = vector.shape_cast %103 : vector<1x1x256xf32> to vector<1x256xf32>
    %105 = vector.broadcast %104 : vector<1x256xf32> to vector<8x256xf32>
    %106 = arith.mulf %102, %105 : vector<8x256xf32>
    %c0_69 = arith.constant 0 : index
    %c0_70 = arith.constant 0 : index
    %c0_71 = arith.constant 0 : index
    %107 = vector.load %arg5[%c0_69, %c0_70, %c0_71] : memref<2x1x256xf32, #tpu.memory_space<vmem>>, vector<1x1x256xf32>
    %108 = vector.shape_cast %107 : vector<1x1x256xf32> to vector<1x256xf32>
    %109 = vector.broadcast %108 : vector<1x256xf32> to vector<8x256xf32>
    %110 = arith.addf %106, %109 : vector<8x256xf32>
    %cst_72 = arith.constant 5.000000e-01 : f32
    %111 = vector.broadcast %cst_72 : f32 to vector<8x256xf32>
    %112 = arith.mulf %111, %110 : vector<8x256xf32>
    %cst_73 = arith.constant 0.707106769 : f32
    %113 = vector.broadcast %cst_73 : f32 to vector<8x256xf32>
    %114 = arith.mulf %110, %113 : vector<8x256xf32>
    %115 = math.erf %114 : vector<8x256xf32>
    %cst_74 = arith.constant 1.000000e+00 : f32
    %116 = vector.broadcast %cst_74 : f32 to vector<8x256xf32>
    %117 = arith.addf %116, %115 : vector<8x256xf32>
    %118 = arith.mulf %112, %117 : vector<8x256xf32>
    %119 = arith.truncf %118 : vector<8x256xf32> to vector<8x256xbf16>
    %c0_75 = arith.constant 0 : index
    %c1024 = arith.constant 1024 : index
    %120 = vector.load %arg10[%c0_75, %c1024] : memref<8x1536xbf16, #tpu.memory_space<vmem>>, vector<8x256xbf16>
    tpu.vector_store %arg10[%c0_75, %c1024], %119 {strides = array<i32>} : memref<8x1536xbf16, #tpu.memory_space<vmem>>, vector<8x256xbf16>,
    %c5 = arith.constant 5 : index
    %c0_76 = arith.constant 0 : index
    %c0_77 = arith.constant 0 : index
    %121 = vector.load %arg1[%c5, %c0_76, %c0_77] : memref<6x8x256xbf16, #tpu.memory_space<vmem>>, vector<1x8x256xbf16>
    %122 = vector.shape_cast %121 : vector<1x8x256xbf16> to vector<8x256xbf16>
    %c5_78 = arith.constant 5 : index
    %c0_79 = arith.constant 0 : index
    %c0_80 = arith.constant 0 : index
    %123 = vector.load %arg2[%c5_78, %c0_79, %c0_80] : memref<6x256x256xbf16, #tpu.memory_space<vmem>>, vector<1x256x256xbf16>
    %124 = vector.shape_cast %123 : vector<1x256x256xbf16> to vector<256x256xbf16>
    %cst_81 = arith.constant dense<0.000000e+00> : vector<8x256xf32>
    %125 = tpu.matmul %122, %124, %cst_81 {dimension_numbers = #tpu.dot_dimension_numbers<[1], [0], [0], [1], [0, 0, 1, 1], [], []>} : vector<8x256xbf16>, vector<256x256xbf16>, vector<8x256xf32> -> vector<8x256xf32>
    %c5_82 = arith.constant 5 : index
    %c0_83 = arith.constant 0 : index
    %c0_84 = arith.constant 0 : index
    %126 = vector.load %arg3[%c5_82, %c0_83, %c0_84] : memref<6x1x256xf32, #tpu.memory_space<vmem>>, vector<1x1x256xf32>
    %127 = vector.shape_cast %126 : vector<1x1x256xf32> to vector<1x256xf32>
    %128 = vector.broadcast %127 : vector<1x256xf32> to vector<8x256xf32>
    %129 = arith.addf %125, %128 : vector<8x256xf32>
    %cst_85 = arith.constant dense<0.000000e+00> : vector<8xf32>
    %130 = vector.multi_reduction <add>, %129, %cst_85 [1] : vector<8x256xf32> to vector<8xf32>
    %131 = vector.shape_cast %130 : vector<8xf32> to vector<8x1xf32>
    %cst_86 = arith.constant 2.560000e+02 : f32
    %132 = vector.broadcast %cst_86 : f32 to vector<8x1xf32>
    %133 = arith.divf %131, %132 : vector<8x1xf32>
    %134 = vector.broadcast %133 : vector<8x1xf32> to vector<8x256xf32>
    %135 = arith.subf %129, %134 : vector<8x256xf32>
    %136 = arith.mulf %135, %135 : vector<8x256xf32>
    %cst_87 = arith.constant dense<0.000000e+00> : vector<8xf32>
    %137 = vector.multi_reduction <add>, %136, %cst_87 [1] : vector<8x256xf32> to vector<8xf32>
    %138 = vector.shape_cast %137 : vector<8xf32> to vector<8x1xf32>
    %cst_88 = arith.constant 2.560000e+02 : f32
    %139 = vector.broadcast %cst_88 : f32 to vector<8x1xf32>
    %140 = arith.divf %138, %139 : vector<8x1xf32>
    %141 = vector.broadcast %133 : vector<8x1xf32> to vector<8x256xf32>
    %142 = arith.subf %129, %141 : vector<8x256xf32>
    %cst_89 = arith.constant 9.99999974E-6 : f32
    %143 = vector.broadcast %cst_89 : f32 to vector<8x1xf32>
    %144 = arith.addf %140, %143 : vector<8x1xf32>
    %145 = math.rsqrt %144 : vector<8x1xf32>
    %146 = vector.broadcast %145 : vector<8x1xf32> to vector<8x256xf32>
    %147 = arith.mulf %142, %146 : vector<8x256xf32>
    %c1_90 = arith.constant 1 : index
    %c0_91 = arith.constant 0 : index
    %c0_92 = arith.constant 0 : index
    %148 = vector.load %arg4[%c1_90, %c0_91, %c0_92] : memref<2x1x256xf32, #tpu.memory_space<vmem>>, vector<1x1x256xf32>
    %149 = vector.shape_cast %148 : vector<1x1x256xf32> to vector<1x256xf32>
    %150 = vector.broadcast %149 : vector<1x256xf32> to vector<8x256xf32>
    %151 = arith.mulf %147, %150 : vector<8x256xf32>
    %c1_93 = arith.constant 1 : index
    %c0_94 = arith.constant 0 : index
    %c0_95 = arith.constant 0 : index
    %152 = vector.load %arg5[%c1_93, %c0_94, %c0_95] : memref<2x1x256xf32, #tpu.memory_space<vmem>>, vector<1x1x256xf32>
    %153 = vector.shape_cast %152 : vector<1x1x256xf32> to vector<1x256xf32>
    %154 = vector.broadcast %153 : vector<1x256xf32> to vector<8x256xf32>
    %155 = arith.addf %151, %154 : vector<8x256xf32>
    %cst_96 = arith.constant 5.000000e-01 : f32
    %156 = vector.broadcast %cst_96 : f32 to vector<8x256xf32>
    %157 = arith.mulf %156, %155 : vector<8x256xf32>
    %cst_97 = arith.constant 0.707106769 : f32
    %158 = vector.broadcast %cst_97 : f32 to vector<8x256xf32>
    %159 = arith.mulf %155, %158 : vector<8x256xf32>
    %160 = math.erf %159 : vector<8x256xf32>
    %cst_98 = arith.constant 1.000000e+00 : f32
    %161 = vector.broadcast %cst_98 : f32 to vector<8x256xf32>
    %162 = arith.addf %161, %160 : vector<8x256xf32>
    %163 = arith.mulf %157, %162 : vector<8x256xf32>
    %164 = arith.truncf %163 : vector<8x256xf32> to vector<8x256xbf16>
    %c0_99 = arith.constant 0 : index
    %c1280 = arith.constant 1280 : index
    %165 = vector.load %arg10[%c0_99, %c1280] : memref<8x1536xbf16, #tpu.memory_space<vmem>>, vector<8x256xbf16>
    tpu.vector_store %arg10[%c0_99, %c1280], %164 {strides = array<i32>} : memref<8x1536xbf16, #tpu.memory_space<vmem>>, vector<8x256xbf16>,
    %c0_100 = arith.constant 0 : index
    %c0_101 = arith.constant 0 : index
    %166 = vector.load %arg8[%c0_100, %c0_101] : memref<1x1408xf32, #tpu.memory_space<vmem>>, vector<1x1024xf32>
    %c0_102 = arith.constant 0 : index
    %c1024_103 = arith.constant 1024 : index
    %167 = vector.load %arg8[%c0_102, %c1024_103] : memref<1x1408xf32, #tpu.memory_space<vmem>>, vector<1x128xf32>
    %c0_104 = arith.constant 0 : index
    %c1152 = arith.constant 1152 : index
    %168 = vector.load %arg8[%c0_104, %c1152] : memref<1x1408xf32, #tpu.memory_space<vmem>>, vector<1x128xf32>
    %c0_105 = arith.constant 0 : index
    %c1280_106 = arith.constant 1280 : index
    %169 = vector.load %arg8[%c0_105, %c1280_106] : memref<1x1408xf32, #tpu.memory_space<vmem>>, vector<1x1xf32>
    %c0_107 = arith.constant 0 : index
    %c0_108 = arith.constant 0 : index
    %170 = vector.load %arg10[%c0_107, %c0_108] : memref<8x1536xbf16, #tpu.memory_space<vmem>>, vector<8x1536xbf16>
    %c0_109 = arith.constant 0 : index
    %c0_110 = arith.constant 0 : index
    %171 = vector.load %arg6[%c0_109, %c0_110] : memref<1536x1024xbf16, #tpu.memory_space<vmem>>, vector<1536x1024xbf16>
    %cst_111 = arith.constant dense<0.000000e+00> : vector<8x1024xf32>
    %172 = tpu.matmul %170, %171, %cst_111 {dimension_numbers = #tpu.dot_dimension_numbers<[1], [0], [0], [1], [0, 0, 1, 1], [], []>} : vector<8x1536xbf16>, vector<1536x1024xbf16>, vector<8x1024xf32> -> vector<8x1024xf32>
    %173 = vector.broadcast %166 : vector<1x1024xf32> to vector<8x1024xf32>
    %174 = arith.addf %172, %173 : vector<8x1024xf32>
    %cst_112 = arith.constant 0.000000e+00 : f32
    %175 = vector.broadcast %cst_112 : f32 to vector<8x1024xf32>
    %176 = arith.maximumf %174, %175 : vector<8x1024xf32>
    %177 = arith.truncf %176 : vector<8x1024xf32> to vector<8x1024xbf16>
    %c0_113 = arith.constant 0 : index
    %c0_114 = arith.constant 0 : index
    %178 = vector.load %arg7[%c0_113, %c0_114] : memref<1024x128xbf16, #tpu.memory_space<vmem>>, vector<1024x128xbf16>
    %cst_115 = arith.constant dense<0.000000e+00> : vector<8x128xf32>
    %179 = tpu.matmul %177, %178, %cst_115 {dimension_numbers = #tpu.dot_dimension_numbers<[1], [0], [0], [1], [0, 0, 1, 1], [], []>} : vector<8x1024xbf16>, vector<1024x128xbf16>, vector<8x128xf32> -> vector<8x128xf32>
    %180 = vector.broadcast %167 : vector<1x128xf32> to vector<8x128xf32>
    %181 = arith.addf %179, %180 : vector<8x128xf32>
    %cst_116 = arith.constant 0.000000e+00 : f32
    %182 = vector.broadcast %cst_116 : f32 to vector<8x128xf32>
    %183 = arith.maximumf %181, %182 : vector<8x128xf32>
    %184 = vector.broadcast %168 : vector<1x128xf32> to vector<8x128xf32>
    %185 = arith.mulf %183, %184 : vector<8x128xf32>
    %cst_117 = arith.constant dense<0.000000e+00> : vector<8xf32>
    %186 = vector.multi_reduction <add>, %185, %cst_117 [1] : vector<8x128xf32> to vector<8xf32>
    %187 = vector.shape_cast %186 : vector<8xf32> to vector<8x1xf32>
    %188 = vector.broadcast %169 : vector<1x1xf32> to vector<8x1xf32>
    %189 = arith.addf %187, %188 : vector<8x1xf32>
    %c0_118 = arith.constant 0 : index
    %c0_119 = arith.constant 0 : index
    %190 = vector.load %arg9[%c0_118, %c0_119] : memref<8x1xf32, #tpu.memory_space<vmem>>, vector<8x1xf32>
    tpu.vector_store %arg9[%c0_118, %c0_119], %189 {strides = array<i32>} : memref<8x1xf32, #tpu.memory_space<vmem>>, vector<8x1xf32>,
    return
  }
  func.func @transform_0(%arg0: i32) -> (i32, i32, i32) {
    %c0_i32 = arith.constant 0 : i32
    %c0_i32_0 = arith.constant 0 : i32
    %c0_i32_1 = arith.constant 0 : i32
    return %c0_i32, %arg0, %c0_i32_0 : i32, i32, i32
  }
  func.func @transform_1(%arg0: i32) -> (i32, i32, i32) {
    %c0_i32 = arith.constant 0 : i32
    %c0_i32_0 = arith.constant 0 : i32
    %c0_i32_1 = arith.constant 0 : i32
    %c0_i32_2 = arith.constant 0 : i32
    return %c0_i32, %c0_i32_0, %c0_i32_1 : i32, i32, i32
  }
  func.func @transform_2(%arg0: i32) -> (i32, i32, i32) {
    %c0_i32 = arith.constant 0 : i32
    %c0_i32_0 = arith.constant 0 : i32
    %c0_i32_1 = arith.constant 0 : i32
    %c0_i32_2 = arith.constant 0 : i32
    return %c0_i32, %c0_i32_0, %c0_i32_1 : i32, i32, i32
  }
  func.func @transform_3(%arg0: i32) -> (i32, i32, i32) {
    %c0_i32 = arith.constant 0 : i32
    %c0_i32_0 = arith.constant 0 : i32
    %c0_i32_1 = arith.constant 0 : i32
    %c0_i32_2 = arith.constant 0 : i32
    return %c0_i32, %c0_i32_0, %c0_i32_1 : i32, i32, i32
  }
  func.func @transform_4(%arg0: i32) -> (i32, i32, i32) {
    %c0_i32 = arith.constant 0 : i32
    %c0_i32_0 = arith.constant 0 : i32
    %c0_i32_1 = arith.constant 0 : i32
    %c0_i32_2 = arith.constant 0 : i32
    return %c0_i32, %c0_i32_0, %c0_i32_1 : i32, i32, i32
  }
  func.func @transform_5(%arg0: i32) -> (i32, i32) {
    %c0_i32 = arith.constant 0 : i32
    %c0_i32_0 = arith.constant 0 : i32
    %c0_i32_1 = arith.constant 0 : i32
    return %c0_i32, %c0_i32_0 : i32, i32
  }
  func.func @transform_6(%arg0: i32) -> (i32, i32) {
    %c0_i32 = arith.constant 0 : i32
    %c0_i32_0 = arith.constant 0 : i32
    %c0_i32_1 = arith.constant 0 : i32
    return %c0_i32, %c0_i32_0 : i32, i32
  }
  func.func @transform_7(%arg0: i32) -> (i32, i32) {
    %c0_i32 = arith.constant 0 : i32
    %c0_i32_0 = arith.constant 0 : i32
    %c0_i32_1 = arith.constant 0 : i32
    return %c0_i32, %c0_i32_0 : i32, i32
  }
  func.func @transform_8(%arg0: i32) -> (i32, i32) {
    %c0_i32 = arith.constant 0 : i32
    %c0_i32_0 = arith.constant 0 : i32
    return %arg0, %c0_i32 : i32, i32
  }
}

</mosaic_0001>

<bundles_post_ra>
// kernel: tpu_custom_call.1
= control target key start
LH: loop header
LB: loop body
LE: loop exit
PB: predicated region body
PF: predicated region fallthrough
CT: control target
= control target key end

     0   :  { %13 = vsyncpa [#allocation4], 0  ;;  %s10599_s0 = inlined_call_operand.hbm [shape: bf16[6,8,256], index: 0, kind: input, shape index: {}]   ;;  %s10600_s1 = inlined_call_operand.hbm [shape: bf16[6,256,256], index: 1, kind: input, shape index: {}]   ;;  %s10601_s2 = inlined_call_operand.hbm [shape: f32[6,1,256], index: 2, kind: input, shape index: {}]   ;;  %s10602_s3 = inlined_call_operand.hbm [shape: f32[2,1,256], index: 3, kind: input, shape index: {}]   ;;  %s10603_s4 = inlined_call_operand.hbm [shape: f32[2,1,256], index: 4, kind: input, shape index: {}]   ;;  %s10604_s5 = inlined_call_operand.hbm [shape: bf16[1536,1024], index: 5, kind: input, shape index: {}]   ;;  %s10605_s6 = inlined_call_operand.hbm [shape: bf16[1024,128], index: 6, kind: input, shape index: {}]   ;;  %s10606_s7 = inlined_call_operand.hbm [shape: f32[1,1408], index: 7, kind: input, shape index: {}]   ;;  %s10607_s8 = inlined_call_operand.vmem [shape: f32[8,1], index: 8, kind: output, shape index: {}]  }
   0x1   :  { %14 = vsyncpa [#allocation6], 0 }
   0x2   :  { %15 = vsyncpa [#allocation9], 0 }
   0x3   :  { %16 = vsyncpa [#allocation12], 0 }
   0x4   :  { %17 = vsyncpa [#allocation15], 0  ;;  %s10126_s27 = smov [#allocation5]   ;;  %s9940_s9 = scalar_lea.hbm %s10600_s1, 24576 }
   0x5   :  { %s35_s28 = sshll.u32 %s10126_s27, 4  ;;  %p9941_p0 = scmp.ne.s32.totalorder %s10600_s1, %s9940_s9  ;;  %s36_s28 = int_to_ptr.vmem [resolvable:$true] %s35_s28 }
   0x6   :  { %p9944_p1 = scmp.lt.u32.totalorder %s9940_s9, %s10600_s1 }
   0x8   :  { %p9946_p2 = pnand %p9944_p1, %p9941_p0 }
   0xa   :  { %9949 = shalt.err (!%p9946_p2)
}
   0xb   :  { %s9950_s14 = scalar_lea.vmem %s36_s28, 24576  ;;  %p9955_p4 = scmp.lt.s32.totalorder %s36_s28, %s36_s28 }
   0xc   :  { %p9951_p3 = scmp.ne.s32.totalorder %s36_s28, %s9950_s14  ;;  %p9956_p5 = scmp.lt.s32.totalorder %s9950_s14, %s9950_s14 }
   0xe   :  { %p9957_p6 = por %p9956_p5, %p9955_p4 }
  0x10   :  { %p9958_p7 = pnand %p9957_p6, %p9951_p3 }
  0x12   :  { %9961 = shalt.err (!%p9958_p7)
}
  0x13   :  { %s10127_s15 = smov 128   ;;  %s10128_s16 = smov 8  }
  0x14   :  { %41 = dma.hbm_to_vmem [thread:$0]  %s10600_s1, 24576, %s36_s28, [#allocation6], %s10127_s15, %s10127_s15, %s10128_s16  }
  0x15   :  { %s10129_s19 = smov [#allocation8]   ;;  %s10130_s21 = smov [#allocation11]  }
  0x16   :  { %s59_s20 = sshll.u32 %s10129_s19, 4  ;;  %s83_s22 = sshll.u32 %s10130_s21, 4  ;;  %s60_s20 = int_to_ptr.vmem [resolvable:$true] %s59_s20  ;;  %s84_s22 = int_to_ptr.vmem [resolvable:$true] %s83_s22 }
  0x17   :  { %s9962_s25 = scalar_lea.hbm %s10602_s3, 64 }
  0x18   :  { %p9963_p8 = scmp.ne.s32.totalorder %s10602_s3, %s9962_s25  ;;  %p9966_p9 = scmp.lt.u32.totalorder %s9962_s25, %s10602_s3 }
  0x1a   :  { %p9968_p10 = pnand %p9966_p9, %p9963_p8 }
  0x1c   :  { %9971 = shalt.err (!%p9968_p10)
}
  0x1d   :  { %s9972_s1 = scalar_lea.vmem %s60_s20, 64  ;;  %p9977_p12 = scmp.lt.s32.totalorder %s60_s20, %s60_s20 }
  0x1e   :  { %p9973_p11 = scmp.ne.s32.totalorder %s60_s20, %s9972_s1  ;;  %p9978_p13 = scmp.lt.s32.totalorder %s9972_s1, %s9972_s1 }
  0x20   :  { %p9979_p0 = por %p9978_p13, %p9977_p12 }
  0x22   :  { %p9980_p1 = pnand %p9979_p0, %p9973_p11 }
  0x24   :  { %9983 = shalt.err (!%p9980_p1)
}
  0x25   :  { %s10131_s28 = smov 32   ;;  %s10132_s9 = smov 2  }
  0x26   :  { %65 = dma.hbm_to_vmem [thread:$0]  %s10602_s3, 64, %s60_s20, [#allocation9], %s10131_s28, %s10131_s28, %s10132_s9  }
  0x27   :  { %s9984_s14 = scalar_lea.hbm %s10604_s5, 98304 }
  0x28   :  { %p9985_p2 = scmp.ne.s32.totalorder %s10604_s5, %s9984_s14  ;;  %p9988_p3 = scmp.lt.u32.totalorder %s9984_s14, %s10604_s5 }
  0x2a   :  { %p9990_p4 = pnand %p9988_p3, %p9985_p2 }
  0x2c   :  { %9993 = shalt.err (!%p9990_p4)
}
  0x2d   :  { %s9994_s23 = scalar_lea.vmem %s84_s22, 98304  ;;  %p9999_p6 = scmp.lt.s32.totalorder %s84_s22, %s84_s22 }
  0x2e   :  { %p9995_p5 = scmp.ne.s32.totalorder %s84_s22, %s9994_s23  ;;  %p10000_p7 = scmp.lt.s32.totalorder %s9994_s23, %s9994_s23 }
  0x30   :  { %p10001_p8 = por %p10000_p7, %p9999_p6 }
  0x32   :  { %p10002_p9 = pnand %p10001_p8, %p9995_p5 }
  0x34   :  { %10005 = shalt.err (!%p10002_p9)
}
  0x35   :  { %s10133_s3 = smov 512   ;;  %s10134_s25 = smov [#allocation3]  }
  0x36   :  { %89 = dma.hbm_to_vmem [thread:$0]  %s10604_s5, 98304, %s84_s22, [#allocation12], %s10133_s3, %s10133_s3, %s10131_s28  }
  0x37   :  { %s23_s26 = sshll.u32 %s10134_s25, 4  ;;  %s10135_s27 = smov [#allocation7]   ;;  %s24_s26 = int_to_ptr.vmem [resolvable:$true] %s23_s26 }
  0x38   :  { %s47_s29 = sshll.u32 %s10135_s27, 4  ;;  %s10006_s10 = scalar_lea.hbm %s10599_s0, 768  ;;  %s10229_s29 = int_to_ptr.vmem [resolvable:$true] %s47_s29 }
  0x39   :  { %p10007_p10 = scmp.ne.s32.totalorder %s10599_s0, %s10006_s10  ;;  %p10010_p11 = scmp.lt.u32.totalorder %s10006_s10, %s10599_s0 }
  0x3b   :  { %p10012_p12 = pnand %p10010_p11, %p10007_p10 }
  0x3d   :  { %10015 = shalt.err (!%p10012_p12)
}
  0x3e   :  { %s10016_s5 = scalar_lea.vmem %s24_s26, 768  ;;  %p10021_p0 = scmp.lt.s32.totalorder %s24_s26, %s24_s26 }
  0x3f   :  { %p10017_p13 = scmp.ne.s32.totalorder %s24_s26, %s10016_s5  ;;  %p10022_p1 = scmp.lt.s32.totalorder %s10016_s5, %s10016_s5 }
  0x41   :  { %p10023_p2 = por %p10022_p1, %p10021_p0 }
  0x43   :  { %p10024_p3 = pnand %p10023_p2, %p10017_p13 }
  0x45   :  { %10027 = shalt.err (!%p10024_p3)
}
  0x46   :  { %29 = dma.hbm_to_vmem [thread:$0]  %s10599_s0, 768, %s24_s26, [#allocation4], %s10127_s15, %s10127_s15, %s10128_s16  }
  0x47   :  { %s10028_s21 = scalar_lea.hbm %s10601_s2, 192 }
  0x48   :  { %p10029_p4 = scmp.ne.s32.totalorder %s10601_s2, %s10028_s21  ;;  %p10032_p5 = scmp.lt.u32.totalorder %s10028_s21, %s10601_s2 }
  0x4a   :  { %p10034_p6 = pnand %p10032_p5, %p10029_p4 }
  0x4c   :  { %10037 = shalt.err (!%p10034_p6)
}
  0x4d   :  { %s10038_s25 = scalar_lea.vmem %s10229_s29, 192  ;;  %p10043_p8 = scmp.lt.s32.totalorder %s10229_s29, %s10229_s29 }
  0x4e   :  { %p10039_p7 = scmp.ne.s32.totalorder %s10229_s29, %s10038_s25  ;;  %p10044_p9 = scmp.lt.s32.totalorder %s10038_s25, %s10038_s25 }
  0x50   :  { %p10045_p10 = por %p10044_p9, %p10043_p8 }
  0x52   :  { %p10046_p11 = pnand %p10045_p10, %p10039_p7 }
  0x54   :  { %10049 = shalt.err (!%p10046_p11)
}
  0x55   :  { %53 = dma.hbm_to_vmem [thread:$0]  %s10601_s2, 192, %s10229_s29, [#allocation6], %s10131_s28, %s10131_s28, %s10132_s9  }
  0x56   :  { %s10136_s16 = smov [#allocation10]   ;;  %s10137_s27 = smov [#allocation13]  }
  0x57   :  { %s71_s26 = sshll.u32 %s10136_s16, 4  ;;  %s95_s30 = sshll.u32 %s10137_s27, 4  ;;  %s72_s26 = int_to_ptr.vmem [resolvable:$true] %s71_s26  ;;  %s10266_s30 = int_to_ptr.vmem [resolvable:$true] %s95_s30 }
  0x58   :  { %s10050_s11 = scalar_lea.hbm %s10603_s4, 64 }
  0x59   :  { %p10051_p12 = scmp.ne.s32.totalorder %s10603_s4, %s10050_s11  ;;  %p10054_p13 = scmp.lt.u32.totalorder %s10050_s11, %s10603_s4 }
  0x5b   :  { %p10056_p0 = pnand %p10054_p13, %p10051_p12 }
  0x5d   :  { %10059 = shalt.err (!%p10056_p0)
}
  0x5e   :  { %s10060_s2 = scalar_lea.vmem %s72_s26, 64  ;;  %p10065_p2 = scmp.lt.s32.totalorder %s72_s26, %s72_s26 }
  0x5f   :  { %p10061_p1 = scmp.ne.s32.totalorder %s72_s26, %s10060_s2  ;;  %p10066_p3 = scmp.lt.s32.totalorder %s10060_s2, %s10060_s2 }
  0x61   :  { %p10067_p4 = por %p10066_p3, %p10065_p2 }
  0x63   :  { %p10068_p5 = pnand %p10067_p4, %p10061_p1 }
  0x65   :  { %10071 = shalt.err (!%p10068_p5)
}
  0x66   :  { %77 = dma.hbm_to_vmem [thread:$0]  %s10603_s4, 64, %s72_s26, [#allocation9], %s10131_s28, %s10131_s28, %s10132_s9  }
  0x67   :  { %s10072_s19 = scalar_lea.hbm %s10605_s6, 8192 }
  0x68   :  { %p10073_p6 = scmp.ne.s32.totalorder %s10605_s6, %s10072_s19  ;;  %p10076_p7 = scmp.lt.u32.totalorder %s10072_s19, %s10605_s6 }
  0x6a   :  { %p10078_p8 = pnand %p10076_p7, %p10073_p6 }
  0x6c   :  { %10081 = shalt.err (!%p10078_p8)
}
  0x6d   :  { %s10082_s24 = scalar_lea.vmem %s10266_s30, 8192  ;;  %p10087_p10 = scmp.lt.s32.totalorder %s10266_s30, %s10266_s30 }
  0x6e   :  { %p10083_p9 = scmp.ne.s32.totalorder %s10266_s30, %s10082_s24  ;;  %p10088_p11 = scmp.lt.s32.totalorder %s10082_s24, %s10082_s24 }
  0x70   :  { %p10089_p12 = por %p10088_p11, %p10087_p10 }
  0x72   :  { %p10090_p13 = pnand %p10089_p12, %p10083_p9 }
  0x74   :  { %10093 = shalt.err (!%p10090_p13)
}
  0x75   :  { %s10138_s4 = smov 64   ;;  %s10139_s28 = smov 4  }
  0x76   :  { %101 = dma.hbm_to_vmem [thread:$0]  %s10605_s6, 8192, %s10266_s30, [#allocation12], %s10138_s4, %s10138_s4, %s10139_s28  }
  0x77   :  { %s10140_s0 = smov [#allocation14]   ;;  %s10094_s27 = scalar_lea.hbm %s10606_s7, 176 }
  0x78   :  { %s108_s15 = sshll.u32 %s10140_s0, 4  ;;  %p10095_p0 = scmp.ne.s32.totalorder %s10606_s7, %s10094_s27  ;;  %s109_s15 = int_to_ptr.vmem [resolvable:$true] %s108_s15 }
  0x79   :  { %p10098_p1 = scmp.lt.u32.totalorder %s10094_s27, %s10606_s7 }
  0x7b   :  { %p10100_p2 = pnand %p10098_p1, %p10095_p0 }
  0x7d   :  { %10103 = shalt.err (!%p10100_p2)
}
  0x7e   :  { %s10104_s13 = scalar_lea.vmem %s109_s15, 176  ;;  %s10108_s6 = scalar_lea.vmem %s109_s15, 192 }
  0x7f   :  { %p10105_p3 = scmp.ne.s32.totalorder %s109_s15, %s10104_s13  ;;  %p10109_p4 = scmp.lt.s32.totalorder %s109_s15, %s109_s15 }
  0x80   :  { %p10110_p5 = scmp.lt.s32.totalorder %s10108_s6, %s10104_s13 }
  0x82   :  { %p10111_p6 = por %p10110_p5, %p10109_p4 }
  0x84   :  { %p10112_p7 = pnand %p10111_p6, %p10105_p3 }
  0x86   :  { %10115 = shalt.err (!%p10112_p7)
}
  0x87   :  { %111 = dma.hbm_to_vmem [thread:$0]  %s10606_s7, 176, %s109_s15, [#allocation15]  }
  0x88   :  { %10116 = dma.done.wait [#allocation4], 768  }
  0x89   :  { %10117 = vsyncadd [#allocation4], 4294966528 }
  0x8a   :  { %10118 = dma.done.wait [#allocation6], 24768  }
  0x8b   :  { %10119 = vsyncadd [#allocation6], 4294942528 }
  0x8c   :  { %10120 = dma.done.wait [#allocation9], 128  }
  0x8d   :  { %10121 = vsyncadd [#allocation9], 4294967168 }
  0x8e   :  { %10122 = dma.done.wait [#allocation12], 106496  }
  0x8f   :  { %10123 = vsyncadd [#allocation12], 4294860800 }
  0x90   :  { %10124 = dma.done.wait [#allocation15], 176  }
  0x91   :  { %10125 = vsyncadd [#allocation15], 4294967120  ;;  %v9548_v0 = vld [vmem:[#allocation5 + $0x4] ss:$8 sps:$4 sm:$0xff]   ;;  %v9550_v1 = vld [vmem:[#allocation5] ss:$8 sps:$4 sm:$0xff]  }
  0x92   :  { %349 = vmatprep.subr.bf16.mxu0 %v9548_v0  ;;  %v9551_v2 = vld [vmem:[#allocation5 + $0x14] ss:$8 sps:$4 sm:$0xff]   ;;  %v9553_v3 = vld [vmem:[#allocation5 + $0x104] ss:$8 sps:$4 sm:$0xff]   ;;  %v9555_v4 = vld [vmem:[#allocation5 + $0x10] ss:$8 sps:$4 sm:$0xff]  }
  0x93   :  { %350 = vmatpush1.bf16.msra.mxu0 %v9550_v1  ;;  %v9556_v5 = vld [vmem:[#allocation5 + $0x100] ss:$8 sps:$4 sm:$0xff]   ;;  %v9557_v6 = vld [vmem:[#allocation5 + $0x24] ss:$8 sps:$4 sm:$0xff]   ;;  %624 = vmatprep.subr.bf16.mxu1 %v9553_v3  ;;  %v9559_v7 = vld [vmem:[#allocation5 + $0x114] ss:$8 sps:$4 sm:$0xff]  }
  0x94   :  { %351 = vmatprep.subr.bf16.mxu0 %v9551_v2  ;;  %625 = vmatpush1.bf16.msra.mxu1 %v9556_v5  ;;  %v9562_v8 = vld [vmem:[#allocation5 + $0x110] ss:$8 sps:$4 sm:$0xff]   ;;  %v9561_v9 = vld [vmem:[#allocation5 + $0x20] ss:$8 sps:$4 sm:$0xff]   ;;  %v9563_v10 = vld [vmem:[#allocation5 + $0x34] ss:$8 sps:$4 sm:$0xff]  }
  0x95   :  { %626 = vmatprep.subr.bf16.mxu1 %v9559_v7  ;;  %v9565_v11 = vld [vmem:[#allocation5 + $0x124] ss:$8 sps:$4 sm:$0xff]   ;;  %v9568_v12 = vld [vmem:[#allocation5 + $0x120] ss:$8 sps:$4 sm:$0xff]   ;;  %v9567_v13 = vld [vmem:[#allocation5 + $0x30] ss:$8 sps:$4 sm:$0xff]  }
  0x96   :  { %v9571_v14 = vld [vmem:[#allocation5 + $0x134] ss:$8 sps:$4 sm:$0xff]   ;;  %v9569_v15 = vld [vmem:[#allocation5 + $0x44] ss:$8 sps:$4 sm:$0xff]   ;;  %v9573_v16 = vld [vmem:[#allocation5 + $0x40] ss:$8 sps:$4 sm:$0xff]  }
  0x97   :  { %352 = vmatpush1.bf16.msra.mxu0 %v9555_v4  ;;  %v9574_v17 = vld [vmem:[#allocation5 + $0x130] ss:$8 sps:$4 sm:$0xff]   ;;  %v9577_v18 = vld [vmem:[#allocation5 + $0x144] ss:$8 sps:$4 sm:$0xff]   ;;  %v9575_v19 = vld [vmem:[#allocation5 + $0x54] ss:$8 sps:$4 sm:$0xff]  }
  0x98   :  { %353 = vmatprep.subr.bf16.mxu0 %v9557_v6  ;;  %627 = vmatpush1.bf16.msra.mxu1 %v9562_v8  ;;  %v9580_v20 = vld [vmem:[#allocation5 + $0x140] ss:$8 sps:$4 sm:$0xff]   ;;  %v9579_v21 = vld [vmem:[#allocation5 + $0x50] ss:$8 sps:$4 sm:$0xff]   ;;  %v9583_v22 = vld [vmem:[#allocation5 + $0x154] ss:$8 sps:$4 sm:$0xff]  }
  0x99   :  { %628 = vmatprep.subr.bf16.mxu1 %v9565_v11  ;;  %v9581_v23 = vld [vmem:[#allocation5 + $0x64] ss:$8 sps:$4 sm:$0xff]   ;;  %v9585_v24 = vld [vmem:[#allocation5 + $0x60] ss:$8 sps:$4 sm:$0xff]   ;;  %v9586_v25 = vld [vmem:[#allocation5 + $0x150] ss:$8 sps:$4 sm:$0xff]  }
  0x9a   :  { %v9589_v26 = vld [vmem:[#allocation5 + $0x164] ss:$8 sps:$4 sm:$0xff]   ;;  %v9587_v27 = vld [vmem:[#allocation5 + $0x74] ss:$8 sps:$4 sm:$0xff]   ;;  %v9592_v28 = vld [vmem:[#allocation5 + $0x160] ss:$8 sps:$4 sm:$0xff]  }
  0x9b   :  { %354 = vmatpush1.bf16.msra.mxu0 %v9561_v9  ;;  %v9591_v29 = vld [vmem:[#allocation5 + $0x70] ss:$8 sps:$4 sm:$0xff]   ;;  %v9595_v30 = vld [vmem:[#allocation5 + $0x174] ss:$8 sps:$4 sm:$0xff]   ;;  %v9593_v31 = vld [vmem:[#allocation5 + $0x84] ss:$8 sps:$4 sm:$0xff]  }
  0x9c   :  { %355 = vmatprep.subr.bf16.mxu0 %v9563_v10  ;;  %629 = vmatpush1.bf16.msra.mxu1 %v9568_v12  ;;  %v9597_v32 = vld [vmem:[#allocation5 + $0x80] ss:$8 sps:$4 sm:$0xff]   ;;  %v9598_v33 = vld [vmem:[#allocation5 + $0x170] ss:$8 sps:$4 sm:$0xff]   ;;  %v9601_v34 = vld [vmem:[#allocation5 + $0x184] ss:$8 sps:$4 sm:$0xff]  }
  0x9d   :  { %630 = vmatprep.subr.bf16.mxu1 %v9571_v14  ;;  %v9599_v35 = vld [vmem:[#allocation5 + $0x94] ss:$8 sps:$4 sm:$0xff]   ;;  %v9604_v36 = vld [vmem:[#allocation5 + $0x180] ss:$8 sps:$4 sm:$0xff]   ;;  %v9603_v37 = vld [vmem:[#allocation5 + $0x90] ss:$8 sps:$4 sm:$0xff]  }
  0x9e   :  { %v9607_v38 = vld [vmem:[#allocation5 + $0x194] ss:$8 sps:$4 sm:$0xff]   ;;  %v9605_v39 = vld [vmem:[#allocation5 + $0xa4] ss:$8 sps:$4 sm:$0xff]   ;;  %v9609_v40 = vld [vmem:[#allocation5 + $0xa0] ss:$8 sps:$4 sm:$0xff]  }
  0x9f   :  { %356 = vmatpush1.bf16.msra.mxu0 %v9567_v13  ;;  %v9610_v41 = vld [vmem:[#allocation5 + $0x190] ss:$8 sps:$4 sm:$0xff]   ;;  %v9613_v42 = vld [vmem:[#allocation5 + $0x1a4] ss:$8 sps:$4 sm:$0xff]   ;;  %v9611_v43 = vld [vmem:[#allocation5 + $0xb4] ss:$8 sps:$4 sm:$0xff]  }
  0xa0   :  { %357 = vmatprep.subr.bf16.mxu0 %v9569_v15  ;;  %631 = vmatpush1.bf16.msra.mxu1 %v9574_v17  ;;  %v137_v44 = vld [vmem:[#allocation3] sm:$0xff]  ;;  %v9616_v45 = vld [vmem:[#allocation5 + $0x1a0] ss:$8 sps:$4 sm:$0xff]   ;;  %v9617_v49 = vld [vmem:[#allocation5 + $0xc4] ss:$8 sps:$4 sm:$0xff]   ;;  %vm8271_vm0 = vcmask 7168  }
  0xa1   :  { %632 = vmatprep.subr.bf16.mxu1 %v9577_v18  ;;  %v8283_v46 = vcombine.high %v137_v44, %v137_v44  ;;  %v9615_v47 = vld [vmem:[#allocation5 + $0xb0] ss:$8 sps:$4 sm:$0xff]   ;;  %v9619_v48 = vld [vmem:[#allocation5 + $0x1b4] ss:$8 sps:$4 sm:$0xff]   ;;  %v9621_v51 = vld [vmem:[#allocation5 + $0xc0] ss:$8 sps:$4 sm:$0xff]   ;;  %v8282_v5 = vcombine.low %v137_v44, %v137_v44 }
  0xa2   :  { %v410_v50 = vld [vmem:[#allocation3 + $0x8] sm:$0xff]  ;;  %v9625_v54 = vld [vmem:[#allocation5 + $0x1c4] ss:$8 sps:$4 sm:$0xff]   ;;  %v9628_v57 = vld [vmem:[#allocation5 + $0x1c0] ss:$8 sps:$4 sm:$0xff]  }
  0xa3   :  { %358 = vmatpush1.bf16.msra.mxu0 %v9573_v16  ;;  %381 = vmatprep.mubr.bf16.mxu0 %v8283_v46  ;;  %v8318_v52 = vcombine.high %v410_v50, %v410_v50  ;;  %v9622_v53 = vld [vmem:[#allocation5 + $0x1b0] ss:$8 sps:$4 sm:$0xff]   ;;  %v9623_v55 = vld [vmem:[#allocation5 + $0xd4] ss:$8 sps:$4 sm:$0xff]   ;;  %v9629_v59 = vld [vmem:[#allocation5 + $0xe4] ss:$8 sps:$4 sm:$0xff]   ;;  %v8317_v9 = vcombine.low %v410_v50, %v410_v50 }
  0xa4   :  { %359 = vmatprep.subr.bf16.mxu0 %v9575_v19  ;;  %633 = vmatpush1.bf16.msra.mxu1 %v9580_v20  ;;  %v9627_v56 = vld [vmem:[#allocation5 + $0xd0] ss:$8 sps:$4 sm:$0xff]   ;;  %v9631_v58 = vld [vmem:[#allocation5 + $0x1d4] ss:$8 sps:$4 sm:$0xff]   ;;  %v9633_v60 = vld [vmem:[#allocation5 + $0xe0] ss:$8 sps:$4 sm:$0xff]  }
  0xa5   :  { %634 = vmatprep.subr.bf16.mxu1 %v9583_v22  ;;  %656 = vmatprep.mubr.bf16.mxu1 %v8318_v52  ;;  %v9634_v61 = vld [vmem:[#allocation5 + $0x1d0] ss:$8 sps:$4 sm:$0xff]   ;;  %v9637_v62 = vld [vmem:[#allocation5 + $0x1e4] ss:$8 sps:$4 sm:$0xff]   ;;  %v9635_v63 = vld [vmem:[#allocation5 + $0xf4] ss:$8 sps:$4 sm:$0xff]  }
  0xa6   :  { %v9639_v0 = vld [vmem:[#allocation5 + $0xf0] ss:$8 sps:$4 sm:$0xff]   ;;  %v9640_v1 = vld [vmem:[#allocation5 + $0x1e0] ss:$8 sps:$4 sm:$0xff]   ;;  %v9643_v2 = vld [vmem:[#allocation5 + $0x1f4] ss:$8 sps:$4 sm:$0xff]  }
  0xa7   :  { %360 = vmatpush1.bf16.msra.mxu0 %v9579_v21  ;;  %v9647_v3 = vld [vmem:[#allocation5 + $0x204] ss:$8 sps:$4 sm:$0xff]   ;;  %v9645_v4 = vld [vmem:[#allocation5 + $0x200] ss:$8 sps:$4 sm:$0xff]   ;;  %v9648_v6 = vld [vmem:[#allocation5 + $0x1f0] ss:$8 sps:$4 sm:$0xff]  }
  0xa8   :  { %361 = vmatprep.subr.bf16.mxu0 %v9581_v23  ;;  %635 = vmatpush1.bf16.msra.mxu1 %v9586_v25  ;;  %v9656_v7 = vld [vmem:[#allocation5 + $0x304] ss:$8 sps:$4 sm:$0xff]   ;;  %v9653_v8 = vld [vmem:[#allocation5 + $0x214] ss:$8 sps:$4 sm:$0xff]   ;;  %v9651_v10 = vld [vmem:[#allocation5 + $0x210] ss:$8 sps:$4 sm:$0xff]  }
  0xa9   :  { %636 = vmatprep.subr.bf16.mxu1 %v9589_v26  ;;  %v9654_v11 = vld [vmem:[#allocation5 + $0x300] ss:$8 sps:$4 sm:$0xff]   ;;  %v9662_v12 = vld [vmem:[#allocation5 + $0x314] ss:$8 sps:$4 sm:$0xff]   ;;  %v9659_v13 = vld [vmem:[#allocation5 + $0x224] ss:$8 sps:$4 sm:$0xff]  }
  0xaa   :  { %v9657_v14 = vld [vmem:[#allocation5 + $0x220] ss:$8 sps:$4 sm:$0xff]   ;;  %v9660_v15 = vld [vmem:[#allocation5 + $0x310] ss:$8 sps:$4 sm:$0xff]   ;;  %v9668_v16 = vld [vmem:[#allocation5 + $0x324] ss:$8 sps:$4 sm:$0xff]  }
  0xab   :  { %362 = vmatpush1.bf16.msra.mxu0 %v9585_v24  ;;  %v9665_v17 = vld [vmem:[#allocation5 + $0x234] ss:$8 sps:$4 sm:$0xff]   ;;  %v9663_v18 = vld [vmem:[#allocation5 + $0x230] ss:$8 sps:$4 sm:$0xff]   ;;  %v9666_v19 = vld [vmem:[#allocation5 + $0x320] ss:$8 sps:$4 sm:$0xff]  }
  0xac   :  { %363 = vmatprep.subr.bf16.mxu0 %v9587_v27  ;;  %637 = vmatpush1.bf16.msra.mxu1 %v9592_v28  ;;  %v9674_v20 = vld [vmem:[#allocation5 + $0x334] ss:$8 sps:$4 sm:$0xff]   ;;  %v9671_v21 = vld [vmem:[#allocation5 + $0x244] ss:$8 sps:$4 sm:$0xff]   ;;  %v9669_v22 = vld [vmem:[#allocation5 + $0x240] ss:$8 sps:$4 sm:$0xff]  }
  0xad   :  { %638 = vmatprep.subr.bf16.mxu1 %v9595_v30  ;;  %v9672_v23 = vld [vmem:[#allocation5 + $0x330] ss:$8 sps:$4 sm:$0xff]   ;;  %v9680_v24 = vld [vmem:[#allocation5 + $0x344] ss:$8 sps:$4 sm:$0xff]   ;;  %v9677_v25 = vld [vmem:[#allocation5 + $0x254] ss:$8 sps:$4 sm:$0xff]  }
  0xae   :  { %v9675_v26 = vld [vmem:[#allocation5 + $0x250] ss:$8 sps:$4 sm:$0xff]   ;;  %v9678_v27 = vld [vmem:[#allocation5 + $0x340] ss:$8 sps:$4 sm:$0xff]   ;;  %v9686_v28 = vld [vmem:[#allocation5 + $0x354] ss:$8 sps:$4 sm:$0xff]  }
  0xaf   :  { %364 = vmatpush1.bf16.msra.mxu0 %v9591_v29  ;;  %v9683_v29 = vld [vmem:[#allocation5 + $0x264] ss:$8 sps:$4 sm:$0xff]   ;;  %v9702_v46 = vld [vmem:[#allocation5 + $0x380] ss:$8 sps:$4 sm:$0xff]   ;;  %v9708_v50 = vld [vmem:[#allocation5 + $0x390] ss:$8 sps:$4 sm:$0xff]  }
  0xb0   :  { %365 = vmatprep.subr.bf16.mxu0 %v9593_v31  ;;  %639 = vmatpush1.bf16.msra.mxu1 %v9598_v33  ;;  %v10312_v30 = vld [vmem:[#allocation3 + $0x10] sm:$0xff] }
  0xb1   :  { %640 = vmatprep.subr.bf16.mxu1 %v9601_v34  ;;  %v8353_v31 = vcombine.high %v10312_v30, %v10312_v30  ;;  %v9681_v33 = vld [vmem:[#allocation5 + $0x260] ss:$8 sps:$4 sm:$0xff]   ;;  %v9692_v34 = vld [vmem:[#allocation5 + $0x364] ss:$8 sps:$4 sm:$0xff]  }
  0xb2   :  { %v9704_v44 = vld [vmem:[#allocation5 + $0x384] ss:$8 sps:$4 sm:$0xff]  }
  0xb3   :  { %366 = vmatpush1.bf16.msra.mxu0 %v9597_v32  ;;  %v9684_v32 = vld [vmem:[#allocation5 + $0x350] ss:$8 sps:$4 sm:$0xff]   ;;  %v9716_v52 = vld [vmem:[#allocation5 + $0x3a4] ss:$8 sps:$4 sm:$0xff]  }
  0xb4   :  { %367 = vmatprep.subr.bf16.mxu0 %v9599_v35  ;;  %641 = vmatpush1.bf16.msra.mxu1 %v9604_v36  ;;  %v10316_v35 = vld [vmem:[#allocation3 + $0x18] sm:$0xff]  ;;  %v9689_v36 = vld [vmem:[#allocation5 + $0x274] ss:$8 sps:$4 sm:$0xff]  }
  0xb5   :  { %642 = vmatprep.subr.bf16.mxu1 %v9607_v38  ;;  %v9690_v38 = vld [vmem:[#allocation5 + $0x360] ss:$8 sps:$4 sm:$0xff]  }
  0xb7   :  { %368 = vmatpush1.bf16.msra.mxu0 %v9603_v37  ;;  %v8388_v37 = vcombine.high %v10316_v35, %v10316_v35 }
  0xb8   :  { %369 = vmatprep.subr.bf16.mxu0 %v9605_v39  ;;  %643 = vmatpush1.bf16.msra.mxu1 %v9610_v41  ;;  %v9687_v39 = vld [vmem:[#allocation5 + $0x270] ss:$8 sps:$4 sm:$0xff]   ;;  %v9695_v41 = vld [vmem:[#allocation5 + $0x284] ss:$8 sps:$4 sm:$0xff]  }
  0xb9   :  { %644 = vmatprep.subr.bf16.mxu1 %v9613_v42  ;;  %v9696_v42 = vld [vmem:[#allocation5 + $0x370] ss:$8 sps:$4 sm:$0xff]  }
  0xbb   :  { %370 = vmatpush1.bf16.msra.mxu0 %v9609_v40  ;;  %v9698_v40 = vld [vmem:[#allocation5 + $0x374] ss:$8 sps:$4 sm:$0xff]  }
  0xbc   :  { %371 = vmatprep.subr.bf16.mxu0 %v9611_v43  ;;  %645 = vmatpush1.bf16.msra.mxu1 %v9616_v45  ;;  %v9693_v43 = vld [vmem:[#allocation5 + $0x280] ss:$8 sps:$4 sm:$0xff]   ;;  %v9701_v45 = vld [vmem:[#allocation5 + $0x294] ss:$8 sps:$4 sm:$0xff]  }
  0xbd   :  { %646 = vmatprep.subr.bf16.mxu1 %v9619_v48  ;;  %v9710_v48 = vld [vmem:[#allocation5 + $0x394] ss:$8 sps:$4 sm:$0xff]  }
  0xbf   :  { %372 = vmatpush1.bf16.msra.mxu0 %v9615_v47  ;;  %v9699_v47 = vld [vmem:[#allocation5 + $0x290] ss:$8 sps:$4 sm:$0xff]  }
  0xc0   :  { %373 = vmatprep.subr.bf16.mxu0 %v9617_v49  ;;  %647 = vmatpush1.bf16.msra.mxu1 %v9622_v53  ;;  %v9707_v49 = vld [vmem:[#allocation5 + $0x2a4] ss:$8 sps:$4 sm:$0xff]   ;;  %v9713_v53 = vld [vmem:[#allocation5 + $0x2b4] ss:$8 sps:$4 sm:$0xff]  }
  0xc1   :  { %648 = vmatprep.subr.bf16.mxu1 %v9625_v54  ;;  %v9714_v54 = vld [vmem:[#allocation5 + $0x3a0] ss:$8 sps:$4 sm:$0xff]  }
  0xc3   :  { %374 = vmatpush1.bf16.msra.mxu0 %v9621_v51  ;;  %v9705_v51 = vld [vmem:[#allocation5 + $0x2a0] ss:$8 sps:$4 sm:$0xff]  }
  0xc4   :  { %375 = vmatprep.subr.bf16.mxu0 %v9623_v55  ;;  %649 = vmatpush1.bf16.msra.mxu1 %v9628_v57  ;;  %v9711_v55 = vld [vmem:[#allocation5 + $0x2b0] ss:$8 sps:$4 sm:$0xff]   ;;  %v9719_v57 = vld [vmem:[#allocation5 + $0x2c4] ss:$8 sps:$4 sm:$0xff]  }
  0xc5   :  { %650 = vmatprep.subr.bf16.mxu1 %v9631_v58  ;;  %v9720_v58 = vld [vmem:[#allocation5 + $0x3b0] ss:$8 sps:$4 sm:$0xff]  }
  0xc7   :  { %376 = vmatpush1.bf16.msra.mxu0 %v9627_v56  ;;  %v9722_v56 = vld [vmem:[#allocation5 + $0x3b4] ss:$8 sps:$4 sm:$0xff]  }
  0xc8   :  { %377 = vmatprep.subr.bf16.mxu0 %v9629_v59  ;;  %651 = vmatpush1.bf16.msra.mxu1 %v9634_v61  ;;  %v9717_v59 = vld [vmem:[#allocation5 + $0x2c0] ss:$8 sps:$4 sm:$0xff]   ;;  %v9725_v61 = vld [vmem:[#allocation5 + $0x2d4] ss:$8 sps:$4 sm:$0xff]  }
  0xc9   :  { %652 = vmatprep.subr.bf16.mxu1 %v9637_v62  ;;  %v9726_v62 = vld [vmem:[#allocation5 + $0x3c0] ss:$8 sps:$4 sm:$0xff]  }
  0xcb   :  { %378 = vmatpush1.bf16.msra.mxu0 %v9633_v60  ;;  %v9728_v60 = vld [vmem:[#allocation5 + $0x3c4] ss:$8 sps:$4 sm:$0xff]  }
  0xcc   :  { %379 = vmatprep.subr.bf16.mxu0 %v9635_v63  ;;  %653 = vmatpush1.bf16.msra.mxu1 %v9640_v1  ;;  %v9723_v63 = vld [vmem:[#allocation5 + $0x2d0] ss:$8 sps:$4 sm:$0xff]   ;;  %v9731_v1 = vld [vmem:[#allocation5 + $0x2e4] ss:$8 sps:$4 sm:$0xff]  }
  0xcd   :  { %654 = vmatprep.subr.bf16.mxu1 %v9643_v2  ;;  %v9732_v2 = vld [vmem:[#allocation5 + $0x3d0] ss:$8 sps:$4 sm:$0xff]  }
  0xcf   :  { %380 = vmatpush1.bf16.msra.mxu0 %v9639_v0  ;;  %v9734_v0 = vld [vmem:[#allocation5 + $0x3d4] ss:$8 sps:$4 sm:$0xff]  }
  0xd0   :  { %899 = vmatprep.subr.bf16.mxu0 %v9647_v3  ;;  %655 = vmatpush1.bf16.msra.mxu1 %v9648_v6  ;;  %v9729_v3 = vld [vmem:[#allocation5 + $0x2e0] ss:$8 sps:$4 sm:$0xff]  }
  0xd1   :  { %1174 = vmatprep.subr.bf16.mxu1 %v9656_v7  ;;  %v9738_v6 = vld [vmem:[#allocation5 + $0x3e0] ss:$8 sps:$4 sm:$0xff]   ;;  %v9735_v7 = vld [vmem:[#allocation5 + $0x2f0] ss:$8 sps:$4 sm:$0xff]  }
  0xd2   :  { %382 = vmatmul.mubr.bf16.vlgmr.msra.gmra.mrb[0].mxu0 %v8282_v5  ;;  %v9737_v5 = vld [vmem:[#allocation5 + $0x2f4] ss:$8 sps:$4 sm:$0xff]  }
  0xd3   :  { %900 = vmatpush1.bf16.msra.mxu0 %v9645_v4  ;;  %657 = vmatmul.mubr.bf16.vlgmr.msra.gmra.mrb[0].mxu1 %v8317_v9  ;;  %v9740_v4 = vld [vmem:[#allocation5 + $0x3e4] ss:$8 sps:$4 sm:$0xff]  }
  0xd4   :  { %901 = vmatprep.subr.bf16.mxu0 %v9653_v8  ;;  %1175 = vmatpush1.bf16.msra.mxu1 %v9654_v11  ;;  %v9745_v8 = vld [vmem:[#allocation5 + $0x3f4] ss:$8 sps:$4 sm:$0xff]   ;;  %v9748_v9 = vld [vmem:[#allocation5 + $0x404] ss:$8 sps:$4 sm:$0xff]   ;;  %v9743_v11 = vld [vmem:[#allocation5 + $0x3f0] ss:$8 sps:$4 sm:$0xff]  }
  0xd5   :  { %1176 = vmatprep.subr.bf16.mxu1 %v9662_v12  ;;  %931 = vmatprep.mubr.bf16.mxu0 %v8353_v31  ;;  %v9746_v12 = vld [vmem:[#allocation5 + $0x400] ss:$8 sps:$4 sm:$0xff]   ;;  %v9771_v31 = vld [vmem:[#allocation5 + $0x444] ss:$8 sps:$4 sm:$0xff]  }
  0xd6   :  { %1206 = vmatprep.mubr.bf16.mxu1 %v8388_v37  ;;  %v9775_v37 = vld [vmem:[#allocation5 + $0x450] ss:$8 sps:$4 sm:$0xff]  }
  0xd7   :  { %902 = vmatpush1.bf16.msra.mxu0 %v9651_v10  ;;  %v8352_v10 = vcombine.low %v10312_v30, %v10312_v30  ;;  %v9774_v30 = vld [vmem:[#allocation5 + $0x534] ss:$8 sps:$4 sm:$0xff]  }
  0xd8   :  { %903 = vmatprep.subr.bf16.mxu0 %v9659_v13  ;;  %1177 = vmatpush1.bf16.msra.mxu1 %v9660_v15  ;;  %v9753_v13 = vld [vmem:[#allocation5 + $0x414] ss:$8 sps:$4 sm:$0xff]  }
  0xd9   :  { %1178 = vmatprep.subr.bf16.mxu1 %v9668_v16  ;;  %v10322_v15 = vld [vmem:[#allocation3 + $0x20] sm:$0xff]  ;;  %v8387_v16 = vcombine.low %v10316_v35, %v10316_v35 }
  0xda   :  { %v9777_v35 = vld [vmem:[#allocation5 + $0x454] ss:$8 sps:$4 sm:$0xff]  }
  0xdb   :  { %904 = vmatpush1.bf16.msra.mxu0 %v9657_v14  ;;  %v9756_v14 = vld [vmem:[#allocation5 + $0x504] ss:$8 sps:$4 sm:$0xff]  }
  0xdc   :  { %905 = vmatprep.subr.bf16.mxu0 %v9665_v17  ;;  %1179 = vmatpush1.bf16.msra.mxu1 %v9666_v19  ;;  %v8423_v17 = vcombine.high %v10322_v15, %v10322_v15  ;;  %v9754_v19 = vld [vmem:[#allocation5 + $0x500] ss:$8 sps:$4 sm:$0xff]  }
  0xdd   :  { %1180 = vmatprep.subr.bf16.mxu1 %v9674_v20 }
  0xdf   :  { %906 = vmatpush1.bf16.msra.mxu0 %v9663_v18  ;;  %v10328_v18 = vld [vmem:[#allocation3 + $0x28] sm:$0xff] }
  0xe0   :  { %907 = vmatprep.subr.bf16.mxu0 %v9671_v21  ;;  %1181 = vmatpush1.bf16.msra.mxu1 %v9672_v23  ;;  %v8458_v20 = vcombine.high %v10328_v18, %v10328_v18  ;;  %v9751_v21 = vld [vmem:[#allocation5 + $0x410] ss:$8 sps:$4 sm:$0xff]   ;;  %v9759_v23 = vld [vmem:[#allocation5 + $0x424] ss:$8 sps:$4 sm:$0xff]  }
  0xe1   :  { %1182 = vmatprep.subr.bf16.mxu1 %v9680_v24  ;;  %v9760_v24 = vld [vmem:[#allocation5 + $0x510] ss:$8 sps:$4 sm:$0xff]  }
  0xe3   :  { %908 = vmatpush1.bf16.msra.mxu0 %v9669_v22  ;;  %v9762_v22 = vld [vmem:[#allocation5 + $0x514] ss:$8 sps:$4 sm:$0xff]  }
  0xe4   :  { %909 = vmatprep.subr.bf16.mxu0 %v9677_v25  ;;  %1183 = vmatpush1.bf16.msra.mxu1 %v9678_v27  ;;  %v9757_v25 = vld [vmem:[#allocation5 + $0x420] ss:$8 sps:$4 sm:$0xff]   ;;  %v9765_v27 = vld [vmem:[#allocation5 + $0x434] ss:$8 sps:$4 sm:$0xff]  }
  0xe5   :  { %1184 = vmatprep.subr.bf16.mxu1 %v9686_v28  ;;  %v9766_v28 = vld [vmem:[#allocation5 + $0x520] ss:$8 sps:$4 sm:$0xff]  }
  0xe7   :  { %910 = vmatpush1.bf16.msra.mxu0 %v9675_v26  ;;  %v9768_v26 = vld [vmem:[#allocation5 + $0x524] ss:$8 sps:$4 sm:$0xff]  }
  0xe8   :  { %911 = vmatprep.subr.bf16.mxu0 %v9683_v29  ;;  %1185 = vmatpush1.bf16.msra.mxu1 %v9684_v32  ;;  %v9763_v29 = vld [vmem:[#allocation5 + $0x430] ss:$8 sps:$4 sm:$0xff]  }
  0xe9   :  { %1186 = vmatprep.subr.bf16.mxu1 %v9692_v34  ;;  %v9772_v32 = vld [vmem:[#allocation5 + $0x530] ss:$8 sps:$4 sm:$0xff]   ;;  %v9780_v34 = vld [vmem:[#allocation5 + $0x544] ss:$8 sps:$4 sm:$0xff]  }
  0xeb   :  { %912 = vmatpush1.bf16.msra.mxu0 %v9681_v33  ;;  %v9769_v33 = vld [vmem:[#allocation5 + $0x440] ss:$8 sps:$4 sm:$0xff]  }
  0xec   :  { %913 = vmatprep.subr.bf16.mxu0 %v9689_v36  ;;  %1187 = vmatpush1.bf16.msra.mxu1 %v9690_v38  ;;  %v9778_v36 = vld [vmem:[#allocation5 + $0x540] ss:$8 sps:$4 sm:$0xff]   ;;  %v9783_v38 = vld [vmem:[#allocation5 + $0x464] ss:$8 sps:$4 sm:$0xff]  }
  0xed   :  { %1188 = vmatprep.subr.bf16.mxu1 %v9698_v40  ;;  %v9781_v40 = vld [vmem:[#allocation5 + $0x460] ss:$8 sps:$4 sm:$0xff]  }
  0xef   :  { %914 = vmatpush1.bf16.msra.mxu0 %v9687_v39  ;;  %v9786_v39 = vld [vmem:[#allocation5 + $0x554] ss:$8 sps:$4 sm:$0xff]  }
  0xf0   :  { %915 = vmatprep.subr.bf16.mxu0 %v9695_v41  ;;  %1189 = vmatpush1.bf16.msra.mxu1 %v9696_v42  ;;  %v9784_v41 = vld [vmem:[#allocation5 + $0x550] ss:$8 sps:$4 sm:$0xff]   ;;  %v9789_v42 = vld [vmem:[#allocation5 + $0x474] ss:$8 sps:$4 sm:$0xff]  }
  0xf1   :  { %1190 = vmatprep.subr.bf16.mxu1 %v9704_v44  ;;  %v9787_v44 = vld [vmem:[#allocation5 + $0x470] ss:$8 sps:$4 sm:$0xff]  }
  0xf3   :  { %916 = vmatpush1.bf16.msra.mxu0 %v9693_v43  ;;  %v9792_v43 = vld [vmem:[#allocation5 + $0x564] ss:$8 sps:$4 sm:$0xff]  }
  0xf4   :  { %917 = vmatprep.subr.bf16.mxu0 %v9701_v45  ;;  %1191 = vmatpush1.bf16.msra.mxu1 %v9702_v46  ;;  %v9790_v45 = vld [vmem:[#allocation5 + $0x560] ss:$8 sps:$4 sm:$0xff]   ;;  %v9795_v46 = vld [vmem:[#allocation5 + $0x484] ss:$8 sps:$4 sm:$0xff]  }
  0xf5   :  { %1192 = vmatprep.subr.bf16.mxu1 %v9710_v48  ;;  %v9793_v48 = vld [vmem:[#allocation5 + $0x480] ss:$8 sps:$4 sm:$0xff]  }
  0xf7   :  { %918 = vmatpush1.bf16.msra.mxu0 %v9699_v47  ;;  %v9798_v47 = vld [vmem:[#allocation5 + $0x574] ss:$8 sps:$4 sm:$0xff]  }
  0xf8   :  { %919 = vmatprep.subr.bf16.mxu0 %v9707_v49  ;;  %1193 = vmatpush1.bf16.msra.mxu1 %v9708_v50  ;;  %v9796_v49 = vld [vmem:[#allocation5 + $0x570] ss:$8 sps:$4 sm:$0xff]   ;;  %v9801_v50 = vld [vmem:[#allocation5 + $0x494] ss:$8 sps:$4 sm:$0xff]  }
  0xf9   :  { %1194 = vmatprep.subr.bf16.mxu1 %v9716_v52  ;;  %v9799_v52 = vld [vmem:[#allocation5 + $0x490] ss:$8 sps:$4 sm:$0xff]  }
  0xfb   :  { %920 = vmatpush1.bf16.msra.mxu0 %v9705_v51  ;;  %v9804_v51 = vld [vmem:[#allocation5 + $0x584] ss:$8 sps:$4 sm:$0xff]  }
  0xfc   :  { %921 = vmatprep.subr.bf16.mxu0 %v9713_v53  ;;  %1195 = vmatpush1.bf16.msra.mxu1 %v9714_v54  ;;  %v9802_v53 = vld [vmem:[#allocation5 + $0x580] ss:$8 sps:$4 sm:$0xff]   ;;  %v9807_v54 = vld [vmem:[#allocation5 + $0x4a4] ss:$8 sps:$4 sm:$0xff]  }
  0xfd   :  { %1196 = vmatprep.subr.bf16.mxu1 %v9722_v56  ;;  %v9805_v56 = vld [vmem:[#allocation5 + $0x4a0] ss:$8 sps:$4 sm:$0xff]  }
  0xff   :  { %922 = vmatpush1.bf16.msra.mxu0 %v9711_v55  ;;  %v9810_v55 = vld [vmem:[#allocation5 + $0x594] ss:$8 sps:$4 sm:$0xff]  }
 0x100   :  { %923 = vmatprep.subr.bf16.mxu0 %v9719_v57  ;;  %1197 = vmatpush1.bf16.msra.mxu1 %v9720_v58  ;;  %v9808_v57 = vld [vmem:[#allocation5 + $0x590] ss:$8 sps:$4 sm:$0xff]   ;;  %v9813_v58 = vld [vmem:[#allocation5 + $0x4b4] ss:$8 sps:$4 sm:$0xff]  }
 0x101   :  { %1198 = vmatprep.subr.bf16.mxu1 %v9728_v60  ;;  %v9811_v60 = vld [vmem:[#allocation5 + $0x4b0] ss:$8 sps:$4 sm:$0xff]  }
 0x103   :  { %924 = vmatpush1.bf16.msra.mxu0 %v9717_v59  ;;  %v9816_v59 = vld [vmem:[#allocation5 + $0x5a4] ss:$8 sps:$4 sm:$0xff]  }
 0x104   :  { %925 = vmatprep.subr.bf16.mxu0 %v9725_v61  ;;  %1199 = vmatpush1.bf16.msra.mxu1 %v9726_v62  ;;  %v9814_v61 = vld [vmem:[#allocation5 + $0x5a0] ss:$8 sps:$4 sm:$0xff]   ;;  %v9819_v62 = vld [vmem:[#allocation5 + $0x4c4] ss:$8 sps:$4 sm:$0xff]  }
 0x105   :  { %1200 = vmatprep.subr.bf16.mxu1 %v9734_v0  ;;  %v9817_v0 = vld [vmem:[#allocation5 + $0x4c0] ss:$8 sps:$4 sm:$0xff]  }
 0x107   :  { %926 = vmatpush1.bf16.msra.mxu0 %v9723_v63  ;;  %v9822_v63 = vld [vmem:[#allocation5 + $0x5b4] ss:$8 sps:$4 sm:$0xff]  }
 0x108   :  { %927 = vmatprep.subr.bf16.mxu0 %v9731_v1  ;;  %1201 = vmatpush1.bf16.msra.mxu1 %v9732_v2  ;;  %v9820_v1 = vld [vmem:[#allocation5 + $0x5b0] ss:$8 sps:$4 sm:$0xff]   ;;  %v9825_v2 = vld [vmem:[#allocation5 + $0x4d4] ss:$8 sps:$4 sm:$0xff]  }
 0x109   :  { %1202 = vmatprep.subr.bf16.mxu1 %v9740_v4  ;;  %v9823_v4 = vld [vmem:[#allocation5 + $0x4d0] ss:$8 sps:$4 sm:$0xff]  }
 0x10b   :  { %928 = vmatpush1.bf16.msra.mxu0 %v9729_v3  ;;  %v9828_v3 = vld [vmem:[#allocation5 + $0x5c4] ss:$8 sps:$4 sm:$0xff]  }
 0x10c   :  { %929 = vmatprep.subr.bf16.mxu0 %v9737_v5  ;;  %1203 = vmatpush1.bf16.msra.mxu1 %v9738_v6  ;;  %v9826_v5 = vld [vmem:[#allocation5 + $0x5c0] ss:$8 sps:$4 sm:$0xff]   ;;  %v9831_v6 = vld [vmem:[#allocation5 + $0x4e4] ss:$8 sps:$4 sm:$0xff]  }
 0x10d   :  { %1204 = vmatprep.subr.bf16.mxu1 %v9745_v8  ;;  %v9829_v8 = vld [vmem:[#allocation5 + $0x4e0] ss:$8 sps:$4 sm:$0xff]  }
 0x10f   :  { %930 = vmatpush1.bf16.msra.mxu0 %v9735_v7  ;;  %v9834_v7 = vld [vmem:[#allocation5 + $0x5d4] ss:$8 sps:$4 sm:$0xff]  }
 0x110   :  { %1449 = vmatprep.subr.bf16.mxu0 %v9748_v9  ;;  %1205 = vmatpush1.bf16.msra.mxu1 %v9743_v11  ;;  %v9832_v9 = vld [vmem:[#allocation5 + $0x5d0] ss:$8 sps:$4 sm:$0xff]   ;;  %v9840_v11 = vld [vmem:[#allocation5 + $0x5e4] ss:$8 sps:$4 sm:$0xff]  }
 0x111   :  { %1769 = vmatprep.subr.bf16.mxu1 %v9756_v14  ;;  %v9838_v14 = vld [vmem:[#allocation5 + $0x5e0] ss:$8 sps:$4 sm:$0xff]  }
 0x112   :  { %932 = vmatmul.mubr.bf16.vlgmr.msra.gmra.mrb[4].mxu0 %v8352_v10  ;;  %v9837_v10 = vld [vmem:[#allocation5 + $0x4f4] ss:$8 sps:$4 sm:$0xff]  }
 0x113   :  { %1450 = vmatpush1.bf16.msra.mxu0 %v9746_v12  ;;  %1481 = vmatprep.mubr.bf16.mxu0 %v8423_v17  ;;  %v1885_v12 = vld [vmem:[#allocation11] sm:$0xff] }
 0x114   :  { %1451 = vmatprep.subr.bf16.mxu0 %v9753_v13  ;;  %1207 = vmatmul.mubr.bf16.vlgmr.msra.gmra.mrb[4].mxu1 %v8387_v16  ;;  %v1889_v13 = vld [vmem:[#allocation11 + $0x20] sm:$0xff] }
 0x115   :  { %1770 = vmatpush1.bf16.msra.mxu1 %v9754_v19  ;;  %1801 = vmatprep.mubr.bf16.mxu1 %v8458_v20  ;;  %v9835_v16 = vld [vmem:[#allocation5 + $0x4f0] ss:$8 sps:$4 sm:$0xff]   ;;  %v9845_v17 = vld [vmem:[#allocation5 + $0x5f4] ss:$8 sps:$4 sm:$0xff]  }
 0x116   :  { %1771 = vmatprep.subr.bf16.mxu1 %v9762_v22  ;;  %v1886_v19 = vld [vmem:[#allocation11 + $0x8] sm:$0xff]  ;;  %v1897_v22 = vld [vmem:[#allocation11 + $0x60] sm:$0xff] }
 0x117   :  { %1452 = vmatpush1.bf16.msra.mxu0 %v9751_v21  ;;  %v1890_v20 = vld [vmem:[#allocation11 + $0x28] sm:$0xff]  ;;  %v1893_v21 = vld [vmem:[#allocation11 + $0x40] sm:$0xff] }
 0x118   :  { %1453 = vmatprep.subr.bf16.mxu0 %v9759_v23  ;;  %v8505_v23 = vcombine.high %v1885_v12, %v1889_v13 }
 0x119   :  { %1772 = vmatpush1.bf16.msra.mxu1 %v9760_v24  ;;  %v8422_v24 = vcombine.low %v10322_v15, %v10322_v15  ;;  %v8512_v15 = vcombine.low %v1893_v21, %v1897_v22 }
 0x11a   :  { %1773 = vmatprep.subr.bf16.mxu1 %v9768_v26  ;;  %v1894_v26 = vld [vmem:[#allocation11 + $0x48] sm:$0xff] }
 0x11b   :  { %1454 = vmatpush1.bf16.msra.mxu0 %v9757_v25  ;;  %v9843_v25 = vld [vmem:[#allocation5 + $0x5f0] ss:$8 sps:$4 sm:$0xff]  }
 0x11c   :  { %1455 = vmatprep.subr.bf16.mxu0 %v9765_v27  ;;  %v1898_v27 = vld [vmem:[#allocation11 + $0x68] sm:$0xff] }
 0x11d   :  { %1774 = vmatpush1.bf16.msra.mxu1 %v9766_v28  ;;  %v8504_v28 = vcombine.low %v1885_v12, %v1889_v13  ;;  %v1942_v12 = vld [vmem:[#allocation11 + $0x1c8] sm:$0xff] }
 0x11e   :  { %1775 = vmatprep.subr.bf16.mxu1 %v9774_v30  ;;  %v1901_v30 = vld [vmem:[#allocation11 + $0x80] sm:$0xff]  ;;  %v1946_v13 = vld [vmem:[#allocation11 + $0x1e8] sm:$0xff] }
 0x11f   :  { %1456 = vmatpush1.bf16.msra.mxu0 %v9763_v29  ;;  %v8507_v29 = vcombine.high %v1886_v19, %v1890_v20 }
 0x120   :  { %1457 = vmatprep.subr.bf16.mxu0 %v9771_v31  ;;  %v1905_v31 = vld [vmem:[#allocation11 + $0xa0] sm:$0xff] }
 0x121   :  { %1776 = vmatpush1.bf16.msra.mxu1 %v9772_v32  ;;  %v8513_v32 = vcombine.high %v1893_v21, %v1897_v22  ;;  %v1950_v22 = vld [vmem:[#allocation11 + $0x208] sm:$0xff] }
 0x122   :  { %1777 = vmatprep.subr.bf16.mxu1 %v9780_v34  ;;  %v8506_v34 = vcombine.low %v1886_v19, %v1890_v20  ;;  %v8563_v20 = vcombine.high %v1942_v12, %v1946_v13 }
 0x123   :  { %1458 = vmatpush1.bf16.msra.mxu0 %v9769_v33  ;;  %v8457_v33 = vcombine.low %v10328_v18, %v10328_v18  ;;  %v8520_v18 = vcombine.low %v1901_v30, %v1905_v31 }
 0x124   :  { %1459 = vmatprep.subr.bf16.mxu0 %v9777_v35  ;;  %v1902_v35 = vld [vmem:[#allocation11 + $0x88] sm:$0xff] }
 0x125   :  { %1778 = vmatpush1.bf16.msra.mxu1 %v9778_v36  ;;  %v1906_v36 = vld [vmem:[#allocation11 + $0xa8] sm:$0xff] }
 0x126   :  { %1779 = vmatprep.subr.bf16.mxu1 %v9786_v39  ;;  %v1913_v39 = vld [vmem:[#allocation11 + $0xe0] sm:$0xff] }
 0x127   :  { %1460 = vmatpush1.bf16.msra.mxu0 %v9775_v37  ;;  %v8515_v37 = vcombine.high %v1894_v26, %v1898_v27 }
 0x128   :  { %1461 = vmatprep.subr.bf16.mxu0 %v9783_v38  ;;  %v1909_v38 = vld [vmem:[#allocation11 + $0xc0] sm:$0xff] }
 0x129   :  { %1780 = vmatpush1.bf16.msra.mxu1 %v9784_v41  ;;  %v8514_v41 = vcombine.low %v1894_v26, %v1898_v27  ;;  %v8562_v26 = vcombine.low %v1942_v12, %v1946_v13  ;;  %v2006_v12 = vld [vmem:[#allocation11 + $0x3c8] sm:$0xff] }
 0x12a   :  { %1781 = vmatprep.subr.bf16.mxu1 %v9792_v43  ;;  %v1914_v43 = vld [vmem:[#allocation11 + $0xe8] sm:$0xff] }
 0x12b   :  { %1462 = vmatpush1.bf16.msra.mxu0 %v9781_v40  ;;  %v8521_v40 = vcombine.high %v1901_v30, %v1905_v31  ;;  %v1958_v30 = vld [vmem:[#allocation11 + $0x248] sm:$0xff] }
 0x12c   :  { %1463 = vmatprep.subr.bf16.mxu0 %v9789_v42  ;;  %v1910_v42 = vld [vmem:[#allocation11 + $0xc8] sm:$0xff] }
 0x12d   :  { %1782 = vmatpush1.bf16.msra.mxu1 %v9790_v45  ;;  %v1917_v45 = vld [vmem:[#allocation11 + $0x100] sm:$0xff]  ;;  %v1962_v31 = vld [vmem:[#allocation11 + $0x268] sm:$0xff] }
 0x12e   :  { %1783 = vmatprep.subr.bf16.mxu1 %v9798_v47  ;;  %v8529_v47 = vcombine.high %v1909_v38, %v1913_v39  ;;  %v2010_v13 = vld [vmem:[#allocation11 + $0x3e8] sm:$0xff] }
 0x12f   :  { %1464 = vmatpush1.bf16.msra.mxu0 %v9787_v44  ;;  %v8523_v44 = vcombine.high %v1902_v35, %v1906_v36 }
 0x130   :  { %1465 = vmatprep.subr.bf16.mxu0 %v9795_v46  ;;  %v1921_v46 = vld [vmem:[#allocation11 + $0x120] sm:$0xff] }
 0x131   :  { %1784 = vmatpush1.bf16.msra.mxu1 %v9796_v49  ;;  %v1918_v49 = vld [vmem:[#allocation11 + $0x108] sm:$0xff] }
 0x132   :  { %1785 = vmatprep.subr.bf16.mxu1 %v9804_v51  ;;  %v8528_v51 = vcombine.low %v1909_v38, %v1913_v39  ;;  %v1970_v38 = vld [vmem:[#allocation11 + $0x2a8] sm:$0xff]  ;;  %v1973_v39 = vld [vmem:[#allocation11 + $0x2c0] sm:$0xff] }
 0x133   :  { %1466 = vmatpush1.bf16.msra.mxu0 %v9793_v48  ;;  %v8522_v48 = vcombine.low %v1902_v35, %v1906_v36  ;;  %v8579_v36 = vcombine.high %v1958_v30, %v1962_v31 }
 0x134   :  { %1467 = vmatprep.subr.bf16.mxu0 %v9801_v50  ;;  %v1922_v50 = vld [vmem:[#allocation11 + $0x128] sm:$0xff] }
 0x135   :  { %1786 = vmatpush1.bf16.msra.mxu1 %v9802_v53  ;;  %v1925_v53 = vld [vmem:[#allocation11 + $0x140] sm:$0xff] }
 0x136   :  { %1787 = vmatprep.subr.bf16.mxu1 %v9810_v55  ;;  %v8537_v55 = vcombine.high %v1917_v45, %v1921_v46 }
 0x137   :  { %1468 = vmatpush1.bf16.msra.mxu0 %v9799_v52  ;;  %v8531_v52 = vcombine.high %v1910_v42, %v1914_v43 }
 0x138   :  { %1469 = vmatprep.subr.bf16.mxu0 %v9807_v54  ;;  %v1929_v54 = vld [vmem:[#allocation11 + $0x160] sm:$0xff] }
 0x139   :  { %1788 = vmatpush1.bf16.msra.mxu1 %v9808_v57  ;;  %v8536_v57 = vcombine.low %v1917_v45, %v1921_v46  ;;  %v1978_v45 = vld [vmem:[#allocation11 + $0x2e8] sm:$0xff]  ;;  %v1981_v46 = vld [vmem:[#allocation11 + $0x300] sm:$0xff] }
 0x13a   :  { %1789 = vmatprep.subr.bf16.mxu1 %v9816_v59  ;;  %v8545_v59 = vcombine.high %v1925_v53, %v1929_v54 }
 0x13b   :  { %1470 = vmatpush1.bf16.msra.mxu0 %v9805_v56  ;;  %v8530_v56 = vcombine.low %v1910_v42, %v1914_v43 }
 0x13c   :  { %1471 = vmatprep.subr.bf16.mxu0 %v9813_v58  ;;  %v8539_v58 = vcombine.high %v1918_v49, %v1922_v50 }
 0x13d   :  { %1790 = vmatpush1.bf16.msra.mxu1 %v9814_v61  ;;  %v1930_v61 = vld [vmem:[#allocation11 + $0x168] sm:$0xff] }
 0x13e   :  { %1791 = vmatprep.subr.bf16.mxu1 %v9822_v63  ;;  %v1937_v63 = vld [vmem:[#allocation11 + $0x1a0] sm:$0xff] }
 0x13f   :  { %1472 = vmatpush1.bf16.msra.mxu0 %v9811_v60  ;;  %v1926_v60 = vld [vmem:[#allocation11 + $0x148] sm:$0xff] }
 0x140   :  { %1473 = vmatprep.subr.bf16.mxu0 %v9819_v62  ;;  %v1933_v62 = vld [vmem:[#allocation11 + $0x180] sm:$0xff] }
 0x141   :  { %1792 = vmatpush1.bf16.msra.mxu1 %v9820_v1  ;;  %v8544_v1 = vcombine.low %v1925_v53, %v1929_v54  ;;  %v1986_v53 = vld [vmem:[#allocation11 + $0x328] sm:$0xff]  ;;  %v1989_v54 = vld [vmem:[#allocation11 + $0x340] sm:$0xff] }
 0x142   :  { %1793 = vmatprep.subr.bf16.mxu1 %v9828_v3  ;;  %v8553_v3 = vcombine.high %v1933_v62, %v1937_v63 }
 0x143   :  { %1474 = vmatpush1.bf16.msra.mxu0 %v9817_v0  ;;  %v8538_v0 = vcombine.low %v1918_v49, %v1922_v50 }
 0x144   :  { %1475 = vmatprep.subr.bf16.mxu0 %v9825_v2  ;;  %v8547_v2 = vcombine.high %v1926_v60, %v1930_v61 }
 0x145   :  { %1794 = vmatpush1.bf16.msra.mxu1 %v9826_v5  ;;  %v1938_v5 = vld [vmem:[#allocation11 + $0x1a8] sm:$0xff] }
 0x146   :  { %1795 = vmatprep.subr.bf16.mxu1 %v9834_v7  ;;  %v1945_v7 = vld [vmem:[#allocation11 + $0x1e0] sm:$0xff] }
 0x147   :  { %1476 = vmatpush1.bf16.msra.mxu0 %v9823_v4  ;;  %v1934_v4 = vld [vmem:[#allocation11 + $0x188] sm:$0xff] }
 0x148   :  { %1477 = vmatprep.subr.bf16.mxu0 %v9831_v6  ;;  %v1941_v6 = vld [vmem:[#allocation11 + $0x1c0] sm:$0xff] }
 0x149   :  { %1796 = vmatpush1.bf16.msra.mxu1 %v9832_v9  ;;  %v8552_v9 = vcombine.low %v1933_v62, %v1937_v63  ;;  %v8560_v19 = vcombine.low %v1941_v6, %v1945_v7  ;;  %v1997_v62 = vld [vmem:[#allocation11 + $0x380] sm:$0xff] }
 0x14a   :  { %1797 = vmatprep.subr.bf16.mxu1 %v9840_v11  ;;  %v8561_v11 = vcombine.high %v1941_v6, %v1945_v7  ;;  %v2001_v63 = vld [vmem:[#allocation11 + $0x3a0] sm:$0xff] }
 0x14b   :  { %1478 = vmatpush1.bf16.msra.mxu0 %v9829_v8  ;;  %v8546_v8 = vcombine.low %v1926_v60, %v1930_v61  ;;  %v1990_v60 = vld [vmem:[#allocation11 + $0x348] sm:$0xff]  ;;  %v2005_v6 = vld [vmem:[#allocation11 + $0x3c0] sm:$0xff] }
 0x14c   :  { %1479 = vmatprep.subr.bf16.mxu0 %v9837_v10  ;;  %v8555_v10 = vcombine.high %v1934_v4, %v1938_v5  ;;  %v1994_v61 = vld [vmem:[#allocation11 + $0x368] sm:$0xff]  ;;  %v2009_v7 = vld [vmem:[#allocation11 + $0x3e0] sm:$0xff] }
 0x14d   :  { %1798 = vmatpush1.bf16.msra.mxu1 %v9838_v14  ;;  %v1949_v14 = vld [vmem:[#allocation11 + $0x200] sm:$0xff] }
 0x14e   :  { %1799 = vmatprep.subr.bf16.mxu1 %v9845_v17  ;;  %v8554_v17 = vcombine.low %v1934_v4, %v1938_v5  ;;  %v1998_v4 = vld [vmem:[#allocation11 + $0x388] sm:$0xff] }
 0x14f   :  { %1480 = vmatpush1.bf16.msra.mxu0 %v9835_v16  ;;  %v1953_v16 = vld [vmem:[#allocation11 + $0x220] sm:$0xff]  ;;  %v2002_v5 = vld [vmem:[#allocation11 + $0x3a8] sm:$0xff] }
 0x150   :  { %6576 = vmatprep.subr.bf16.mxu0 %v8505_v23  ;;  %v8569_v21 = vcombine.high %v1949_v14, %v1953_v16  ;;  %v1954_v23 = vld [vmem:[#allocation11 + $0x228] sm:$0xff]  ;;  %v8568_v27 = vcombine.low %v1949_v14, %v1953_v16  ;;  %v10336_v14 = vld [vmem:[#allocation11 + $0x400] sm:$0xff] }
 0x151   :  { %1800 = vmatpush1.bf16.msra.mxu1 %v9843_v25  ;;  %v1961_v25 = vld [vmem:[#allocation11 + $0x260] sm:$0xff] }
 0x152   :  { %1482 = vmatmul.mubr.bf16.vlgmr.msra.gmra.mrb[8].mxu0 %v8422_v24  ;;  %6822 = vmatprep.subr.bf16.mxu1 %v8507_v29  ;;  %v1957_v24 = vld [vmem:[#allocation11 + $0x240] sm:$0xff] }
 0x153   :  { %6577 = vmatpush1.bf16.msra.mxu0 %v8504_v28  ;;  %v8571_v28 = vcombine.high %v1950_v22, %v1954_v23  ;;  %v8577_v29 = vcombine.high %v1957_v24, %v1961_v25  ;;  %v8576_v35 = vcombine.low %v1957_v24, %v1961_v25  ;;  %v10338_v16 = vld [vmem:[#allocation11 + $0x420] sm:$0xff]  ;;  %v8626_v24 = vcombine.low %v2006_v12, %v2010_v13 }
 0x154   :  { %6578 = vmatprep.subr.bf16.mxu0 %v8513_v32  ;;  %1802 = vmatmul.mubr.bf16.vlgmr.msra.gmra.mrb[8].mxu1 %v8457_v33  ;;  %v1965_v32 = vld [vmem:[#allocation11 + $0x280] sm:$0xff] }
 0x155   :  { %6823 = vmatpush1.bf16.msra.mxu1 %v8506_v34  ;;  %v1969_v33 = vld [vmem:[#allocation11 + $0x2a0] sm:$0xff]  ;;  %v8570_v34 = vcombine.low %v1950_v22, %v1954_v23  ;;  %v10342_v22 = vld [vmem:[#allocation11 + $0x408] sm:$0xff] }
 0x156   :  { %6824 = vmatprep.subr.bf16.mxu1 %v8515_v37  ;;  %v1966_v37 = vld [vmem:[#allocation11 + $0x288] sm:$0xff]  ;;  %v8584_v42 = vcombine.low %v1965_v32, %v1969_v33 }
 0x157   :  { %6579 = vmatpush1.bf16.msra.mxu0 %v8512_v15  ;;  %v8585_v15 = vcombine.high %v1965_v32, %v1969_v33  ;;  %v8587_v43 = vcombine.high %v1966_v37, %v1970_v38  ;;  %v10344_v23 = vld [vmem:[#allocation11 + $0x428] sm:$0xff] }
 0x158   :  { %6580 = vmatprep.subr.bf16.mxu0 %v8521_v40  ;;  %v1977_v40 = vld [vmem:[#allocation11 + $0x2e0] sm:$0xff]  ;;  %v8635_v25 = vcombine.high %v10342_v22, %v10344_v23  ;;  %v10358_v33 = vld [vmem:[#allocation7 + $0x2] sm:$0x3] }
 0x159   :  { %6825 = vmatpush1.bf16.msra.mxu1 %v8514_v41  ;;  %v8578_v41 = vcombine.low %v1958_v30, %v1962_v31  ;;  %v8592_v49 = vcombine.low %v1973_v39, %v1977_v40 }
 0x15a   :  { %6826 = vmatprep.subr.bf16.mxu1 %v8523_v44  ;;  %v1974_v44 = vld [vmem:[#allocation11 + $0x2c8] sm:$0xff] }
 0x15b   :  { %6581 = vmatpush1.bf16.msra.mxu0 %v8520_v18  ;;  %v8593_v18 = vcombine.high %v1973_v39, %v1977_v40  ;;  %v8595_v50 = vcombine.high %v1974_v44, %v1978_v45 }
 0x15c   :  { %6582 = vmatprep.subr.bf16.mxu0 %v8529_v47  ;;  %v1985_v47 = vld [vmem:[#allocation11 + $0x320] sm:$0xff] }
 0x15d   :  { %6827 = vmatpush1.bf16.msra.mxu1 %v8522_v48  ;;  %v8586_v48 = vcombine.low %v1966_v37, %v1970_v38 }
 0x15e   :  { %6828 = vmatprep.subr.bf16.mxu1 %v8531_v52  ;;  %v1982_v52 = vld [vmem:[#allocation11 + $0x308] sm:$0xff] }
 0x15f   :  { %6583 = vmatpush1.bf16.msra.mxu0 %v8528_v51  ;;  %v8601_v51 = vcombine.high %v1981_v46, %v1985_v47 }
 0x160   :  { %6584 = vmatprep.subr.bf16.mxu0 %v8537_v55  ;;  %v1993_v55 = vld [vmem:[#allocation11 + $0x360] sm:$0xff] }
 0x161   :  { %6829 = vmatpush1.bf16.msra.mxu1 %v8530_v56  ;;  %v8594_v56 = vcombine.low %v1974_v44, %v1978_v45 }
 0x162   :  { %6830 = vmatprep.subr.bf16.mxu1 %v8539_v58  ;;  %v8603_v58 = vcombine.high %v1982_v52, %v1986_v53 }
 0x163   :  { %6585 = vmatpush1.bf16.msra.mxu0 %v8536_v57  ;;  %v8600_v57 = vcombine.low %v1981_v46, %v1985_v47 }
 0x164   :  { %6586 = vmatprep.subr.bf16.mxu0 %v8545_v59  ;;  %v8609_v59 = vcombine.high %v1989_v54, %v1993_v55 }
 0x165   :  { %6831 = vmatpush1.bf16.msra.mxu1 %v8538_v0  ;;  %v8602_v0 = vcombine.low %v1982_v52, %v1986_v53 }
 0x166   :  { %6832 = vmatprep.subr.bf16.mxu1 %v8547_v2  ;;  %v8611_v2 = vcombine.high %v1990_v60, %v1994_v61 }
 0x167   :  { %6587 = vmatpush1.bf16.msra.mxu0 %v8544_v1  ;;  %v8608_v1 = vcombine.low %v1989_v54, %v1993_v55  ;;  %v2021_v54 = vld [vmem:[#allocation11 + $0x440] sm:$0xff] }
 0x168   :  { %6588 = vmatprep.subr.bf16.mxu0 %v8553_v3  ;;  %v8617_v3 = vcombine.high %v1997_v62, %v2001_v63 }
 0x169   :  { %6833 = vmatpush1.bf16.msra.mxu1 %v8546_v8  ;;  %v8610_v8 = vcombine.low %v1990_v60, %v1994_v61  ;;  %v2026_v60 = vld [vmem:[#allocation11 + $0x468] sm:$0xff] }
 0x16a   :  { %6834 = vmatprep.subr.bf16.mxu1 %v8555_v10  ;;  %v8619_v10 = vcombine.high %v1998_v4, %v2002_v5 }
 0x16b   :  { %6589 = vmatpush1.bf16.msra.mxu0 %v8552_v9  ;;  %v8616_v9 = vcombine.low %v1997_v62, %v2001_v63  ;;  %v8632_v63 = vcombine.low %v10336_v14, %v10338_v16 }
 0x16c   :  { %6590 = vmatprep.subr.bf16.mxu0 %v8561_v11  ;;  %v8625_v11 = vcombine.high %v2005_v6, %v2009_v7 }
 0x16d   :  { %6835 = vmatpush1.bf16.msra.mxu1 %v8554_v17  ;;  %v8618_v17 = vcombine.low %v1998_v4, %v2002_v5  ;;  %v2029_v4 = vld [vmem:[#allocation11 + $0x480] sm:$0xff] }
 0x16e   :  { %6836 = vmatprep.subr.bf16.mxu1 %v8563_v20  ;;  %v8627_v20 = vcombine.high %v2006_v12, %v2010_v13 }
 0x16f   :  { %6591 = vmatpush1.bf16.msra.mxu0 %v8560_v19  ;;  %v8624_v19 = vcombine.low %v2005_v6, %v2009_v7  ;;  %v2033_v6 = vld [vmem:[#allocation11 + $0x4a0] sm:$0xff]  ;;  %v2030_v7 = vld [vmem:[#allocation11 + $0x488] sm:$0xff] }
 0x170   :  { %6592 = vmatprep.subr.bf16.mxu0 %v8569_v21  ;;  %v8633_v21 = vcombine.high %v10336_v14, %v10338_v16  ;;  %v8649_v12 = vcombine.high %v2029_v4, %v2033_v6  ;;  %v2037_v14 = vld [vmem:[#allocation11 + $0x4c0] sm:$0xff] }
 0x171   :  { %6837 = vmatpush1.bf16.msra.mxu1 %v8562_v26  ;;  %v172_v26 = vlaneseq  ;;  %v2041_v16 = vld [vmem:[#allocation11 + $0x4e0] sm:$0xff] }
 0x172   :  { %6838 = vmatprep.subr.bf16.mxu1 %v8571_v28 }
 0x173   :  { %6593 = vmatpush1.bf16.msra.mxu0 %v8568_v27  ;;  %v10348_v27 = vshrl.u32 %v172_v26, 7  ;;  %v2046_v26 = vld [vmem:[#allocation11 + $0x508] sm:$0xff] }
 0x174   :  { %6594 = vmatprep.subr.bf16.mxu0 %v8577_v29  ;;  %v170_v29 = vld [vmem:[#allocation7] sm:$0x3] }
 0x175   :  { %6839 = vmatpush1.bf16.msra.mxu1 %v8570_v34  ;;  %v10351_v28 = vsub.s32 0, %v10348_v27  ;;  %v10354_v30 = vsub.s32 1, %v10348_v27 }
 0x176   :  { %6840 = vmatprep.subr.bf16.mxu1 %v8579_v36 }
 0x177   :  { %6595 = vmatpush1.bf16.msra.mxu0 %v8576_v35  ;;  %v175_v31 = vrot.slane %v170_v29, %v10351_v28  ;;  %v179_v32 = vrot.slane %v170_v29, %v10354_v30  ;;  %v2050_v29 = vld [vmem:[#allocation11 + $0x528] sm:$0xff] }
 0x178   :  { %6596 = vmatprep.subr.bf16.mxu0 %v8585_v15  ;;  %v454_v15 = vrot.slane %v10358_v33, %v10354_v30 }
 0x179   :  { %6841 = vmatpush1.bf16.msra.mxu1 %v8578_v41 }
 0x17a   :  { %6842 = vmatprep.subr.bf16.mxu1 %v8587_v43 }
 0x17b   :  { %6597 = vmatpush1.bf16.msra.mxu0 %v8584_v42 }
 0x17c   :  { %6598 = vmatprep.subr.bf16.mxu0 %v8593_v18 }
 0x17d   :  { %6843 = vmatpush1.bf16.msra.mxu1 %v8586_v48 }
 0x17e   :  { %6844 = vmatprep.subr.bf16.mxu1 %v8595_v50 }
 0x17f   :  { %6599 = vmatpush1.bf16.msra.mxu0 %v8592_v49 }
 0x180   :  { %6600 = vmatprep.subr.bf16.mxu0 %v8601_v51 }
 0x181   :  { %6845 = vmatpush1.bf16.msra.mxu1 %v8594_v56 }
 0x182   :  { %6846 = vmatprep.subr.bf16.mxu1 %v8603_v58  ;;  %v2025_v58 = vld [vmem:[#allocation11 + $0x460] sm:$0xff] }
 0x183   :  { %6601 = vmatpush1.bf16.msra.mxu0 %v8600_v57 }
 0x184   :  { %6602 = vmatprep.subr.bf16.mxu0 %v8609_v59  ;;  %v2022_v59 = vld [vmem:[#allocation11 + $0x448] sm:$0xff] }
 0x185   :  { %6847 = vmatpush1.bf16.msra.mxu1 %v8602_v0  ;;  %v8634_v0 = vcombine.low %v10342_v22, %v10344_v23  ;;  %v8657_v22 = vcombine.high %v2037_v14, %v2041_v16 }
 0x186   :  { %6848 = vmatprep.subr.bf16.mxu1 %v8611_v2  ;;  %v8641_v2 = vcombine.high %v2021_v54, %v2025_v58 }
 0x187   :  { %6603 = vmatpush1.bf16.msra.mxu0 %v8608_v1 }
 0x188   :  { %6604 = vmatprep.subr.bf16.mxu0 %v8617_v3  ;;  %v8643_v3 = vcombine.high %v2022_v59, %v2026_v60 }
 0x189   :  { %6849 = vmatpush1.bf16.msra.mxu1 %v8610_v8  ;;  %v2034_v8 = vld [vmem:[#allocation11 + $0x4a8] sm:$0xff] }
 0x18a   :  { %6850 = vmatprep.subr.bf16.mxu1 %v8619_v10  ;;  %v8640_v10 = vcombine.low %v2021_v54, %v2025_v58  ;;  %v8651_v13 = vcombine.high %v2030_v7, %v2034_v8  ;;  %v2074_v54 = vld [vmem:[#allocation11 + $0x5e8] sm:$0xff] }
 0x18b   :  { %6605 = vmatpush1.bf16.msra.mxu0 %v8616_v9 }
 0x18c   :  { %6606 = vmatprep.subr.bf16.mxu0 %v8625_v11  ;;  %v8642_v11 = vcombine.low %v2022_v59, %v2026_v60  ;;  %v2077_v59 = vld [vmem:[#allocation11 + $0x600] sm:$0xff] }
 0x18d   :  { %6851 = vmatpush1.bf16.msra.mxu1 %v8618_v17  ;;  %v2038_v17 = vld [vmem:[#allocation11 + $0x4c8] sm:$0xff]  ;;  %v2081_v60 = vld [vmem:[#allocation11 + $0x620] sm:$0xff] }
 0x18e   :  { %6852 = vmatprep.subr.bf16.mxu1 %v8627_v20  ;;  %v8648_v20 = vcombine.low %v2029_v4, %v2033_v6  ;;  %v2089_v6 = vld [vmem:[#allocation11 + $0x660] sm:$0xff] }
 0x18f   :  { %6607 = vmatpush1.bf16.msra.mxu0 %v8624_v19  ;;  %v2042_v19 = vld [vmem:[#allocation11 + $0x4e8] sm:$0xff] }
 0x190   :  { %6617 = vmatprep.subr.bf16.mxu0 %v8633_v21  ;;  %v8650_v21 = vcombine.low %v2030_v7, %v2034_v8  ;;  %v8659_v23 = vcombine.high %v2038_v17, %v2042_v19  ;;  %v2086_v7 = vld [vmem:[#allocation11 + $0x648] sm:$0xff] }
 0x191   :  { %6853 = vmatpush1.bf16.msra.mxu1 %v8626_v24  ;;  %v2045_v24 = vld [vmem:[#allocation11 + $0x500] sm:$0xff]  ;;  %v2090_v8 = vld [vmem:[#allocation11 + $0x668] sm:$0xff] }
 0x192   :  { %6863 = vmatprep.subr.bf16.mxu1 %v8635_v25  ;;  %v2049_v25 = vld [vmem:[#allocation11 + $0x520] sm:$0xff] }
 0x1a5   :  { %v383_v34 = vpop.f32.mrb[0].mxu0 }
 0x1a6   :  { %v384_v35 = vadd.f32 %v383_v34, %v175_v31  ;;  %v385_v36 = vpop.f32.mrb[1].mxu0  ;;  %v10362_v41 = vpop.f32.mrb[0].mxu1  ;;  %v8656_v31 = vcombine.low %v2037_v14, %v2041_v16  ;;  %v8665_v34 = vcombine.high %v2045_v24, %v2049_v25  ;;  %v8707_v14 = vcombine.high %v2086_v7, %v2090_v8  ;;  %v2093_v16 = vld [vmem:[#allocation11 + $0x680] sm:$0xff] }
 0x1a7   :  { %v386_v37 = vadd.f32 %v385_v36, %v179_v32  ;;  %v387_v38 = vpop.f32.mrb[2].mxu0  ;;  %v660_v43 = vpop.f32.mrb[1].mxu1  ;;  %v8658_v32 = vcombine.low %v2038_v17, %v2042_v19  ;;  %v2053_v36 = vld [vmem:[#allocation11 + $0x540] sm:$0xff]  ;;  %v2094_v19 = vld [vmem:[#allocation11 + $0x688] sm:$0xff] }
 0x1a8   :  { %v392_v39 = vmul.f32 0.70710677, %v384_v35  ;;  %v388_v40 = vpop.f32.mrb[3].mxu0  ;;  %v661_v18 = vadd.f32 %v660_v43, %v454_v15  ;;  %v662_v44 = vpop.f32.mrb[2].mxu1  ;;  %v390_v49 = vmul.f32 0.5, %v384_v35  ;;  %v8667_v35 = vcombine.high %v2046_v26, %v2050_v29  ;;  %v2057_v15 = vld [vmem:[#allocation11 + $0x560] sm:$0xff] }
 0x1a9   :  { %v393_v42 = vmul.f32 0.70710677, %v386_v37  ;;  %v663_v45 = vpop.f32.mrb[3].mxu1  ;;  %v391_v51 = vmul.f32 0.5, %v386_v37  ;;  %v2054_v37 = vld [vmem:[#allocation11 + $0x548] sm:$0xff]  ;;  %v8666_v40 = vcombine.low %v2046_v26, %v2050_v29  ;;  %v2065_v44 = vld [vmem:[#allocation11 + $0x5a0] sm:$0xff] }
 0x1aa   :  { %9912 = verf.f32 %v392_v39  ;;  %v668_v46 = vmul.f32 0.70710677, %v661_v18  ;;  %v666_v55 = vmul.f32 0.5, %v661_v18  ;;  %v2058_v38 = vld [vmem:[#allocation11 + $0x568] sm:$0xff]  ;;  %v8664_v39 = vcombine.low %v2045_v24, %v2049_v25  ;;  %v2061_v18 = vld [vmem:[#allocation11 + $0x580] sm:$0xff] }
 0x1ab   :  { %9914 = verf.f32 %v393_v42  ;;  %v8673_v42 = vcombine.high %v2053_v36, %v2057_v15  ;;  %v8675_v43 = vcombine.high %v2054_v37, %v2058_v38  ;;  %v2062_v45 = vld [vmem:[#allocation11 + $0x588] sm:$0xff]  ;;  %v2097_v17 = vld [vmem:[#allocation11 + $0x6a0] sm:$0xff]  ;;  %v10385_v25 = vld [vmem:[#allocation7 + $0x4] sm:$0x3] }
 0x1ac   :  { %9916 = verf.f32 %v668_v46  ;;  %v2066_v46 = vld [vmem:[#allocation11 + $0x5a8] sm:$0xff]  ;;  %v2101_v26 = vld [vmem:[#allocation11 + $0x6c0] sm:$0xff] }
 0x1ad   :  { %v2105_v29 = vld [vmem:[#allocation11 + $0x6e0] sm:$0xff] }
 0x1b4   :  { %v9913_v47 = vpop.eup %9912 }
 0x1b5   :  { %v9915_v48 = vpop.eup %9914  ;;  %v396_v50 = vadd.f32 1.0, %v9913_v47  ;;  %v8672_v47 = vcombine.low %v2053_v36, %v2057_v15  ;;  %v729_v36 = vrot.slane %v10385_v25, %v10354_v30  ;;  %v8721_v15 = vcombine.high %v2101_v26, %v2105_v29 }
 0x1b6   :  { %v397_v52 = vadd.f32 1.0, %v9915_v48  ;;  %v9917_v56 = vpop.eup %9916  ;;  %v8674_v48 = vcombine.low %v2054_v37, %v2058_v38  ;;  %v2109_v38 = vld [vmem:[#allocation11 + $0x700] sm:$0xff] }
 0x1b7   :  { %v398_v53 = vmul.f32 %v396_v50, %v390_v49  ;;  %v672_v61 = vadd.f32 1.0, %v9917_v56  ;;  %v8681_v49 = vcombine.high %v2061_v18, %v2065_v44  ;;  %v8683_v50 = vcombine.high %v2062_v45, %v2066_v46 }
 0x1b8   :  { %v399_v57 = vmul.f32 %v397_v52, %v391_v51  ;;  %v2069_v51 = vld [vmem:[#allocation11 + $0x5c0] sm:$0xff]  ;;  %v8682_v56 = vcombine.low %v2062_v45, %v2066_v46 }
 0x1b9   :  { %v10370_v1 = vpack.c.bf16 %v398_v53, %v398_v53  ;;  %v674_v5 = vmul.f32 %v672_v61, %v666_v55  ;;  %v2073_v52 = vld [vmem:[#allocation11 + $0x5e0] sm:$0xff]  ;;  %v2070_v53 = vld [vmem:[#allocation11 + $0x5c8] sm:$0xff]  ;;  %v8680_v55 = vcombine.low %v2061_v18, %v2065_v44  ;;  %v8720_v44 = vcombine.low %v2101_v26, %v2105_v29 }
 0x1ba   :  { %v10364_v62 = vpack.c.bf16 %v399_v57, %v399_v57  ;;  %v8689_v57 = vcombine.high %v2069_v51, %v2073_v52  ;;  %v8691_v58 = vcombine.high %v2070_v53, %v2074_v54  ;;  %v2078_v61 = vld [vmem:[#allocation11 + $0x608] sm:$0xff]  ;;  %v2145_v26 = vld [vmem:[#allocation11 + $0x820] sm:$0xff] }
 0x1bb   :  { %v10376_v9 = vpack.c.bf16 %v674_v5, %v674_v5  ;;  %v2085_v5 = vld [vmem:[#allocation11 + $0x640] sm:$0xff]  ;;  %v2142_v29 = vld [vmem:[#allocation11 + $0x808] sm:$0xff] }
 0x1bc   :  { %6608 = vmatprep.mubr.bf16.mxu0 %v10364_v62  ;;  %6854 = vmatprep.mubr.bf16.mxu1 %v10364_v62 }
 0x1bd   :  { %6609 = vmatmul.mubr.bf16.vlgmr.msra.gmra.mrb[12].mxu0 %v10370_v1  ;;  %6855 = vmatmul.mubr.bf16.vlgmr.msra.gmra.mrb[12].mxu1 %v10370_v1 }
 0x1be   :  { %6618 = vmatpush1.bf16.msra.mxu0 %v8632_v63  ;;  %6864 = vmatpush1.bf16.msra.mxu1 %v8634_v0  ;;  %v2082_v63 = vld [vmem:[#allocation11 + $0x628] sm:$0xff]  ;;  %v8688_v0 = vcombine.low %v2069_v51, %v2073_v52  ;;  %v2121_v52 = vld [vmem:[#allocation11 + $0x760] sm:$0xff] }
 0x1bf   :  { %6619 = vmatprep.subr.bf16.mxu0 %v8641_v2  ;;  %6865 = vmatprep.subr.bf16.mxu1 %v8643_v3  ;;  %v8690_v2 = vcombine.low %v2070_v53, %v2074_v54  ;;  %v8697_v3 = vcombine.high %v2077_v59, %v2081_v60  ;;  %v8699_v4 = vcombine.high %v2078_v61, %v2082_v63  ;;  %v2118_v53 = vld [vmem:[#allocation11 + $0x748] sm:$0xff] }
 0x1c0   :  { %6649 = vmatprep.mubr.bf16.mxu0 %v10376_v9  ;;  %6895 = vmatprep.mubr.bf16.mxu1 %v10376_v9  ;;  %v2122_v54 = vld [vmem:[#allocation11 + $0x768] sm:$0xff] }
 0x1c2   :  { %6620 = vmatpush1.bf16.msra.mxu0 %v8640_v10  ;;  %6866 = vmatpush1.bf16.msra.mxu1 %v8642_v11  ;;  %v450_v10 = vrot.slane %v10358_v33, %v10351_v28  ;;  %v8696_v11 = vcombine.low %v2077_v59, %v2081_v60  ;;  %v8713_v33 = vcombine.high %v2093_v16, %v2097_v17 }
 0x1c3   :  { %6621 = vmatprep.subr.bf16.mxu0 %v8649_v12  ;;  %6867 = vmatprep.subr.bf16.mxu1 %v8651_v13  ;;  %v8698_v12 = vcombine.low %v2078_v61, %v2082_v63  ;;  %v8705_v13 = vcombine.high %v2085_v5, %v2089_v6  ;;  %v8739_v63 = vcombine.high %v2118_v53, %v2122_v54 }
 0x1c6   :  { %6622 = vmatpush1.bf16.msra.mxu0 %v8648_v20  ;;  %6868 = vmatpush1.bf16.msra.mxu1 %v8650_v21  ;;  %v2098_v20 = vld [vmem:[#allocation11 + $0x6a8] sm:$0xff]  ;;  %v10383_v21 = vadd.f32 %v10362_v41, %v450_v10  ;;  %v8712_v41 = vcombine.low %v2093_v16, %v2097_v17 }
 0x1c7   :  { %6623 = vmatprep.subr.bf16.mxu0 %v8657_v22  ;;  %6869 = vmatprep.subr.bf16.mxu1 %v8659_v23  ;;  %v8704_v22 = vcombine.low %v2085_v5, %v2089_v6  ;;  %v8706_v23 = vcombine.low %v2086_v7, %v2090_v8  ;;  %v8715_v24 = vcombine.high %v2094_v19, %v2098_v20  ;;  %v2130_v5 = vld [vmem:[#allocation11 + $0x7a8] sm:$0xff] }
 0x1c8   :  { %v8738_v7 = vcombine.low %v2118_v53, %v2122_v54  ;;  %v2138_v16 = vld [vmem:[#allocation11 + $0x7e8] sm:$0xff] }
 0x1c9   :  { %v2162_v53 = vld [vmem:[#allocation11 + $0x8a8] sm:$0xff] }
 0x1ca   :  { %6624 = vmatpush1.bf16.msra.mxu0 %v8656_v31  ;;  %6870 = vmatpush1.bf16.msra.mxu1 %v8658_v32  ;;  %v2102_v31 = vld [vmem:[#allocation11 + $0x6c8] sm:$0xff] }
 0x1cb   :  { %6625 = vmatprep.subr.bf16.mxu0 %v8665_v34  ;;  %6871 = vmatprep.subr.bf16.mxu1 %v8667_v35  ;;  %v2106_v32 = vld [vmem:[#allocation11 + $0x6e8] sm:$0xff]  ;;  %v667_v34 = vmul.f32 0.70710677, %v10383_v21  ;;  %v8714_v35 = vcombine.low %v2094_v19, %v2098_v20  ;;  %v665_v20 = vmul.f32 0.5, %v10383_v21 }
 0x1cc   :  { %v8723_v37 = vcombine.high %v2102_v31, %v2106_v32  ;;  %v8722_v45 = vcombine.low %v2102_v31, %v2106_v32  ;;  %v2146_v31 = vld [vmem:[#allocation11 + $0x828] sm:$0xff] }
 0x1cd   :  { %9918 = verf.f32 %v667_v34 }
 0x1ce   :  { %6626 = vmatpush1.bf16.msra.mxu0 %v8664_v39  ;;  %6872 = vmatpush1.bf16.msra.mxu1 %v8666_v40  ;;  %v2113_v39 = vld [vmem:[#allocation11 + $0x720] sm:$0xff]  ;;  %v2110_v40 = vld [vmem:[#allocation11 + $0x708] sm:$0xff] }
 0x1cf   :  { %6627 = vmatprep.subr.bf16.mxu0 %v8673_v42  ;;  %6873 = vmatprep.subr.bf16.mxu1 %v8675_v43  ;;  %v2114_v42 = vld [vmem:[#allocation11 + $0x728] sm:$0xff] }
 0x1d0   :  { %v8730_v59 = vcombine.low %v2110_v40, %v2114_v42 }
 0x1d2   :  { %6628 = vmatpush1.bf16.msra.mxu0 %v8672_v47  ;;  %6874 = vmatpush1.bf16.msra.mxu1 %v8674_v48  ;;  %v8729_v48 = vcombine.high %v2109_v38, %v2113_v39 }
 0x1d3   :  { %6629 = vmatprep.subr.bf16.mxu0 %v8681_v49  ;;  %6875 = vmatprep.subr.bf16.mxu1 %v8683_v50  ;;  %v8731_v49 = vcombine.high %v2110_v40, %v2114_v42  ;;  %v2117_v50 = vld [vmem:[#allocation11 + $0x740] sm:$0xff]  ;;  %v2150_v42 = vld [vmem:[#allocation11 + $0x848] sm:$0xff] }
 0x1d4   :  { %v8737_v61 = vcombine.high %v2117_v50, %v2121_v52  ;;  %v8736_v6 = vcombine.low %v2117_v50, %v2121_v52  ;;  %v2153_v40 = vld [vmem:[#allocation11 + $0x860] sm:$0xff]  ;;  %v2158_v52 = vld [vmem:[#allocation11 + $0x888] sm:$0xff] }
 0x1d5   :  { %v2157_v50 = vld [vmem:[#allocation11 + $0x880] sm:$0xff] }
 0x1d6   :  { %6630 = vmatpush1.bf16.msra.mxu0 %v8680_v55  ;;  %6876 = vmatpush1.bf16.msra.mxu1 %v8682_v56 }
 0x1d7   :  { %6631 = vmatprep.subr.bf16.mxu0 %v8689_v57  ;;  %6877 = vmatprep.subr.bf16.mxu1 %v8691_v58  ;;  %v8728_v58 = vcombine.low %v2109_v38, %v2113_v39  ;;  %v2149_v39 = vld [vmem:[#allocation11 + $0x840] sm:$0xff] }
 0x1d8   :  { %v8768_v54 = vcombine.low %v2149_v39, %v2153_v40 }
 0x1da   :  { %6632 = vmatpush1.bf16.msra.mxu0 %v8688_v0  ;;  %6878 = vmatpush1.bf16.msra.mxu1 %v8690_v2  ;;  %v2125_v0 = vld [vmem:[#allocation11 + $0x780] sm:$0xff] }
 0x1db   :  { %6633 = vmatprep.subr.bf16.mxu0 %v8697_v3  ;;  %6879 = vmatprep.subr.bf16.mxu1 %v8699_v4  ;;  %v2129_v3 = vld [vmem:[#allocation11 + $0x7a0] sm:$0xff]  ;;  %v2126_v4 = vld [vmem:[#allocation11 + $0x788] sm:$0xff] }
 0x1dc   :  { %v8745_v8 = vcombine.high %v2125_v0, %v2129_v3  ;;  %v8747_v10 = vcombine.high %v2126_v4, %v2130_v5  ;;  %v8744_v17 = vcombine.low %v2125_v0, %v2129_v3  ;;  %v8746_v19 = vcombine.low %v2126_v4, %v2130_v5  ;;  %v2170_v0 = vld [vmem:[#allocation11 + $0x8e8] sm:$0xff] }
 0x1dd   :  { %v8778_v3 = vcombine.low %v2158_v52, %v2162_v53 }
 0x1de   :  { %6634 = vmatpush1.bf16.msra.mxu0 %v8696_v11  ;;  %6880 = vmatpush1.bf16.msra.mxu1 %v8698_v12  ;;  %v2133_v11 = vld [vmem:[#allocation11 + $0x7c0] sm:$0xff]  ;;  %v9919_v12 = vpop.eup %9918 }
 0x1df   :  { %6635 = vmatprep.subr.bf16.mxu0 %v8705_v13  ;;  %6881 = vmatprep.subr.bf16.mxu1 %v8707_v14  ;;  %v2137_v13 = vld [vmem:[#allocation11 + $0x7e0] sm:$0xff]  ;;  %v2134_v14 = vld [vmem:[#allocation11 + $0x7c8] sm:$0xff] }
 0x1e2   :  { %6636 = vmatpush1.bf16.msra.mxu0 %v8704_v22  ;;  %6882 = vmatpush1.bf16.msra.mxu1 %v8706_v23  ;;  %v671_v22 = vadd.f32 1.0, %v9919_v12  ;;  %v8753_v23 = vcombine.high %v2133_v11, %v2137_v13 }
 0x1e3   :  { %6637 = vmatprep.subr.bf16.mxu0 %v8713_v33  ;;  %6883 = vmatprep.subr.bf16.mxu1 %v8715_v24  ;;  %v8755_v33 = vcombine.high %v2134_v14, %v2138_v16  ;;  %v2141_v24 = vld [vmem:[#allocation11 + $0x800] sm:$0xff] }
 0x1e4   :  { %v8761_v21 = vcombine.high %v2141_v24, %v2145_v26 }
 0x1e5   :  { %v10390_v43 = vpop.f32.mrb[4].mxu0 }
 0x1e6   :  { %6638 = vmatpush1.bf16.msra.mxu0 %v8712_v41  ;;  %6884 = vmatpush1.bf16.msra.mxu1 %v8714_v35  ;;  %v935_v18 = vpop.f32.mrb[5].mxu0  ;;  %v8752_v35 = vcombine.low %v2133_v11, %v2137_v13 }
 0x1e7   :  { %v936_v46 = vadd.f32 %v935_v18, %v729_v36  ;;  %v937_v47 = vpop.f32.mrb[6].mxu0  ;;  %6639 = vmatprep.subr.bf16.mxu0 %v8721_v15  ;;  %6885 = vmatprep.subr.bf16.mxu1 %v8723_v37  ;;  %v10392_v55 = vpop.f32.mrb[4].mxu1  ;;  %v8754_v36 = vcombine.low %v2134_v14, %v2138_v16  ;;  %v673_v15 = vmul.f32 %v671_v22, %v665_v20  ;;  %v2154_v18 = vld [vmem:[#allocation11 + $0x868] sm:$0xff]  ;;  %v2181_v16 = vld [vmem:[#allocation11 + $0x940] sm:$0xff] }
 0x1e8   :  { %v938_v51 = vpop.f32.mrb[7].mxu0  ;;  %v10394_v57 = vpop.f32.mrb[5].mxu1  ;;  %v8763_v37 = vcombine.high %v2142_v29, %v2146_v31  ;;  %v8762_v47 = vcombine.low %v2142_v29, %v2146_v31  ;;  %v2186_v20 = vld [vmem:[#allocation11 + $0x968] sm:$0xff]  ;;  %v2193_v29 = vld [vmem:[#allocation11 + $0x9a0] sm:$0xff] }
 0x1e9   :  { %v943_v56 = vmul.f32 0.70710677, %v936_v46  ;;  %v1212_v60 = vpop.f32.mrb[6].mxu1  ;;  %v941_v34 = vmul.f32 0.5, %v936_v46  ;;  %v10399_v46 = vpack.c.bf16 %v673_v15, %v673_v15  ;;  %v2161_v51 = vld [vmem:[#allocation11 + $0x8a0] sm:$0xff]  ;;  %v2190_v31 = vld [vmem:[#allocation11 + $0x988] sm:$0xff] }
 0x1ea   :  { %6640 = vmatpush1.bf16.msra.mxu0 %v8720_v44  ;;  %6886 = vmatpush1.bf16.msra.mxu1 %v8722_v45  ;;  %v1213_v2 = vpop.f32.mrb[7].mxu1  ;;  %v8760_v45 = vcombine.low %v2141_v24, %v2145_v26  ;;  %v2165_v60 = vld [vmem:[#allocation11 + $0x8c0] sm:$0xff] }
 0x1eb   :  { %9920 = verf.f32 %v943_v56  ;;  %6641 = vmatprep.subr.bf16.mxu0 %v8729_v48  ;;  %6887 = vmatprep.subr.bf16.mxu1 %v8731_v49  ;;  %v8769_v48 = vcombine.high %v2149_v39, %v2153_v40  ;;  %v8771_v49 = vcombine.high %v2150_v42, %v2154_v18  ;;  %v8770_v56 = vcombine.low %v2150_v42, %v2154_v18  ;;  %v2189_v26 = vld [vmem:[#allocation11 + $0x980] sm:$0xff] }
 0x1ec   :  { %v8776_v2 = vcombine.low %v2157_v50, %v2161_v51  ;;  %v2197_v15 = vld [vmem:[#allocation11 + $0x9c0] sm:$0xff]  ;;  %v8808_v39 = vcombine.low %v2189_v26, %v2193_v29 }
 0x1ee   :  { %6642 = vmatpush1.bf16.msra.mxu0 %v8728_v58  ;;  %6888 = vmatpush1.bf16.msra.mxu1 %v8730_v59  ;;  %v8777_v58 = vcombine.high %v2157_v50, %v2161_v51  ;;  %v8779_v59 = vcombine.high %v2158_v52, %v2162_v53 }
 0x1ef   :  { %6643 = vmatprep.subr.bf16.mxu0 %v8737_v61  ;;  %6889 = vmatprep.subr.bf16.mxu1 %v8739_v63  ;;  %v2169_v61 = vld [vmem:[#allocation11 + $0x8e0] sm:$0xff]  ;;  %v2166_v63 = vld [vmem:[#allocation11 + $0x8c8] sm:$0xff] }
 0x1f0   :  { %v8785_v4 = vcombine.high %v2165_v60, %v2169_v61  ;;  %v8787_v5 = vcombine.high %v2166_v63, %v2170_v0  ;;  %v8784_v11 = vcombine.low %v2165_v60, %v2169_v61  ;;  %v8786_v12 = vcombine.low %v2166_v63, %v2170_v0  ;;  %v2218_v60 = vld [vmem:[#allocation11 + $0xa68] sm:$0xff] }
 0x1f1   :  { %v725_v61 = vrot.slane %v10385_v25, %v10351_v28 }
 0x1f2   :  { %6644 = vmatpush1.bf16.msra.mxu0 %v8736_v6  ;;  %6890 = vmatpush1.bf16.msra.mxu1 %v8738_v7  ;;  %v2173_v6 = vld [vmem:[#allocation11 + $0x900] sm:$0xff] }
 0x1f3   :  { %6645 = vmatprep.subr.bf16.mxu0 %v8745_v8  ;;  %6891 = vmatprep.subr.bf16.mxu1 %v8747_v10  ;;  %v2177_v7 = vld [vmem:[#allocation11 + $0x920] sm:$0xff]  ;;  %v2174_v8 = vld [vmem:[#allocation11 + $0x908] sm:$0xff] }
 0x1f4   :  { %v2178_v10 = vld [vmem:[#allocation11 + $0x928] sm:$0xff]  ;;  %v8793_v13 = vcombine.high %v2173_v6, %v2177_v7  ;;  %v8792_v22 = vcombine.low %v2173_v6, %v2177_v7  ;;  %v2225_v6 = vld [vmem:[#allocation11 + $0xaa0] sm:$0xff] }
 0x1f5   :  { %v9921_v32 = vpop.eup %9920  ;;  %v8795_v14 = vcombine.high %v2174_v8, %v2178_v10  ;;  %v2222_v7 = vld [vmem:[#allocation11 + $0xa88] sm:$0xff] }
 0x1f6   :  { %v947_v41 = vadd.f32 1.0, %v9921_v32  ;;  %6646 = vmatpush1.bf16.msra.mxu0 %v8744_v17  ;;  %6892 = vmatpush1.bf16.msra.mxu1 %v8746_v19  ;;  %v2185_v17 = vld [vmem:[#allocation11 + $0x960] sm:$0xff]  ;;  %v2182_v19 = vld [vmem:[#allocation11 + $0x948] sm:$0xff] }
 0x1f7   :  { %6647 = vmatprep.subr.bf16.mxu0 %v8753_v23  ;;  %6893 = vmatprep.subr.bf16.mxu1 %v8755_v33  ;;  %v8794_v23 = vcombine.low %v2174_v8, %v2178_v10  ;;  %v8801_v33 = vcombine.high %v2181_v16, %v2185_v17  ;;  %v8803_v24 = vcombine.high %v2182_v19, %v2186_v20  ;;  %v2194_v32 = vld [vmem:[#allocation11 + $0x9a8] sm:$0xff] }
 0x1f8   :  { %v949_v38 = vmul.f32 %v947_v41, %v941_v34  ;;  %v8800_v34 = vcombine.low %v2181_v16, %v2185_v17  ;;  %v8802_v41 = vcombine.low %v2182_v19, %v2186_v20  ;;  %v8810_v40 = vcombine.low %v2190_v31, %v2194_v32  ;;  %v2226_v8 = vld [vmem:[#allocation11 + $0xaa8] sm:$0xff]  ;;  %v2229_v17 = vld [vmem:[#allocation11 + $0xac0] sm:$0xff] }
 0x1f9   :  { %v10412_v10 = vadd.f32 %v10390_v43, %v725_v61  ;;  %v8843_v16 = vcombine.high %v2222_v7, %v2226_v8  ;;  %v2233_v19 = vld [vmem:[#allocation11 + $0xae0] sm:$0xff]  ;;  %v2230_v20 = vld [vmem:[#allocation11 + $0xac8] sm:$0xff] }
 0x1fa   :  { %v10397_v44 = vpack.c.bf16 %v949_v38, %v949_v38  ;;  %6648 = vmatpush1.bf16.msra.mxu0 %v8752_v35  ;;  %6894 = vmatpush1.bf16.msra.mxu1 %v8754_v36  ;;  %v8809_v35 = vcombine.high %v2189_v26, %v2193_v29  ;;  %v8811_v36 = vcombine.high %v2190_v31, %v2194_v32  ;;  %v2202_v38 = vld [vmem:[#allocation11 + $0x9e8] sm:$0xff] }
 0x1fb   :  { %6658 = vmatprep.subr.bf16.mxu0 %v8761_v21  ;;  %6904 = vmatprep.subr.bf16.mxu1 %v8763_v37  ;;  %v2201_v21 = vld [vmem:[#allocation11 + $0x9e0] sm:$0xff]  ;;  %v2198_v37 = vld [vmem:[#allocation11 + $0x9c8] sm:$0xff]  ;;  %v8842_v26 = vcombine.low %v2222_v7, %v2226_v8 }
 0x1fc   :  { %v8817_v42 = vcombine.high %v2197_v15, %v2201_v21  ;;  %v8819_v18 = vcombine.high %v2198_v37, %v2202_v38  ;;  %v8816_v50 = vcombine.low %v2197_v15, %v2201_v21  ;;  %v8818_v51 = vcombine.low %v2198_v37, %v2202_v38  ;;  %v2238_v15 = vld [vmem:[#allocation11 + $0xb08] sm:$0xff]  ;;  %v2253_v7 = vld [vmem:[#allocation11 + $0xb80] sm:$0xff] }
 0x1fd   :  { %6650 = vmatmul.mubr.bf16.vlgmr.msra.gmra.mrb[12].mxu0 %v10399_v46  ;;  %6896 = vmatmul.mubr.bf16.vlgmr.msra.gmra.mrb[12].mxu1 %v10399_v46  ;;  %v2242_v21 = vld [vmem:[#allocation11 + $0xb28] sm:$0xff]  ;;  %v2257_v8 = vld [vmem:[#allocation11 + $0xba0] sm:$0xff] }
 0x1fe   :  { %6659 = vmatpush1.bf16.msra.mxu0 %v8760_v45  ;;  %6690 = vmatprep.mubr.bf16.mxu0 %v10397_v44  ;;  %v2205_v45 = vld [vmem:[#allocation11 + $0xa00] sm:$0xff] }
 0x1ff   :  { %6905 = vmatpush1.bf16.msra.mxu1 %v8762_v47  ;;  %6936 = vmatprep.mubr.bf16.mxu1 %v10397_v44  ;;  %v2209_v47 = vld [vmem:[#allocation11 + $0xa20] sm:$0xff] }
 0x200   :  { %6660 = vmatprep.subr.bf16.mxu0 %v8769_v48  ;;  %6906 = vmatprep.subr.bf16.mxu1 %v8771_v49  ;;  %v2206_v48 = vld [vmem:[#allocation11 + $0xa08] sm:$0xff]  ;;  %v8825_v52 = vcombine.high %v2205_v45, %v2209_v47  ;;  %v8824_v63 = vcombine.low %v2205_v45, %v2209_v47 }
 0x201   :  { %v2210_v49 = vld [vmem:[#allocation11 + $0xa28] sm:$0xff] }
 0x202   :  { %6661 = vmatpush1.bf16.msra.mxu0 %v8768_v54  ;;  %v8827_v53 = vcombine.high %v2206_v48, %v2210_v49  ;;  %v2213_v54 = vld [vmem:[#allocation11 + $0xa40] sm:$0xff]  ;;  %v8826_v0 = vcombine.low %v2206_v48, %v2210_v49 }
 0x203   :  { %6907 = vmatpush1.bf16.msra.mxu1 %v8770_v56  ;;  %6662 = vmatprep.subr.bf16.mxu0 %v8777_v58  ;;  %v2217_v56 = vld [vmem:[#allocation11 + $0xa60] sm:$0xff]  ;;  %v10405_v58 = vld [vmem:[#allocation7 + $0x6] sm:$0x3] }
 0x204   :  { %6908 = vmatprep.subr.bf16.mxu1 %v8779_v59  ;;  %v2214_v59 = vld [vmem:[#allocation11 + $0xa48] sm:$0xff]  ;;  %v8832_v25 = vcombine.low %v2213_v54, %v2217_v56 }
 0x206   :  { %6663 = vmatpush1.bf16.msra.mxu0 %v8776_v2  ;;  %v8833_v2 = vcombine.high %v2213_v54, %v2217_v56  ;;  %v2249_v56 = vld [vmem:[#allocation11 + $0xb60] sm:$0xff] }
 0x207   :  { %6909 = vmatpush1.bf16.msra.mxu1 %v8778_v3  ;;  %6664 = vmatprep.subr.bf16.mxu0 %v8785_v4  ;;  %v1004_v3 = vrot.slane %v10405_v58, %v10354_v30  ;;  %v8835_v4 = vcombine.high %v2214_v59, %v2218_v60 }
 0x208   :  { %6910 = vmatprep.subr.bf16.mxu1 %v8787_v5  ;;  %v2221_v5 = vld [vmem:[#allocation11 + $0xa80] sm:$0xff] }
 0x209   :  { %v8840_v43 = vcombine.low %v2221_v5, %v2225_v6 }
 0x20a   :  { %6665 = vmatpush1.bf16.msra.mxu0 %v8784_v11  ;;  %v8834_v11 = vcombine.low %v2214_v59, %v2218_v60  ;;  %v2246_v59 = vld [vmem:[#allocation11 + $0xb48] sm:$0xff] }
 0x20b   :  { %6911 = vmatpush1.bf16.msra.mxu1 %v8786_v12  ;;  %6666 = vmatprep.subr.bf16.mxu0 %v8793_v13  ;;  %v8841_v12 = vcombine.high %v2221_v5, %v2225_v6  ;;  %v1270_v13 = vld [vmem:[#allocation7 + $0x8] sm:$0x3]  ;;  %v2250_v60 = vld [vmem:[#allocation11 + $0xb68] sm:$0xff] }
 0x20c   :  { %6912 = vmatprep.subr.bf16.mxu1 %v8795_v14  ;;  %v10415_v14 = vadd.f32 %v10394_v57, %v1004_v3  ;;  %v1279_v29 = vrot.slane %v1270_v13, %v10354_v30  ;;  %v8849_v57 = vcombine.high %v2229_v17, %v2233_v19  ;;  %v8867_v6 = vcombine.high %v2246_v59, %v2250_v60 }
 0x20e   :  { %6667 = vmatpush1.bf16.msra.mxu0 %v8792_v22  ;;  %v2234_v22 = vld [vmem:[#allocation11 + $0xae8] sm:$0xff]  ;;  %v1218_v31 = vmul.f32 0.70710677, %v10415_v14 }
 0x20f   :  { %6913 = vmatpush1.bf16.msra.mxu1 %v8794_v23  ;;  %6668 = vmatprep.subr.bf16.mxu0 %v8801_v33  ;;  %v942_v23 = vmul.f32 0.70710677, %v10412_v10  ;;  %v1275_v33 = vrot.slane %v1270_v13, %v10351_v28  ;;  %v8851_v32 = vcombine.high %v2230_v20, %v2234_v22  ;;  %v8850_v45 = vcombine.low %v2230_v20, %v2234_v22  ;;  %v2261_v20 = vld [vmem:[#allocation11 + $0xbc0] sm:$0xff] }
 0x210   :  { %6914 = vmatprep.subr.bf16.mxu1 %v8803_v24  ;;  %v1590_v24 = vld [vmem:[#allocation7 + $0xa] sm:$0x3]  ;;  %v8866_v13 = vcombine.low %v2246_v59, %v2250_v60  ;;  %v2265_v22 = vld [vmem:[#allocation11 + $0xbe0] sm:$0xff] }
 0x211   :  { %9922 = verf.f32 %v942_v23  ;;  %v2262_v23 = vld [vmem:[#allocation11 + $0xbc8] sm:$0xff]  ;;  %v2289_v59 = vld [vmem:[#allocation11 + $0xca0] sm:$0xff] }
 0x212   :  { %6669 = vmatpush1.bf16.msra.mxu0 %v8800_v34  ;;  %v2237_v34 = vld [vmem:[#allocation11 + $0xb00] sm:$0xff]  ;;  %9924 = verf.f32 %v1218_v31 }
 0x213   :  { %6915 = vmatpush1.bf16.msra.mxu1 %v8802_v41  ;;  %6670 = vmatprep.subr.bf16.mxu0 %v8809_v35  ;;  %v1595_v35 = vrot.slane %v1590_v24, %v10351_v28 }
 0x214   :  { %6916 = vmatprep.subr.bf16.mxu1 %v8811_v36  ;;  %v2241_v36 = vld [vmem:[#allocation11 + $0xb20] sm:$0xff] }
 0x215   :  { %v8857_v49 = vcombine.high %v2237_v34, %v2241_v36 }
 0x216   :  { %6671 = vmatpush1.bf16.msra.mxu0 %v8808_v39  ;;  %v8848_v39 = vcombine.low %v2229_v17, %v2233_v19 }
 0x217   :  { %6917 = vmatpush1.bf16.msra.mxu1 %v8810_v40  ;;  %6672 = vmatprep.subr.bf16.mxu0 %v8817_v42  ;;  %v1599_v40 = vrot.slane %v1590_v24, %v10354_v30  ;;  %v8872_v24 = vcombine.low %v2253_v7, %v2257_v8 }
 0x218   :  { %6918 = vmatprep.subr.bf16.mxu1 %v8819_v18 }
 0x21a   :  { %6673 = vmatpush1.bf16.msra.mxu0 %v8816_v50  ;;  %v8859_v50 = vcombine.high %v2238_v15, %v2242_v21 }
 0x21b   :  { %6919 = vmatpush1.bf16.msra.mxu1 %v8818_v51  ;;  %6674 = vmatprep.subr.bf16.mxu0 %v8825_v52  ;;  %v2245_v51 = vld [vmem:[#allocation11 + $0xb40] sm:$0xff]  ;;  %v9923_v17 = vpop.eup %9922 }
 0x21c   :  { %6920 = vmatprep.subr.bf16.mxu1 %v8827_v53  ;;  %v8865_v5 = vcombine.high %v2245_v51, %v2249_v56 }
 0x21e   :  { %6675 = vmatpush1.bf16.msra.mxu0 %v8824_v63  ;;  %v8856_v63 = vcombine.low %v2237_v34, %v2241_v36  ;;  %v2273_v34 = vld [vmem:[#allocation11 + $0xc20] sm:$0xff] }
 0x21f   :  { %6921 = vmatpush1.bf16.msra.mxu1 %v8826_v0  ;;  %6676 = vmatprep.subr.bf16.mxu0 %v8833_v2  ;;  %v8858_v2 = vcombine.low %v2238_v15, %v2242_v21  ;;  %v2270_v15 = vld [vmem:[#allocation11 + $0xc08] sm:$0xff] }
 0x220   :  { %6922 = vmatprep.subr.bf16.mxu1 %v8835_v4  ;;  %v2274_v21 = vld [vmem:[#allocation11 + $0xc28] sm:$0xff] }
 0x222   :  { %6677 = vmatpush1.bf16.msra.mxu0 %v8832_v25  ;;  %v2254_v25 = vld [vmem:[#allocation11 + $0xb88] sm:$0xff] }
 0x223   :  { %6923 = vmatpush1.bf16.msra.mxu1 %v8834_v11  ;;  %6678 = vmatprep.subr.bf16.mxu0 %v8841_v12  ;;  %v2258_v11 = vld [vmem:[#allocation11 + $0xba8] sm:$0xff]  ;;  %v8864_v12 = vcombine.low %v2245_v51, %v2249_v56  ;;  %v2285_v56 = vld [vmem:[#allocation11 + $0xc80] sm:$0xff] }
 0x224   :  { %6924 = vmatprep.subr.bf16.mxu1 %v8843_v16  ;;  %v8873_v16 = vcombine.high %v2253_v7, %v2257_v8  ;;  %v8875_v19 = vcombine.high %v2254_v25, %v2258_v11  ;;  %v2282_v51 = vld [vmem:[#allocation11 + $0xc68] sm:$0xff]  ;;  %v2293_v7 = vld [vmem:[#allocation11 + $0xcc0] sm:$0xff] }
 0x225   :  { %v1483_v41 = vpop.f32.mrb[8].mxu0  ;;  %v2297_v8 = vld [vmem:[#allocation11 + $0xce0] sm:$0xff] }
 0x226   :  { %v10422_v37 = vadd.f32 %v1483_v41, %v1275_v33  ;;  %6679 = vmatpush1.bf16.msra.mxu0 %v8840_v43  ;;  %v1485_v38 = vpop.f32.mrb[9].mxu0  ;;  %v2266_v43 = vld [vmem:[#allocation11 + $0xbe8] sm:$0xff]  ;;  %v9925_v33 = vpop.eup %9924  ;;  %v940_v41 = vmul.f32 0.5, %v10412_v10 }
 0x227   :  { %6925 = vmatpush1.bf16.msra.mxu1 %v8842_v26  ;;  %v10425_v42 = vadd.f32 %v1485_v38, %v1279_v29  ;;  %v1487_v18 = vpop.f32.mrb[10].mxu0  ;;  %6680 = vmatprep.subr.bf16.mxu0 %v8849_v57  ;;  %v1803_v48 = vpop.f32.mrb[8].mxu1  ;;  %v946_v26 = vadd.f32 1.0, %v9923_v17  ;;  %v8874_v29 = vcombine.low %v2254_v25, %v2258_v11  ;;  %v8881_v57 = vcombine.high %v2261_v20, %v2265_v22  ;;  %v2278_v10 = vld [vmem:[#allocation11 + $0xc48] sm:$0xff] }
 0x228   :  { %v1488_v47 = vpop.f32.mrb[11].mxu0  ;;  %6926 = vmatprep.subr.bf16.mxu1 %v8851_v32  ;;  %v10427_v52 = vadd.f32 %v1803_v48, %v1595_v35  ;;  %v1805_v53 = vpop.f32.mrb[9].mxu1  ;;  %v8883_v31 = vcombine.high %v2262_v23, %v2266_v43  ;;  %v2269_v32 = vld [vmem:[#allocation11 + $0xc00] sm:$0xff]  ;;  %v1216_v35 = vmul.f32 0.5, %v10415_v14  ;;  %v1222_v36 = vadd.f32 1.0, %v9925_v33  ;;  %v2294_v25 = vld [vmem:[#allocation11 + $0xcc8] sm:$0xff] }
 0x229   :  { %v1490_v54 = vadd.f32 %v10425_v42, %v10422_v37  ;;  %v10431_v61 = vadd.f32 %v1805_v53, %v1599_v40  ;;  %v1807_v0 = vpop.f32.mrb[10].mxu1  ;;  %v8880_v38 = vcombine.low %v2261_v20, %v2265_v22  ;;  %v8882_v40 = vcombine.low %v2262_v23, %v2266_v43  ;;  %v2277_v48 = vld [vmem:[#allocation11 + $0xc40] sm:$0xff]  ;;  %v2298_v11 = vld [vmem:[#allocation11 + $0xce8] sm:$0xff] }
 0x22a   :  { %6681 = vmatpush1.bf16.msra.mxu0 %v8848_v39  ;;  %v1808_v3 = vpop.f32.mrb[11].mxu1  ;;  %v948_v39 = vmul.f32 %v946_v26, %v940_v41  ;;  %v8889_v18 = vcombine.high %v2269_v32, %v2273_v34  ;;  %v1224_v47 = vmul.f32 %v1222_v36, %v1216_v35  ;;  %v8890_v53 = vcombine.low %v2270_v15, %v2274_v21  ;;  %v2286_v0 = vld [vmem:[#allocation11 + $0xc88] sm:$0xff]  ;;  %v2305_v20 = vld [vmem:[#allocation11 + $0xd20] sm:$0xff] }
 0x22b   :  { %6927 = vmatpush1.bf16.msra.mxu1 %v8850_v45  ;;  %1491 = vadd.xlane.f32.xlu0 %v1490_v54  ;;  %v1810_v4 = vadd.f32 %v10431_v61, %v10427_v52  ;;  %v8891_v45 = vcombine.high %v2270_v15, %v2274_v21  ;;  %v8915_v17 = vcombine.high %v2294_v25, %v2298_v11  ;;  %v2302_v22 = vld [vmem:[#allocation11 + $0xd08] sm:$0xff]  ;;  %v2317_v15 = vld [vmem:[#allocation11 + $0xd80] sm:$0xff] }
 0x22c   :  { %6682 = vmatprep.subr.bf16.mxu0 %v8857_v49  ;;  %6928 = vmatprep.subr.bf16.mxu1 %v8859_v50  ;;  %v2281_v49 = vld [vmem:[#allocation11 + $0xc60] sm:$0xff]  ;;  %v8888_v50 = vcombine.low %v2269_v32, %v2273_v34  ;;  %v10437_v14 = vpack.c.bf16 %v948_v39, %v948_v39  ;;  %v10439_v60 = vpack.c.bf16 %v1224_v47, %v1224_v47  ;;  %v2306_v23 = vld [vmem:[#allocation11 + $0xd28] sm:$0xff] }
 0x22d   :  { %v8897_v54 = vcombine.high %v2277_v48, %v2281_v49  ;;  %v8896_v3 = vcombine.low %v2277_v48, %v2281_v49  ;;  %v8912_v43 = vcombine.low %v2293_v7, %v2297_v8  ;;  %v8914_v33 = vcombine.low %v2294_v25, %v2298_v11  ;;  %v2314_v32 = vld [vmem:[#allocation11 + $0xd68] sm:$0xff]  ;;  %v2321_v21 = vld [vmem:[#allocation11 + $0xda0] sm:$0xff] }
 0x22e   :  { %6683 = vmatpush1.bf16.msra.mxu0 %v8856_v63  ;;  %v8899_v63 = vcombine.high %v2278_v10, %v2282_v51  ;;  %v8923_v26 = vcombine.high %v2302_v22, %v2306_v23  ;;  %v8922_v41 = vcombine.low %v2302_v22, %v2306_v23  ;;  %v2322_v39 = vld [vmem:[#allocation11 + $0xda8] sm:$0xff]  ;;  %v2325_v48 = vld [vmem:[#allocation11 + $0xdc0] sm:$0xff] }
 0x22f   :  { %6929 = vmatpush1.bf16.msra.mxu1 %v8858_v2  ;;  %1811 = vadd.xlane.f32.xlu0 %v1810_v4  ;;  %v2290_v2 = vld [vmem:[#allocation11 + $0xca8] sm:$0xff]  ;;  %v8898_v4 = vcombine.low %v2278_v10, %v2282_v51  ;;  %v2329_v49 = vld [vmem:[#allocation11 + $0xde0] sm:$0xff]  ;;  %v8936_v51 = vcombine.low %v2317_v15, %v2321_v21 }
 0x230   :  { %6684 = vmatprep.subr.bf16.mxu0 %v8865_v5  ;;  %6930 = vmatprep.subr.bf16.mxu1 %v8867_v6  ;;  %v8905_v5 = vcombine.high %v2285_v56, %v2289_v59  ;;  %v8907_v6 = vcombine.high %v2286_v0, %v2290_v2  ;;  %v2330_v10 = vld [vmem:[#allocation11 + $0xde8] sm:$0xff]  ;;  %v2353_v22 = vld [vmem:[#allocation11 + $0xea0] sm:$0xff] }
 0x231   :  { %v2342_v25 = vld [vmem:[#allocation11 + $0xe48] sm:$0xff] }
 0x232   :  { %6685 = vmatpush1.bf16.msra.mxu0 %v8864_v12  ;;  %v8904_v12 = vcombine.low %v2285_v56, %v2289_v59  ;;  %v2333_v59 = vld [vmem:[#allocation11 + $0xe00] sm:$0xff]  ;;  %v2346_v11 = vld [vmem:[#allocation11 + $0xe68] sm:$0xff] }
 0x233   :  { %6931 = vmatpush1.bf16.msra.mxu1 %v8866_v13  ;;  %6686 = vmatprep.subr.bf16.mxu0 %v8873_v16  ;;  %v8906_v13 = vcombine.low %v2286_v0, %v2290_v2  ;;  %v8913_v16 = vcombine.high %v2293_v7, %v2297_v8  ;;  %v2334_v0 = vld [vmem:[#allocation11 + $0xe08] sm:$0xff]  ;;  %v2341_v7 = vld [vmem:[#allocation11 + $0xe40] sm:$0xff] }
 0x234   :  { %6932 = vmatprep.subr.bf16.mxu1 %v8875_v19  ;;  %v2301_v19 = vld [vmem:[#allocation11 + $0xd00] sm:$0xff]  ;;  %v2338_v2 = vld [vmem:[#allocation11 + $0xe28] sm:$0xff] }
 0x235   :  { %v8920_v34 = vcombine.low %v2301_v19, %v2305_v20  ;;  %v2345_v8 = vld [vmem:[#allocation11 + $0xe60] sm:$0xff]  ;;  %v2350_v23 = vld [vmem:[#allocation11 + $0xe88] sm:$0xff] }
 0x236   :  { %6687 = vmatpush1.bf16.msra.mxu0 %v8872_v24  ;;  %v8921_v24 = vcombine.high %v2301_v19, %v2305_v20  ;;  %v8963_v19 = vcombine.high %v2342_v25, %v2346_v11  ;;  %v2349_v20 = vld [vmem:[#allocation11 + $0xe80] sm:$0xff] }
 0x237   :  { %6933 = vmatpush1.bf16.msra.mxu1 %v8874_v29  ;;  %6688 = vmatprep.subr.bf16.mxu0 %v8881_v57  ;;  %v2309_v29 = vld [vmem:[#allocation11 + $0xd40] sm:$0xff] }
 0x238   :  { %6934 = vmatprep.subr.bf16.mxu1 %v8883_v31  ;;  %v2313_v57 = vld [vmem:[#allocation11 + $0xd60] sm:$0xff]  ;;  %v2310_v31 = vld [vmem:[#allocation11 + $0xd48] sm:$0xff] }
 0x239   :  { %v8929_v35 = vcombine.high %v2309_v29, %v2313_v57  ;;  %v8931_v36 = vcombine.high %v2310_v31, %v2314_v32 }
 0x23a   :  { %6689 = vmatpush1.bf16.msra.mxu0 %v8880_v38  ;;  %v2318_v38 = vld [vmem:[#allocation11 + $0xd88] sm:$0xff] }
 0x23b   :  { %6935 = vmatpush1.bf16.msra.mxu1 %v8882_v40  ;;  %6699 = vmatprep.subr.bf16.mxu0 %v8889_v18  ;;  %v8928_v40 = vcombine.low %v2309_v29, %v2313_v57  ;;  %v8930_v18 = vcombine.low %v2310_v31, %v2314_v32  ;;  %v8939_v47 = vcombine.high %v2318_v38, %v2322_v39  ;;  %v2357_v57 = vld [vmem:[#allocation11 + $0xec0] sm:$0xff]  ;;  %v2358_v32 = vld [vmem:[#allocation11 + $0xec8] sm:$0xff] }
 0x23c   :  { %6945 = vmatprep.subr.bf16.mxu1 %v8891_v45  ;;  %v8937_v45 = vcombine.high %v2317_v15, %v2321_v21  ;;  %v2361_v31 = vld [vmem:[#allocation11 + $0xee0] sm:$0xff] }
 0x23d   :  { %6691 = vmatmul.mubr.bf16.vlgmr.msra.gmra.mrb[12].mxu0 %v10437_v14  ;;  %v2365_v21 = vld [vmem:[#allocation11 + $0xf00] sm:$0xff] }
 0x23e   :  { %6937 = vmatmul.mubr.bf16.vlgmr.msra.gmra.mrb[12].mxu1 %v10437_v14  ;;  %6700 = vmatpush1.bf16.msra.mxu0 %v8888_v50  ;;  %v2326_v50 = vld [vmem:[#allocation11 + $0xdc8] sm:$0xff] }
 0x23f   :  { %6731 = vmatprep.mubr.bf16.mxu0 %v10439_v60  ;;  %6946 = vmatpush1.bf16.msra.mxu1 %v8890_v53  ;;  %v8938_v53 = vcombine.low %v2318_v38, %v2322_v39  ;;  %v8947_v56 = vcombine.high %v2326_v50, %v2330_v10  ;;  %v2369_v38 = vld [vmem:[#allocation11 + $0xf20] sm:$0xff]  ;;  %v2366_v39 = vld [vmem:[#allocation11 + $0xf08] sm:$0xff] }
 0x240   :  { %6977 = vmatprep.mubr.bf16.mxu1 %v10439_v60  ;;  %6701 = vmatprep.subr.bf16.mxu0 %v8897_v54  ;;  %v8945_v54 = vcombine.high %v2325_v48, %v2329_v49 }
 0x241   :  { %6947 = vmatprep.subr.bf16.mxu1 %v8899_v63  ;;  %v2337_v63 = vld [vmem:[#allocation11 + $0xe20] sm:$0xff] }
 0x242   :  { %6702 = vmatpush1.bf16.msra.mxu0 %v8896_v3  ;;  %v8944_v3 = vcombine.low %v2325_v48, %v2329_v49  ;;  %v2373_v49 = vld [vmem:[#allocation11 + $0xf40] sm:$0xff] }
 0x243   :  { %6948 = vmatpush1.bf16.msra.mxu1 %v8898_v4  ;;  %6703 = vmatprep.subr.bf16.mxu0 %v8905_v5  ;;  %v8946_v4 = vcombine.low %v2326_v50, %v2330_v10  ;;  %v8953_v5 = vcombine.high %v2333_v59, %v2337_v63  ;;  %v2377_v50 = vld [vmem:[#allocation11 + $0xf60] sm:$0xff]  ;;  %v2374_v10 = vld [vmem:[#allocation11 + $0xf48] sm:$0xff] }
 0x244   :  { %6949 = vmatprep.subr.bf16.mxu1 %v8907_v6  ;;  %v8955_v6 = vcombine.high %v2334_v0, %v2338_v2 }
 0x246   :  { %6704 = vmatpush1.bf16.msra.mxu0 %v8904_v12  ;;  %v1000_v12 = vrot.slane %v10405_v58, %v10351_v28  ;;  %v8962_v58 = vcombine.low %v2342_v25, %v2346_v11  ;;  %v2389_v25 = vld [vmem:[#allocation11 + $0xfc0] sm:$0xff] }
 0x247   :  { %6950 = vmatpush1.bf16.msra.mxu1 %v8906_v13  ;;  %6705 = vmatprep.subr.bf16.mxu0 %v8913_v16  ;;  %v8952_v13 = vcombine.low %v2333_v59, %v2337_v63  ;;  %v8954_v16 = vcombine.low %v2334_v0, %v2338_v2  ;;  %v2381_v63 = vld [vmem:[#allocation11 + $0xf80] sm:$0xff]  ;;  %v2382_v2 = vld [vmem:[#allocation11 + $0xf88] sm:$0xff] }
 0x248   :  { %6951 = vmatprep.subr.bf16.mxu1 %v8915_v17  ;;  %v8961_v17 = vcombine.high %v2341_v7, %v2345_v8  ;;  %v2385_v0 = vld [vmem:[#allocation11 + $0xfa0] sm:$0xff] }
 0x249   :  { %v2393_v11 = vld [vmem:[#allocation11 + $0xfe0] sm:$0xff] }
 0x24a   :  { %6706 = vmatpush1.bf16.msra.mxu0 %v8912_v43  ;;  %v2354_v43 = vld [vmem:[#allocation11 + $0xea8] sm:$0xff] }
 0x24b   :  { %6952 = vmatpush1.bf16.msra.mxu1 %v8914_v33  ;;  %6707 = vmatprep.subr.bf16.mxu0 %v8921_v24  ;;  %v10448_v33 = vadd.f32 %v10392_v55, %v1000_v12  ;;  %v8960_v24 = vcombine.low %v2341_v7, %v2345_v8  ;;  %v8971_v29 = vcombine.high %v2350_v23, %v2354_v43  ;;  %v2390_v12 = vld [vmem:[#allocation11 + $0xfc8] sm:$0xff] }
 0x24c   :  { %6953 = vmatprep.subr.bf16.mxu1 %v8923_v26  ;;  %v8969_v26 = vcombine.high %v2349_v20, %v2353_v22  ;;  %v8970_v55 = vcombine.low %v2350_v23, %v2354_v43  ;;  %v2397_v43 = vld [vmem:[#allocation11 + $0x1000] sm:$0xff] }
 0x24e   :  { %6708 = vmatpush1.bf16.msra.mxu0 %v8920_v34  ;;  %v2362_v34 = vld [vmem:[#allocation11 + $0xee8] sm:$0xff] }
 0x24f   :  { %6954 = vmatpush1.bf16.msra.mxu1 %v8922_v41  ;;  %6709 = vmatprep.subr.bf16.mxu0 %v8929_v35  ;;  %v1217_v41 = vmul.f32 0.70710677, %v10448_v33  ;;  %v8968_v35 = vcombine.low %v2349_v20, %v2353_v22  ;;  %v8979_v15 = vcombine.high %v2358_v32, %v2362_v34  ;;  %v9009_v22 = vcombine.high %v2389_v25, %v2393_v11 }
 0x250   :  { %6955 = vmatprep.subr.bf16.mxu1 %v8931_v36  ;;  %v8977_v36 = vcombine.high %v2357_v57, %v2361_v31 }
 0x251   :  { %9926 = verf.f32 %v1217_v41  ;;  %v2409_v41 = vld [vmem:[#allocation11 + $0x1060] sm:$0xff] }
 0x252   :  { %6710 = vmatpush1.bf16.msra.mxu0 %v8928_v40  ;;  %v2370_v40 = vld [vmem:[#allocation11 + $0xf28] sm:$0xff] }
 0x253   :  { %6956 = vmatpush1.bf16.msra.mxu1 %v8930_v18  ;;  %6711 = vmatprep.subr.bf16.mxu0 %v8937_v45  ;;  %v8976_v18 = vcombine.low %v2357_v57, %v2361_v31  ;;  %v8978_v45 = vcombine.low %v2358_v32, %v2362_v34  ;;  %v8987_v48 = vcombine.high %v2366_v39, %v2370_v40  ;;  %v2405_v34 = vld [vmem:[#allocation11 + $0x1040] sm:$0xff] }
 0x254   :  { %6957 = vmatprep.subr.bf16.mxu1 %v8939_v47  ;;  %v8985_v47 = vcombine.high %v2365_v21, %v2369_v38 }
 0x256   :  { %6712 = vmatpush1.bf16.msra.mxu0 %v8936_v51  ;;  %v2378_v51 = vld [vmem:[#allocation11 + $0xf68] sm:$0xff] }
 0x257   :  { %6958 = vmatpush1.bf16.msra.mxu1 %v8938_v53  ;;  %6713 = vmatprep.subr.bf16.mxu0 %v8945_v54  ;;  %v8984_v53 = vcombine.low %v2365_v21, %v2369_v38  ;;  %v8986_v54 = vcombine.low %v2366_v39, %v2370_v40  ;;  %v8995_v59 = vcombine.high %v2374_v10, %v2378_v51  ;;  %v2413_v40 = vld [vmem:[#allocation11 + $0x1080] sm:$0xff] }
 0x258   :  { %6959 = vmatprep.subr.bf16.mxu1 %v8947_v56  ;;  %v8993_v56 = vcombine.high %v2373_v49, %v2377_v50  ;;  %v9025_v38 = vcombine.high %v2405_v34, %v2409_v41 }
 0x25a   :  { %6714 = vmatpush1.bf16.msra.mxu0 %v8944_v3  ;;  %v2386_v3 = vld [vmem:[#allocation11 + $0xfa8] sm:$0xff] }
 0x25b   :  { %6960 = vmatpush1.bf16.msra.mxu1 %v8946_v4  ;;  %6715 = vmatprep.subr.bf16.mxu0 %v8953_v5  ;;  %v8992_v4 = vcombine.low %v2373_v49, %v2377_v50  ;;  %v8994_v5 = vcombine.low %v2374_v10, %v2378_v51  ;;  %v9927_v7 = vpop.eup %9926  ;;  %v9003_v8 = vcombine.high %v2382_v2, %v2386_v3  ;;  %v2421_v51 = vld [vmem:[#allocation11 + $0x10c0] sm:$0xff] }
 0x25c   :  { %6961 = vmatprep.subr.bf16.mxu1 %v8955_v6  ;;  %v9001_v6 = vcombine.high %v2381_v63, %v2385_v0  ;;  %v9002_v20 = vcombine.low %v2382_v2, %v2386_v3  ;;  %v2429_v3 = vld [vmem:[#allocation11 + $0x1100] sm:$0xff] }
 0x25e   :  { %6716 = vmatpush1.bf16.msra.mxu0 %v8952_v13  ;;  %v2394_v13 = vld [vmem:[#allocation11 + $0xfe8] sm:$0xff] }
 0x25f   :  { %6962 = vmatpush1.bf16.msra.mxu1 %v8954_v16  ;;  %6717 = vmatprep.subr.bf16.mxu0 %v8961_v17  ;;  %v9000_v16 = vcombine.low %v2381_v63, %v2385_v0  ;;  %v1215_v17 = vmul.f32 0.5, %v10448_v33  ;;  %v9011_v23 = vcombine.high %v2390_v12, %v2394_v13  ;;  %v9010_v31 = vcombine.low %v2390_v12, %v2394_v13  ;;  %v2437_v12 = vld [vmem:[#allocation11 + $0x1140] sm:$0xff] }
 0x260   :  { %6963 = vmatprep.subr.bf16.mxu1 %v8963_v19  ;;  %v1221_v19 = vadd.f32 1.0, %v9927_v7  ;;  %v2441_v13 = vld [vmem:[#allocation11 + $0x1160] sm:$0xff] }
 0x262   :  { %6718 = vmatpush1.bf16.msra.mxu0 %v8960_v24  ;;  %v2401_v24 = vld [vmem:[#allocation11 + $0x1020] sm:$0xff]  ;;  %v1223_v57 = vmul.f32 %v1221_v19, %v1215_v17  ;;  %v2442_v17 = vld [vmem:[#allocation11 + $0x1168] sm:$0xff] }
 0x263   :  { %6964 = vmatpush1.bf16.msra.mxu1 %v8962_v58  ;;  %6719 = vmatprep.subr.bf16.mxu0 %v8969_v26  ;;  %v2398_v58 = vld [vmem:[#allocation11 + $0x1008] sm:$0xff]  ;;  %v9017_v32 = vcombine.high %v2397_v43, %v2401_v24 }
 0x264   :  { %6965 = vmatprep.subr.bf16.mxu1 %v8971_v29  ;;  %v2402_v26 = vld [vmem:[#allocation11 + $0x1028] sm:$0xff]  ;;  %v9008_v29 = vcombine.low %v2389_v25, %v2393_v11 }
 0x265   :  { %v9019_v33 = vcombine.high %v2398_v58, %v2402_v26  ;;  %v9018_v21 = vcombine.low %v2398_v58, %v2402_v26 }
 0x266   :  { %6720 = vmatpush1.bf16.msra.mxu0 %v8968_v35  ;;  %v2406_v35 = vld [vmem:[#allocation11 + $0x1048] sm:$0xff] }
 0x267   :  { %6966 = vmatpush1.bf16.msra.mxu1 %v8970_v55  ;;  %6721 = vmatprep.subr.bf16.mxu0 %v8977_v36  ;;  %v2410_v55 = vld [vmem:[#allocation11 + $0x1068] sm:$0xff]  ;;  %v9016_v36 = vcombine.low %v2397_v43, %v2401_v24  ;;  %v9056_v43 = vcombine.low %v2437_v12, %v2441_v13 }
 0x268   :  { %6967 = vmatprep.subr.bf16.mxu1 %v8979_v15  ;;  %v10452_v15 = vpack.c.bf16 %v1223_v57, %v1223_v57  ;;  %v9027_v39 = vcombine.high %v2406_v35, %v2410_v55  ;;  %v9026_v49 = vcombine.low %v2406_v35, %v2410_v55 }
 0x26a   :  { %6722 = vmatpush1.bf16.msra.mxu0 %v8976_v18  ;;  %v2417_v18 = vld [vmem:[#allocation11 + $0x10a0] sm:$0xff] }
 0x26b   :  { %6968 = vmatpush1.bf16.msra.mxu1 %v8978_v45  ;;  %6723 = vmatprep.subr.bf16.mxu0 %v8985_v47  ;;  %v2414_v45 = vld [vmem:[#allocation11 + $0x1088] sm:$0xff]  ;;  %v9033_v50 = vcombine.high %v2413_v40, %v2417_v18 }
 0x26c   :  { %6969 = vmatprep.subr.bf16.mxu1 %v8987_v48  ;;  %v2418_v47 = vld [vmem:[#allocation11 + $0x10a8] sm:$0xff]  ;;  %v9024_v48 = vcombine.low %v2405_v34, %v2409_v41 }
 0x26d   :  { %v9035_v10 = vcombine.high %v2414_v45, %v2418_v47  ;;  %v9034_v63 = vcombine.low %v2414_v45, %v2418_v47 }
 0x26e   :  { %6724 = vmatpush1.bf16.msra.mxu0 %v8984_v53  ;;  %v2425_v53 = vld [vmem:[#allocation11 + $0x10e0] sm:$0xff] }
 0x26f   :  { %6970 = vmatpush1.bf16.msra.mxu1 %v8986_v54  ;;  %6725 = vmatprep.subr.bf16.mxu0 %v8993_v56  ;;  %v2422_v54 = vld [vmem:[#allocation11 + $0x10c8] sm:$0xff]  ;;  %v9041_v0 = vcombine.high %v2421_v51, %v2425_v53  ;;  %v9040_v7 = vcombine.low %v2421_v51, %v2425_v53 }
 0x270   :  { %6971 = vmatprep.subr.bf16.mxu1 %v8995_v59  ;;  %v2426_v56 = vld [vmem:[#allocation11 + $0x10e8] sm:$0xff]  ;;  %v9032_v59 = vcombine.low %v2413_v40, %v2417_v18 }
 0x271   :  { %v9043_v2 = vcombine.high %v2422_v54, %v2426_v56  ;;  %v2450_v18 = vld [vmem:[#allocation11 + $0x11a8] sm:$0xff] }
 0x272   :  { %6726 = vmatpush1.bf16.msra.mxu0 %v8992_v4  ;;  %v2433_v4 = vld [vmem:[#allocation11 + $0x1120] sm:$0xff] }
 0x273   :  { %6972 = vmatpush1.bf16.msra.mxu1 %v8994_v5  ;;  %6727 = vmatprep.subr.bf16.mxu0 %v9001_v6  ;;  %v2430_v5 = vld [vmem:[#allocation11 + $0x1108] sm:$0xff]  ;;  %v9049_v25 = vcombine.high %v2429_v3, %v2433_v4  ;;  %v9048_v19 = vcombine.low %v2429_v3, %v2433_v4 }
 0x274   :  { %6973 = vmatprep.subr.bf16.mxu1 %v9003_v8  ;;  %v2434_v6 = vld [vmem:[#allocation11 + $0x1128] sm:$0xff]  ;;  %v9042_v8 = vcombine.low %v2422_v54, %v2426_v56  ;;  %v2461_v56 = vld [vmem:[#allocation11 + $0x1200] sm:$0xff] }
 0x275   :  { %v9051_v11 = vcombine.high %v2430_v5, %v2434_v6 }
 0x276   :  { %6728 = vmatpush1.bf16.msra.mxu0 %v9000_v16  ;;  %v2438_v16 = vld [vmem:[#allocation11 + $0x1148] sm:$0xff] }
 0x277   :  { %6974 = vmatpush1.bf16.msra.mxu1 %v9002_v20  ;;  %6729 = vmatprep.subr.bf16.mxu0 %v9009_v22  ;;  %v9050_v20 = vcombine.low %v2430_v5, %v2434_v6  ;;  %v9057_v22 = vcombine.high %v2437_v12, %v2441_v13  ;;  %v9058_v24 = vcombine.low %v2438_v16, %v2442_v17  ;;  %v2469_v6 = vld [vmem:[#allocation11 + $0x1240] sm:$0xff] }
 0x278   :  { %6975 = vmatprep.subr.bf16.mxu1 %v9011_v23  ;;  %v9059_v23 = vcombine.high %v2438_v16, %v2442_v17  ;;  %v2477_v17 = vld [vmem:[#allocation11 + $0x1280] sm:$0xff] }
 0x27a   :  { %6730 = vmatpush1.bf16.msra.mxu0 %v9008_v29 }
 0x27b   :  { %6976 = vmatpush1.bf16.msra.mxu1 %v9010_v31  ;;  %6740 = vmatprep.subr.bf16.mxu0 %v9017_v32 }
 0x27c   :  { %6986 = vmatprep.subr.bf16.mxu1 %v9019_v33 }
 0x27d   :  { %6732 = vmatmul.mubr.bf16.vlgmr.msra.gmra.mrb[12].mxu0 %v10452_v15 }
 0x27e   :  { %6978 = vmatmul.mubr.bf16.vlgmr.msra.gmra.mrb[12].mxu1 %v10452_v15  ;;  %6741 = vmatpush1.bf16.msra.mxu0 %v9016_v36 }
 0x27f   :  { %6987 = vmatpush1.bf16.msra.mxu1 %v9018_v21  ;;  %6742 = vmatprep.subr.bf16.mxu0 %v9025_v38  ;;  %v2445_v21 = vld [vmem:[#allocation11 + $0x1180] sm:$0xff] }
 0x280   :  { %6988 = vmatprep.subr.bf16.mxu1 %v9027_v39  ;;  %v2449_v38 = vld [vmem:[#allocation11 + $0x11a0] sm:$0xff]  ;;  %v2446_v39 = vld [vmem:[#allocation11 + $0x1188] sm:$0xff] }
 0x281   :  { %v9065_v40 = vcombine.high %v2445_v21, %v2449_v38  ;;  %v9066_v45 = vcombine.low %v2446_v39, %v2450_v18  ;;  %v9067_v47 = vcombine.high %v2446_v39, %v2450_v18  ;;  %v2494_v39 = vld [vmem:[#allocation11 + $0x1308] sm:$0xff]  ;;  %v2501_v18 = vld [vmem:[#allocation11 + $0x1340] sm:$0xff] }
 0x282   :  { %6743 = vmatpush1.bf16.msra.mxu0 %v9024_v48  ;;  %v2457_v48 = vld [vmem:[#allocation11 + $0x11e0] sm:$0xff] }
 0x283   :  { %6989 = vmatpush1.bf16.msra.mxu1 %v9026_v49  ;;  %6744 = vmatprep.subr.bf16.mxu0 %v9033_v50  ;;  %v2454_v49 = vld [vmem:[#allocation11 + $0x11c8] sm:$0xff] }
 0x284   :  { %6990 = vmatprep.subr.bf16.mxu1 %v9035_v10  ;;  %v2458_v10 = vld [vmem:[#allocation11 + $0x11e8] sm:$0xff] }
 0x285   :  { %v9074_v53 = vcombine.low %v2454_v49, %v2458_v10  ;;  %v9075_v54 = vcombine.high %v2454_v49, %v2458_v10 }
 0x286   :  { %6745 = vmatpush1.bf16.msra.mxu0 %v9032_v59  ;;  %v2465_v59 = vld [vmem:[#allocation11 + $0x1220] sm:$0xff] }
 0x287   :  { %6991 = vmatpush1.bf16.msra.mxu1 %v9034_v63  ;;  %6746 = vmatprep.subr.bf16.mxu0 %v9041_v0  ;;  %v2462_v63 = vld [vmem:[#allocation11 + $0x1208] sm:$0xff]  ;;  %v9081_v0 = vcombine.high %v2461_v56, %v2465_v59  ;;  %v9080_v3 = vcombine.low %v2461_v56, %v2465_v59 }
 0x288   :  { %6992 = vmatprep.subr.bf16.mxu1 %v9043_v2  ;;  %v2466_v2 = vld [vmem:[#allocation11 + $0x1228] sm:$0xff] }
 0x289   :  { %v9082_v4 = vcombine.low %v2462_v63, %v2466_v2  ;;  %v9083_v5 = vcombine.high %v2462_v63, %v2466_v2  ;;  %v2514_v56 = vld [vmem:[#allocation11 + $0x13a8] sm:$0xff] }
 0x28a   :  { %6747 = vmatpush1.bf16.msra.mxu0 %v9040_v7  ;;  %v2473_v7 = vld [vmem:[#allocation11 + $0x1260] sm:$0xff] }
 0x28b   :  { %6993 = vmatpush1.bf16.msra.mxu1 %v9042_v8  ;;  %6748 = vmatprep.subr.bf16.mxu0 %v9049_v25  ;;  %v2470_v8 = vld [vmem:[#allocation11 + $0x1248] sm:$0xff]  ;;  %v9089_v25 = vcombine.high %v2469_v6, %v2473_v7  ;;  %v9088_v12 = vcombine.low %v2469_v6, %v2473_v7 }
 0x28c   :  { %6994 = vmatprep.subr.bf16.mxu1 %v9051_v11  ;;  %v2474_v11 = vld [vmem:[#allocation11 + $0x1268] sm:$0xff] }
 0x28d   :  { %v9090_v13 = vcombine.low %v2470_v8, %v2474_v11  ;;  %v9091_v16 = vcombine.high %v2470_v8, %v2474_v11  ;;  %v2522_v6 = vld [vmem:[#allocation11 + $0x13e8] sm:$0xff] }
 0x28e   :  { %6749 = vmatpush1.bf16.msra.mxu0 %v9048_v19  ;;  %v2481_v19 = vld [vmem:[#allocation11 + $0x12a0] sm:$0xff] }
 0x28f   :  { %6995 = vmatpush1.bf16.msra.mxu1 %v9050_v20  ;;  %6750 = vmatprep.subr.bf16.mxu0 %v9057_v22  ;;  %v2478_v20 = vld [vmem:[#allocation11 + $0x1288] sm:$0xff]  ;;  %v9097_v22 = vcombine.high %v2477_v17, %v2481_v19 }
 0x290   :  { %6996 = vmatprep.subr.bf16.mxu1 %v9059_v23  ;;  %v2482_v23 = vld [vmem:[#allocation11 + $0x12a8] sm:$0xff] }
 0x292   :  { %6751 = vmatpush1.bf16.msra.mxu0 %v9056_v43  ;;  %v9096_v43 = vcombine.low %v2477_v17, %v2481_v19  ;;  %v10478_v17 = vld [vmem:[#allocation11 + $0x1420] sm:$0xff]  ;;  %v10480_v19 = vld [vmem:[#allocation11 + $0x1408] sm:$0xff] }
 0x293   :  { %6997 = vmatpush1.bf16.msra.mxu1 %v9058_v24  ;;  %6752 = vmatprep.subr.bf16.mxu0 %v9065_v40  ;;  %v9098_v24 = vcombine.low %v2478_v20, %v2482_v23  ;;  %v2498_v40 = vld [vmem:[#allocation11 + $0x1328] sm:$0xff] }
 0x294   :  { %6998 = vmatprep.subr.bf16.mxu1 %v9067_v47  ;;  %v2502_v47 = vld [vmem:[#allocation11 + $0x1348] sm:$0xff]  ;;  %v9114_v49 = vcombine.low %v2494_v39, %v2498_v40 }
 0x297   :  { %6999 = vmatpush1.bf16.msra.mxu1 %v9066_v45  ;;  %v2505_v45 = vld [vmem:[#allocation11 + $0x1360] sm:$0xff] }
 0x298   :  { %7000 = vmatprep.subr.bf16.mxu1 %v9075_v54  ;;  %v2510_v54 = vld [vmem:[#allocation11 + $0x1388] sm:$0xff]  ;;  %v9120_v59 = vcombine.low %v2501_v18, %v2505_v45 }
 0x299   :  { %v9131_v2 = vcombine.high %v2510_v54, %v2514_v56  ;;  %v9130_v8 = vcombine.low %v2510_v54, %v2514_v56 }
 0x29b   :  { %7001 = vmatpush1.bf16.msra.mxu1 %v9074_v53  ;;  %v2513_v53 = vld [vmem:[#allocation11 + $0x13a0] sm:$0xff] }
 0x29c   :  { %7002 = vmatprep.subr.bf16.mxu1 %v9083_v5  ;;  %v2518_v5 = vld [vmem:[#allocation11 + $0x13c8] sm:$0xff] }
 0x29d   :  { %v9139_v11 = vcombine.high %v2518_v5, %v2522_v6 }
 0x29f   :  { %7003 = vmatpush1.bf16.msra.mxu1 %v9082_v4  ;;  %v2521_v4 = vld [vmem:[#allocation11 + $0x13e0] sm:$0xff] }
 0x2a0   :  { %7004 = vmatprep.subr.bf16.mxu1 %v9091_v16  ;;  %v10476_v16 = vld [vmem:[#allocation11 + $0x1400] sm:$0xff] }
 0x2a3   :  { %7005 = vmatpush1.bf16.msra.mxu1 %v9090_v13  ;;  %v9138_v13 = vcombine.low %v2518_v5, %v2522_v6 }
 0x2b8   :  { %v1492_v58 = vpop.xlane.xlu0 %1491 }
 0x2b9   :  { %v1494_v26 = vmul.f32 0.00390625, %v1492_v58  ;;  %v9099_v58 = vcombine.high %v2478_v20, %v2482_v23  ;;  %v9144_v20 = vcombine.low %v10476_v16, %v10478_v17  ;;  %v10486_v23 = vld [vmem:[#allocation11 + $0x1428] sm:$0xff] }
 0x2bb   :  { %v10457_v29 = vsub.f32 %v10422_v37, %v1494_v26  ;;  %v10460_v57 = vsub.f32 %v10425_v42, %v1494_v26  ;;  %7006 = vmatprep.subr.bf16.mxu1 %v9099_v58  ;;  %v2485_v26 = vld [vmem:[#allocation11 + $0x12c0] sm:$0xff] }
 0x2bc   :  { %v1812_v31 = vpop.xlane.xlu0 %1811  ;;  %7007 = vmatpush1.bf16.msra.mxu1 %v9098_v24  ;;  %v9147_v24 = vcombine.high %v10480_v19, %v10486_v23 }
 0x2bd   :  { %v1813_v32 = vmul.f32 0.00390625, %v1812_v31  ;;  %v1497_v33 = vmul.f32 %v10457_v29, %v10457_v29  ;;  %v1498_v34 = vmul.f32 %v10460_v57, %v10460_v57  ;;  %v2489_v31 = vld [vmem:[#allocation11 + $0x12e0] sm:$0xff] }
 0x2bf   :  { %v10467_v41 = vsub.f32 %v10427_v52, %v1813_v32  ;;  %v10470_v35 = vsub.f32 %v10431_v61, %v1813_v32  ;;  %v1499_v55 = vadd.f32 %v1498_v34, %v1497_v33  ;;  %v9064_v52 = vcombine.low %v2445_v21, %v2449_v38  ;;  %v2453_v61 = vld [vmem:[#allocation11 + $0x11c0] sm:$0xff]  ;;  %v2486_v32 = vld [vmem:[#allocation11 + $0x12c8] sm:$0xff] }
 0x2c0   :  { %v9073_v50 = vcombine.high %v2453_v61, %v2457_v48  ;;  %v9072_v51 = vcombine.low %v2453_v61, %v2457_v48  ;;  %v9104_v33 = vcombine.low %v2485_v26, %v2489_v31  ;;  %v9105_v34 = vcombine.high %v2485_v26, %v2489_v31  ;;  %v2506_v61 = vld [vmem:[#allocation11 + $0x1368] sm:$0xff] }
 0x2c1   :  { %1500 = vadd.xlane.f32.xlu1 %v1499_v55  ;;  %v1816_v37 = vmul.f32 %v10467_v41, %v10467_v41  ;;  %v1817_v42 = vmul.f32 %v10470_v35, %v10470_v35  ;;  %6753 = vmatpush1.bf16.msra.mxu0 %v9064_v52  ;;  %v2490_v55 = vld [vmem:[#allocation11 + $0x12e8] sm:$0xff]  ;;  %v9115_v52 = vcombine.high %v2494_v39, %v2498_v40 }
 0x2c2   :  { %6754 = vmatprep.subr.bf16.mxu0 %v9073_v50  ;;  %v9107_v21 = vcombine.high %v2486_v32, %v2490_v55  ;;  %v9121_v50 = vcombine.high %v2501_v18, %v2505_v45  ;;  %v9123_v10 = vcombine.high %v2502_v47, %v2506_v61  ;;  %v9122_v63 = vcombine.low %v2502_v47, %v2506_v61  ;;  %v10500_v45 = vld [vmem:[#allocation10 + $0x2] sm:$0x3] }
 0x2c3   :  { %v1818_v36 = vadd.f32 %v1817_v42, %v1816_v37  ;;  %v2493_v37 = vld [vmem:[#allocation11 + $0x1300] sm:$0xff] }
 0x2c4   :  { %v2497_v42 = vld [vmem:[#allocation11 + $0x1320] sm:$0xff]  ;;  %7008 = vmatprep.subr.bf16.mxu1 %v9107_v21 }
 0x2c5   :  { %1819 = vadd.xlane.f32.xlu1 %v1818_v36  ;;  %6755 = vmatpush1.bf16.msra.mxu0 %v9072_v51  ;;  %v9106_v36 = vcombine.low %v2486_v32, %v2490_v55  ;;  %v9113_v38 = vcombine.high %v2493_v37, %v2497_v42  ;;  %v9112_v48 = vcombine.low %v2493_v37, %v2497_v42  ;;  %v2509_v51 = vld [vmem:[#allocation11 + $0x1380] sm:$0xff]  ;;  %v1507_v55 = vld [vmem:[#allocation8] sm:$0x3]  ;;  %v1521_v37 = vld [vmem:[#allocation10] sm:$0x3] }
 0x2c6   :  { %6756 = vmatprep.subr.bf16.mxu0 %v9081_v0  ;;  %v9129_v0 = vcombine.high %v2509_v51, %v2513_v53  ;;  %v9128_v7 = vcombine.low %v2509_v51, %v2513_v53  ;;  %v1516_v42 = vrot.slane %v1507_v55, %v10354_v30  ;;  %v1530_v18 = vrot.slane %v1521_v37, %v10354_v30 }
 0x2c7   :  { %7009 = vmatpush1.bf16.msra.mxu1 %v9106_v36  ;;  %v1512_v36 = vrot.slane %v1507_v55, %v10351_v28  ;;  %v2542_v55 = vld [vmem:[#allocation11 + $0x1488] sm:$0xff] }
 0x2c8   :  { %7010 = vmatprep.subr.bf16.mxu1 %v9115_v52  ;;  %v1526_v52 = vrot.slane %v1521_v37, %v10351_v28  ;;  %v2546_v37 = vld [vmem:[#allocation11 + $0x14a8] sm:$0xff] }
 0x2c9   :  { %6757 = vmatpush1.bf16.msra.mxu0 %v9080_v3  ;;  %v2517_v3 = vld [vmem:[#allocation11 + $0x13c0] sm:$0xff] }
 0x2ca   :  { %6758 = vmatprep.subr.bf16.mxu0 %v9089_v25  ;;  %v9137_v25 = vcombine.high %v2517_v3, %v2521_v4 }
 0x2cb   :  { %7011 = vmatpush1.bf16.msra.mxu1 %v9114_v49 }
 0x2cc   :  { %7012 = vmatprep.subr.bf16.mxu1 %v9123_v10 }
 0x2cd   :  { %6759 = vmatpush1.bf16.msra.mxu0 %v9088_v12  ;;  %v9136_v12 = vcombine.low %v2517_v3, %v2521_v4 }
 0x2ce   :  { %6760 = vmatprep.subr.bf16.mxu0 %v9097_v22  ;;  %v9145_v22 = vcombine.high %v10476_v16, %v10478_v17  ;;  %v2550_v16 = vld [vmem:[#allocation11 + $0x14c8] sm:$0xff] }
 0x2cf   :  { %7013 = vmatpush1.bf16.msra.mxu1 %v9122_v63  ;;  %v2554_v17 = vld [vmem:[#allocation11 + $0x14e8] sm:$0xff] }
 0x2d0   :  { %7014 = vmatprep.subr.bf16.mxu1 %v9131_v2 }
 0x2d1   :  { %6761 = vmatpush1.bf16.msra.mxu0 %v9096_v43  ;;  %v9146_v43 = vcombine.low %v10480_v19, %v10486_v23 }
 0x2d2   :  { %6762 = vmatprep.subr.bf16.mxu0 %v9105_v34 }
 0x2d3   :  { %7015 = vmatpush1.bf16.msra.mxu1 %v9130_v8  ;;  %v2534_v8 = vld [vmem:[#allocation11 + $0x1448] sm:$0xff] }
 0x2d4   :  { %7016 = vmatprep.subr.bf16.mxu1 %v9139_v11 }
 0x2d5   :  { %6763 = vmatpush1.bf16.msra.mxu0 %v9104_v33 }
 0x2d6   :  { %6764 = vmatprep.subr.bf16.mxu0 %v9113_v38  ;;  %v10494_v38 = vld [vmem:[#allocation8 + $0x2] sm:$0x3] }
 0x2d7   :  { %7017 = vmatpush1.bf16.msra.mxu1 %v9138_v13  ;;  %v1836_v47 = vrot.slane %v10494_v38, %v10354_v30 }
 0x2d8   :  { %7027 = vmatprep.subr.bf16.mxu1 %v9147_v24 }
 0x2d9   :  { %6765 = vmatpush1.bf16.msra.mxu0 %v9112_v48 }
 0x2da   :  { %6766 = vmatprep.subr.bf16.mxu0 %v9121_v50 }
 0x2dd   :  { %6767 = vmatpush1.bf16.msra.mxu0 %v9120_v59 }
 0x2de   :  { %6768 = vmatprep.subr.bf16.mxu0 %v9129_v0 }
 0x2e1   :  { %6769 = vmatpush1.bf16.msra.mxu0 %v9128_v7  ;;  %v2537_v7 = vld [vmem:[#allocation11 + $0x1460] sm:$0xff] }
 0x2e2   :  { %6770 = vmatprep.subr.bf16.mxu0 %v9137_v25  ;;  %v2538_v25 = vld [vmem:[#allocation11 + $0x1468] sm:$0xff] }
 0x2e5   :  { %6771 = vmatpush1.bf16.msra.mxu0 %v9136_v12 }
 0x2e6   :  { %6781 = vmatprep.subr.bf16.mxu0 %v9145_v22 }
 0x34e   :  { %v1501_v58 = vpop.xlane.xlu1 %1500 }
 0x34f   :  { %v1502_v26 = vmul.f32 0.00390625, %v1501_v58 }
 0x351   :  { %v1503_v31 = vadd.f32 1e-05, %v1502_v26 }
 0x352   :  { %v1820_v32 = vpop.xlane.xlu1 %1819 }
 0x353   :  { %9928 = vrsqrt.f32 %v1503_v31  ;;  %v1821_v33 = vmul.f32 0.00390625, %v1820_v32  ;;  %v9155_v31 = vcombine.high %v2534_v8, %v2538_v25  ;;  %v2541_v32 = vld [vmem:[#allocation11 + $0x1480] sm:$0xff] }
 0x355   :  { %v1822_v34 = vadd.f32 1e-05, %v1821_v33 }
 0x357   :  { %9930 = vrsqrt.f32 %v1822_v34  ;;  %v2545_v34 = vld [vmem:[#allocation11 + $0x14a0] sm:$0xff] }
 0x358   :  { %v9160_v19 = vcombine.low %v2541_v32, %v2545_v34 }
 0x35d   :  { %v9929_v21 = vpop.eup %9928 }
 0x35e   :  { %v1505_v39 = vmul.f32 %v9929_v21, %v10457_v29  ;;  %v1506_v40 = vmul.f32 %v9929_v21, %v10460_v57  ;;  %v1851_v57 = vrot.slane %v10500_v45, %v10354_v30  ;;  %v9154_v21 = vcombine.low %v2534_v8, %v2538_v25 }
 0x360   :  { %v1520_v61 = vmul.f32 %v1516_v42, %v1506_v40  ;;  %v1519_v48 = vmul.f32 %v1512_v36, %v1505_v39  ;;  %v9161_v39 = vcombine.high %v2541_v32, %v2545_v34  ;;  %v9163_v40 = vcombine.high %v2542_v55, %v2546_v37 }
 0x361   :  { %v10504_v49 = vpop.eup %9930 }
 0x362   :  { %v1825_v50 = vmul.f32 %v10504_v49, %v10470_v35  ;;  %v1534_v10 = vadd.f32 %v1530_v18, %v1520_v61  ;;  %v1533_v29 = vadd.f32 %v1526_v52, %v1519_v48  ;;  %v2533_v35 = vld [vmem:[#allocation11 + $0x1440] sm:$0xff]  ;;  %v2558_v48 = vld [vmem:[#allocation11 + $0x1508] sm:$0xff] }
 0x363   :  { %v9153_v26 = vcombine.high %v2533_v35, %v2537_v7  ;;  %v9152_v42 = vcombine.low %v2533_v35, %v2537_v7  ;;  %v2549_v18 = vld [vmem:[#allocation11 + $0x14c0] sm:$0xff]  ;;  %v2574_v35 = vld [vmem:[#allocation11 + $0x1588] sm:$0xff] }
 0x364   :  { %v1840_v51 = vmul.f32 %v1836_v47, %v1825_v50  ;;  %v1538_v53 = vmul.f32 0.70710677, %v1534_v10  ;;  %v1537_v54 = vmul.f32 0.70710677, %v1533_v29  ;;  %v1536_v2 = vmul.f32 0.5, %v1534_v10  ;;  %v2553_v52 = vld [vmem:[#allocation11 + $0x14e0] sm:$0xff] }
 0x365   :  { %v1535_v4 = vmul.f32 0.5, %v1533_v29  ;;  %v9169_v23 = vcombine.high %v2549_v18, %v2553_v52  ;;  %v2557_v47 = vld [vmem:[#allocation11 + $0x1500] sm:$0xff]  ;;  %v2562_v50 = vld [vmem:[#allocation11 + $0x1528] sm:$0xff]  ;;  %v9168_v10 = vcombine.low %v2549_v18, %v2553_v52  ;;  %v9170_v29 = vcombine.low %v2550_v16, %v2554_v17 }
 0x366   :  { %9932 = verf.f32 %v1538_v53  ;;  %v1855_v56 = vadd.f32 %v1851_v57, %v1840_v51  ;;  %v2561_v61 = vld [vmem:[#allocation11 + $0x1520] sm:$0xff]  ;;  %v9179_v51 = vcombine.high %v2558_v48, %v2562_v50 }
 0x367   :  { %9934 = verf.f32 %v1537_v54  ;;  %v9177_v57 = vcombine.high %v2557_v47, %v2561_v61  ;;  %v2565_v53 = vld [vmem:[#allocation11 + $0x1540] sm:$0xff] }
 0x368   :  { %v1859_v59 = vmul.f32 0.70710677, %v1855_v56  ;;  %v1857_v22 = vmul.f32 0.5, %v1855_v56  ;;  %v2569_v54 = vld [vmem:[#allocation11 + $0x1560] sm:$0xff]  ;;  %v2566_v56 = vld [vmem:[#allocation11 + $0x1548] sm:$0xff] }
 0x369   :  { %v9184_v7 = vcombine.low %v2565_v53, %v2569_v54 }
 0x36a   :  { %9936 = verf.f32 %v1859_v59  ;;  %v2570_v59 = vld [vmem:[#allocation11 + $0x1568] sm:$0xff] }
 0x36b   :  { %v9186_v8 = vcombine.low %v2566_v56, %v2570_v59 }
 0x370   :  { %v9933_v63 = vpop.eup %9932 }
 0x371   :  { %v9935_v0 = vpop.eup %9934  ;;  %v1542_v3 = vadd.f32 1.0, %v9933_v63  ;;  %v9176_v63 = vcombine.low %v2557_v47, %v2561_v61  ;;  %v1847_v47 = vrot.slane %v10500_v45, %v10351_v28 }
 0x372   :  { %v1541_v5 = vadd.f32 1.0, %v9935_v0  ;;  %v9178_v0 = vcombine.low %v2558_v48, %v2562_v50  ;;  %v2605_v50 = vld [vmem:[#allocation11 + $0x1680] sm:$0xff] }
 0x373   :  { %v1544_v6 = vmul.f32 %v1542_v3, %v1536_v2  ;;  %v9185_v2 = vcombine.high %v2565_v53, %v2569_v54  ;;  %v9187_v3 = vcombine.high %v2566_v56, %v2570_v59  ;;  %v2613_v59 = vld [vmem:[#allocation11 + $0x16c0] sm:$0xff] }
 0x374   :  { %v9937_v11 = vpop.eup %9936  ;;  %v1543_v12 = vmul.f32 %v1541_v5, %v1535_v4  ;;  %v2573_v4 = vld [vmem:[#allocation11 + $0x1580] sm:$0xff] }
 0x375   :  { %v10510_v13 = vpack.c.bf16 %v1544_v6, %v1544_v6  ;;  %v1863_v24 = vadd.f32 1.0, %v9937_v11  ;;  %v2577_v5 = vld [vmem:[#allocation11 + $0x15a0] sm:$0xff]  ;;  %v2578_v6 = vld [vmem:[#allocation11 + $0x15a8] sm:$0xff] }
 0x376   :  { %v10512_v58 = vpack.c.bf16 %v1543_v12, %v1543_v12  ;;  %v9193_v25 = vcombine.high %v2573_v4, %v2577_v5  ;;  %v9195_v11 = vcombine.high %v2574_v35, %v2578_v6  ;;  %v2581_v12 = vld [vmem:[#allocation11 + $0x15c0] sm:$0xff]  ;;  %v9194_v32 = vcombine.low %v2574_v35, %v2578_v6 }
 0x377   :  { %6772 = vmatprep.mubr.bf16.mxu0 %v10510_v13  ;;  %7018 = vmatprep.mubr.bf16.mxu1 %v10510_v13  ;;  %v1865_v33 = vmul.f32 %v1863_v24, %v1857_v22  ;;  %v2585_v22 = vld [vmem:[#allocation11 + $0x15e0] sm:$0xff]  ;;  %v2582_v24 = vld [vmem:[#allocation11 + $0x15c8] sm:$0xff] }
 0x378   :  { %6773 = vmatmul.mubr.bf16.vlgmr.msra.gmra.mrb[12].mxu0 %v10512_v58  ;;  %7019 = vmatmul.mubr.bf16.vlgmr.msra.gmra.mrb[12].mxu1 %v10512_v58  ;;  %v9200_v18 = vcombine.low %v2581_v12, %v2585_v22 }
 0x379   :  { %6782 = vmatpush1.bf16.msra.mxu0 %v9144_v20  ;;  %7028 = vmatpush1.bf16.msra.mxu1 %v9146_v43  ;;  %v10524_v36 = vpack.c.bf16 %v1865_v33, %v1865_v33  ;;  %v9162_v20 = vcombine.low %v2542_v55, %v2546_v37  ;;  %v9171_v43 = vcombine.high %v2550_v16, %v2554_v17  ;;  %v2589_v55 = vld [vmem:[#allocation11 + $0x1600] sm:$0xff] }
 0x37a   :  { %6783 = vmatprep.subr.bf16.mxu0 %v9153_v26  ;;  %7029 = vmatprep.subr.bf16.mxu1 %v9155_v31  ;;  %v2586_v26 = vld [vmem:[#allocation11 + $0x15e8] sm:$0xff]  ;;  %v9192_v31 = vcombine.low %v2573_v4, %v2577_v5  ;;  %v9201_v33 = vcombine.high %v2581_v12, %v2585_v22  ;;  %v2593_v37 = vld [vmem:[#allocation11 + $0x1620] sm:$0xff] }
 0x37b   :  { %6813 = vmatprep.mubr.bf16.mxu0 %v10524_v36  ;;  %7059 = vmatprep.mubr.bf16.mxu1 %v10524_v36  ;;  %v9203_v34 = vcombine.high %v2582_v24, %v2586_v26  ;;  %v9202_v52 = vcombine.low %v2582_v24, %v2586_v26  ;;  %v9209_v16 = vcombine.high %v2589_v55, %v2593_v37 }
 0x37d   :  { %6784 = vmatpush1.bf16.msra.mxu0 %v9152_v42  ;;  %7030 = vmatpush1.bf16.msra.mxu1 %v9154_v21  ;;  %v2590_v42 = vld [vmem:[#allocation11 + $0x1608] sm:$0xff] }
 0x37e   :  { %6785 = vmatprep.subr.bf16.mxu0 %v9161_v39  ;;  %7031 = vmatprep.subr.bf16.mxu1 %v9163_v40  ;;  %v2594_v21 = vld [vmem:[#allocation11 + $0x1628] sm:$0xff]  ;;  %v1832_v39 = vrot.slane %v10494_v38, %v10351_v28  ;;  %v1824_v40 = vmul.f32 %v10504_v49, %v10467_v41  ;;  %v9208_v38 = vcombine.low %v2589_v55, %v2593_v37 }
 0x37f   :  { %v9211_v17 = vcombine.high %v2590_v42, %v2594_v21  ;;  %v9210_v41 = vcombine.low %v2590_v42, %v2594_v21 }
 0x380   :  { %v1839_v61 = vmul.f32 %v1832_v39, %v1824_v40  ;;  %v2637_v39 = vld [vmem:[#allocation11 + $0x1780] sm:$0xff] }
 0x381   :  { %6786 = vmatpush1.bf16.msra.mxu0 %v9160_v19  ;;  %7032 = vmatpush1.bf16.msra.mxu1 %v9162_v20  ;;  %v2597_v19 = vld [vmem:[#allocation11 + $0x1640] sm:$0xff] }
 0x382   :  { %6787 = vmatprep.subr.bf16.mxu0 %v9169_v23  ;;  %7033 = vmatprep.subr.bf16.mxu1 %v9171_v43  ;;  %v2601_v20 = vld [vmem:[#allocation11 + $0x1660] sm:$0xff]  ;;  %v2598_v23 = vld [vmem:[#allocation11 + $0x1648] sm:$0xff]  ;;  %v10534_v54 = vadd.f32 %v1847_v47, %v1839_v61 }
 0x383   :  { %v2602_v43 = vld [vmem:[#allocation11 + $0x1668] sm:$0xff]  ;;  %v9217_v49 = vcombine.high %v2597_v19, %v2601_v20  ;;  %v2641_v40 = vld [vmem:[#allocation11 + $0x17a0] sm:$0xff] }
 0x384   :  { %v9219_v48 = vcombine.high %v2598_v23, %v2602_v43  ;;  %v9218_v53 = vcombine.low %v2598_v23, %v2602_v43  ;;  %v1858_v5 = vmul.f32 0.70710677, %v10534_v54  ;;  %v2645_v23 = vld [vmem:[#allocation11 + $0x17c0] sm:$0xff]  ;;  %v2646_v61 = vld [vmem:[#allocation11 + $0x17c8] sm:$0xff] }
 0x385   :  { %6788 = vmatpush1.bf16.msra.mxu0 %v9168_v10  ;;  %7034 = vmatpush1.bf16.msra.mxu1 %v9170_v29  ;;  %v2609_v10 = vld [vmem:[#allocation11 + $0x16a0] sm:$0xff]  ;;  %v2606_v29 = vld [vmem:[#allocation11 + $0x1688] sm:$0xff] }
 0x386   :  { %6789 = vmatprep.subr.bf16.mxu0 %v9177_v57  ;;  %7035 = vmatprep.subr.bf16.mxu1 %v9179_v51  ;;  %v2610_v57 = vld [vmem:[#allocation11 + $0x16a8] sm:$0xff]  ;;  %v9216_v51 = vcombine.low %v2597_v19, %v2601_v20  ;;  %v9225_v45 = vcombine.high %v2605_v50, %v2609_v10  ;;  %9938 = verf.f32 %v1858_v5  ;;  %v9257_v19 = vcombine.high %v2637_v39, %v2641_v40  ;;  %v2649_v47 = vld [vmem:[#allocation11 + $0x17e0] sm:$0xff]  ;;  %v1896_v5 = vld [vmem:[#allocation11 + $0x58] sm:$0xff] }
 0x387   :  { %v9227_v56 = vcombine.high %v2606_v29, %v2610_v57  ;;  %v9226_v4 = vcombine.low %v2606_v29, %v2610_v57  ;;  %v1887_v29 = vld [vmem:[#allocation11 + $0x10] sm:$0xff] }
 0x388   :  { %v1891_v57 = vld [vmem:[#allocation11 + $0x30] sm:$0xff] }
 0x389   :  { %6790 = vmatpush1.bf16.msra.mxu0 %v9176_v63  ;;  %7036 = vmatpush1.bf16.msra.mxu1 %v9178_v0  ;;  %v2617_v63 = vld [vmem:[#allocation11 + $0x16e0] sm:$0xff]  ;;  %v2614_v0 = vld [vmem:[#allocation11 + $0x16c8] sm:$0xff] }
 0x38a   :  { %6791 = vmatprep.subr.bf16.mxu0 %v9185_v2  ;;  %7037 = vmatprep.subr.bf16.mxu1 %v9187_v3  ;;  %v2618_v2 = vld [vmem:[#allocation11 + $0x16e8] sm:$0xff]  ;;  %v9224_v3 = vcombine.low %v2605_v50, %v2609_v10  ;;  %v9233_v35 = vcombine.high %v2613_v59, %v2617_v63  ;;  %v9232_v12 = vcombine.low %v2613_v59, %v2617_v63 }
 0x38b   :  { %v9235_v6 = vcombine.high %v2614_v0, %v2618_v2  ;;  %v9234_v22 = vcombine.low %v2614_v0, %v2618_v2  ;;  %v8509_v0 = vcombine.high %v1887_v29, %v1891_v57 }
 0x38d   :  { %6792 = vmatpush1.bf16.msra.mxu0 %v9184_v7  ;;  %7038 = vmatpush1.bf16.msra.mxu1 %v9186_v8  ;;  %v2621_v7 = vld [vmem:[#allocation11 + $0x1700] sm:$0xff] }
 0x38e   :  { %6793 = vmatprep.subr.bf16.mxu0 %v9193_v25  ;;  %7039 = vmatprep.subr.bf16.mxu1 %v9195_v11  ;;  %v2625_v8 = vld [vmem:[#allocation11 + $0x1720] sm:$0xff]  ;;  %v2622_v25 = vld [vmem:[#allocation11 + $0x1708] sm:$0xff] }
 0x38f   :  { %v2626_v11 = vld [vmem:[#allocation11 + $0x1728] sm:$0xff]  ;;  %v9241_v24 = vcombine.high %v2621_v7, %v2625_v8  ;;  %v9240_v55 = vcombine.low %v2621_v7, %v2625_v8 }
 0x390   :  { %v9243_v26 = vcombine.high %v2622_v25, %v2626_v11  ;;  %v9242_v37 = vcombine.low %v2622_v25, %v2626_v11  ;;  %v9939_v43 = vpop.eup %9938  ;;  %v1903_v11 = vld [vmem:[#allocation11 + $0x90] sm:$0xff] }
 0x391   :  { %6794 = vmatpush1.bf16.msra.mxu0 %v9192_v31  ;;  %7040 = vmatpush1.bf16.msra.mxu1 %v9194_v32  ;;  %v2629_v31 = vld [vmem:[#allocation11 + $0x1740] sm:$0xff]  ;;  %v1862_v10 = vadd.f32 1.0, %v9939_v43 }
 0x392   :  { %6795 = vmatprep.subr.bf16.mxu0 %v9201_v33  ;;  %7041 = vmatprep.subr.bf16.mxu1 %v9203_v34  ;;  %v2633_v32 = vld [vmem:[#allocation11 + $0x1760] sm:$0xff]  ;;  %v2630_v33 = vld [vmem:[#allocation11 + $0x1748] sm:$0xff] }
 0x393   :  { %v2634_v34 = vld [vmem:[#allocation11 + $0x1768] sm:$0xff]  ;;  %v9249_v42 = vcombine.high %v2629_v31, %v2633_v32 }
 0x394   :  { %v9251_v21 = vcombine.high %v2630_v33, %v2634_v34 }
 0x395   :  { %6796 = vmatpush1.bf16.msra.mxu0 %v9200_v18  ;;  %7042 = vmatpush1.bf16.msra.mxu1 %v9202_v52  ;;  %v2638_v18 = vld [vmem:[#allocation11 + $0x1788] sm:$0xff] }
 0x396   :  { %6797 = vmatprep.subr.bf16.mxu0 %v9209_v16  ;;  %7043 = vmatprep.subr.bf16.mxu1 %v9211_v17  ;;  %v2642_v52 = vld [vmem:[#allocation11 + $0x17a8] sm:$0xff]  ;;  %v9248_v16 = vcombine.low %v2629_v31, %v2633_v32  ;;  %v9250_v17 = vcombine.low %v2630_v33, %v2634_v34  ;;  %v1911_v34 = vld [vmem:[#allocation11 + $0xd0] sm:$0xff] }
 0x397   :  { %v9259_v20 = vcombine.high %v2638_v18, %v2642_v52 }
 0x399   :  { %6798 = vmatpush1.bf16.msra.mxu0 %v9208_v38  ;;  %7044 = vmatpush1.bf16.msra.mxu1 %v9210_v41  ;;  %v2650_v38 = vld [vmem:[#allocation11 + $0x17e8] sm:$0xff]  ;;  %v9256_v41 = vcombine.low %v2637_v39, %v2641_v40 }
 0x39a   :  { %6799 = vmatprep.subr.bf16.mxu0 %v9217_v49  ;;  %7045 = vmatprep.subr.bf16.mxu1 %v9219_v48  ;;  %v9258_v49 = vcombine.low %v2638_v18, %v2642_v52  ;;  %v9265_v48 = vcombine.high %v2645_v23, %v2649_v47  ;;  %v9267_v50 = vcombine.high %v2646_v61, %v2650_v38  ;;  %v1919_v52 = vld [vmem:[#allocation11 + $0x110] sm:$0xff] }
 0x39b   :  { %v9266_v59 = vcombine.low %v2646_v61, %v2650_v38  ;;  %v1931_v61 = vld [vmem:[#allocation11 + $0x170] sm:$0xff]  ;;  %v1928_v38 = vld [vmem:[#allocation11 + $0x158] sm:$0xff] }
 0x39d   :  { %6800 = vmatpush1.bf16.msra.mxu0 %v9216_v51  ;;  %7046 = vmatpush1.bf16.msra.mxu1 %v9218_v53  ;;  %v1888_v51 = vld [vmem:[#allocation11 + $0x18] sm:$0xff] }
 0x39e   :  { %6801 = vmatprep.subr.bf16.mxu0 %v9225_v45  ;;  %7047 = vmatprep.subr.bf16.mxu1 %v9227_v56  ;;  %v1892_v53 = vld [vmem:[#allocation11 + $0x38] sm:$0xff]  ;;  %v1856_v45 = vmul.f32 0.5, %v10534_v54  ;;  %v9264_v56 = vcombine.low %v2645_v23, %v2649_v47  ;;  %v1927_v47 = vld [vmem:[#allocation11 + $0x150] sm:$0xff] }
 0x39f   :  { %v8511_v2 = vcombine.high %v1888_v51, %v1892_v53  ;;  %v8510_v54 = vcombine.low %v1888_v51, %v1892_v53  ;;  %v1936_v51 = vld [vmem:[#allocation11 + $0x198] sm:$0xff] }
 0x3a0   :  { %v1864_v63 = vmul.f32 %v1862_v10, %v1856_v45  ;;  %v1940_v53 = vld [vmem:[#allocation11 + $0x1b8] sm:$0xff]  ;;  %v8548_v45 = vcombine.low %v1927_v47, %v1931_v61 }
 0x3a1   :  { %6802 = vmatpush1.bf16.msra.mxu0 %v9224_v3  ;;  %7048 = vmatpush1.bf16.msra.mxu1 %v9226_v4  ;;  %v1895_v3 = vld [vmem:[#allocation11 + $0x50] sm:$0xff] }
 0x3a2   :  { %6803 = vmatprep.subr.bf16.mxu0 %v9233_v35  ;;  %7049 = vmatprep.subr.bf16.mxu1 %v9235_v6  ;;  %v1899_v4 = vld [vmem:[#allocation11 + $0x70] sm:$0xff]  ;;  %v1900_v35 = vld [vmem:[#allocation11 + $0x78] sm:$0xff]  ;;  %v8508_v6 = vcombine.low %v1887_v29, %v1891_v57  ;;  %v10538_v7 = vpack.c.bf16 %v1864_v63, %v1864_v63  ;;  %v8559_v63 = vcombine.high %v1936_v51, %v1940_v53 }
 0x3a3   :  { %v8517_v8 = vcombine.high %v1895_v3, %v1899_v4  ;;  %v8519_v25 = vcombine.high %v1896_v5, %v1900_v35  ;;  %v8518_v31 = vcombine.low %v1896_v5, %v1900_v35  ;;  %v1935_v29 = vld [vmem:[#allocation11 + $0x190] sm:$0xff]  ;;  %v8558_v35 = vcombine.low %v1936_v51, %v1940_v53 }
 0x3a4   :  { %v1939_v57 = vld [vmem:[#allocation11 + $0x1b0] sm:$0xff] }
 0x3a5   :  { %6804 = vmatpush1.bf16.msra.mxu0 %v9232_v12  ;;  %7050 = vmatpush1.bf16.msra.mxu1 %v9234_v22  ;;  %v1907_v12 = vld [vmem:[#allocation11 + $0xb0] sm:$0xff]  ;;  %v1904_v22 = vld [vmem:[#allocation11 + $0x98] sm:$0xff]  ;;  %v8556_v5 = vcombine.low %v1935_v29, %v1939_v57 }
 0x3a6   :  { %6805 = vmatprep.subr.bf16.mxu0 %v9241_v24  ;;  %7051 = vmatprep.subr.bf16.mxu1 %v9243_v26  ;;  %v1908_v24 = vld [vmem:[#allocation11 + $0xb8] sm:$0xff]  ;;  %v8516_v26 = vcombine.low %v1895_v3, %v1899_v4  ;;  %v8525_v32 = vcombine.high %v1903_v11, %v1907_v12 }
 0x3a7   :  { %v8527_v33 = vcombine.high %v1904_v22, %v1908_v24  ;;  %v8526_v39 = vcombine.low %v1904_v22, %v1908_v24  ;;  %v1944_v3 = vld [vmem:[#allocation11 + $0x1d8] sm:$0xff] }
 0x3a8   :  { %v1948_v4 = vld [vmem:[#allocation11 + $0x1f8] sm:$0xff] }
 0x3a9   :  { %6806 = vmatpush1.bf16.msra.mxu0 %v9240_v55  ;;  %7052 = vmatpush1.bf16.msra.mxu1 %v9242_v37  ;;  %v1915_v55 = vld [vmem:[#allocation11 + $0xf0] sm:$0xff]  ;;  %v1912_v37 = vld [vmem:[#allocation11 + $0xd8] sm:$0xff]  ;;  %v8566_v24 = vcombine.low %v1944_v3, %v1948_v4 }
 0x3aa   :  { %6807 = vmatprep.subr.bf16.mxu0 %v9249_v42  ;;  %7053 = vmatprep.subr.bf16.mxu1 %v9251_v21  ;;  %v1916_v42 = vld [vmem:[#allocation11 + $0xf8] sm:$0xff]  ;;  %v8524_v21 = vcombine.low %v1903_v11, %v1907_v12  ;;  %v8533_v40 = vcombine.high %v1911_v34, %v1915_v55 }
 0x3ab   :  { %v8535_v18 = vcombine.high %v1912_v37, %v1916_v42  ;;  %v1952_v11 = vld [vmem:[#allocation11 + $0x218] sm:$0xff] }
 0x3ac   :  { %v1956_v12 = vld [vmem:[#allocation11 + $0x238] sm:$0xff] }
 0x3ad   :  { %6808 = vmatpush1.bf16.msra.mxu0 %v9248_v16  ;;  %7054 = vmatpush1.bf16.msra.mxu1 %v9250_v17  ;;  %v1923_v16 = vld [vmem:[#allocation11 + $0x130] sm:$0xff]  ;;  %v1924_v17 = vld [vmem:[#allocation11 + $0x138] sm:$0xff] }
 0x3ae   :  { %6809 = vmatprep.subr.bf16.mxu0 %v9257_v19  ;;  %7055 = vmatprep.subr.bf16.mxu1 %v9259_v20  ;;  %v8532_v19 = vcombine.low %v1911_v34, %v1915_v55  ;;  %v8534_v20 = vcombine.low %v1912_v37, %v1916_v42  ;;  %v8541_v23 = vcombine.high %v1919_v52, %v1923_v16  ;;  %v1960_v34 = vld [vmem:[#allocation11 + $0x258] sm:$0xff] }
 0x3af   :  { %v1964_v55 = vld [vmem:[#allocation11 + $0x278] sm:$0xff]  ;;  %v8574_v42 = vcombine.low %v1952_v11, %v1956_v12 }
 0x3b1   :  { %6810 = vmatpush1.bf16.msra.mxu0 %v9256_v41  ;;  %7056 = vmatpush1.bf16.msra.mxu1 %v9258_v49  ;;  %v1932_v41 = vld [vmem:[#allocation11 + $0x178] sm:$0xff]  ;;  %v8540_v49 = vcombine.low %v1919_v52, %v1923_v16 }
 0x3b2   :  { %6811 = vmatprep.subr.bf16.mxu0 %v9265_v48  ;;  %7057 = vmatprep.subr.bf16.mxu1 %v9267_v50  ;;  %v8549_v50 = vcombine.high %v1927_v47, %v1931_v61  ;;  %v8551_v10 = vcombine.high %v1928_v38, %v1932_v41  ;;  %v1968_v52 = vld [vmem:[#allocation11 + $0x298] sm:$0xff] }
 0x3b3   :  { %v1972_v16 = vld [vmem:[#allocation11 + $0x2b8] sm:$0xff] }
 0x3b4   :  { %v1976_v47 = vld [vmem:[#allocation11 + $0x2d8] sm:$0xff] }
 0x3b5   :  { %6812 = vmatpush1.bf16.msra.mxu0 %v9264_v56  ;;  %7058 = vmatpush1.bf16.msra.mxu1 %v9266_v59  ;;  %v8550_v56 = vcombine.low %v1928_v38, %v1932_v41  ;;  %v8557_v59 = vcombine.high %v1935_v29, %v1939_v57  ;;  %v1980_v61 = vld [vmem:[#allocation11 + $0x2f8] sm:$0xff]  ;;  %v8590_v41 = vcombine.low %v1968_v52, %v1972_v16 }
 0x3b6   :  { %7068 = vmatprep.subr.bf16.mxu0 %v8509_v0  ;;  %7314 = vmatprep.subr.bf16.mxu1 %v8511_v2  ;;  %v1943_v0 = vld [vmem:[#allocation11 + $0x1d0] sm:$0xff]  ;;  %v1984_v29 = vld [vmem:[#allocation11 + $0x318] sm:$0xff]  ;;  %v8598_v53 = vcombine.low %v1976_v47, %v1980_v61 }
 0x3b7   :  { %v1947_v2 = vld [vmem:[#allocation11 + $0x1f0] sm:$0xff]  ;;  %v1988_v57 = vld [vmem:[#allocation11 + $0x338] sm:$0xff] }
 0x3b8   :  { %6814 = vmatmul.mubr.bf16.vlgmr.msra.gmra.mrb[12].mxu0 %v10538_v7  ;;  %7060 = vmatmul.mubr.bf16.vlgmr.msra.gmra.mrb[12].mxu1 %v10538_v7  ;;  %v8564_v22 = vcombine.low %v1943_v0, %v1947_v2 }
 0x3b9   :  { %7069 = vmatpush1.bf16.msra.mxu0 %v8508_v6  ;;  %7100 = vmatprep.mubr.bf16.mxu0 %v10364_v62  ;;  %v8565_v6 = vcombine.high %v1943_v0, %v1947_v2  ;;  %v1992_v0 = vld [vmem:[#allocation11 + $0x358] sm:$0xff] }
 0x3ba   :  { %7315 = vmatpush1.bf16.msra.mxu1 %v8510_v54  ;;  %7346 = vmatprep.mubr.bf16.mxu1 %v10364_v62  ;;  %v1920_v62 = vld [vmem:[#allocation11 + $0x118] sm:$0xff]  ;;  %v8567_v54 = vcombine.high %v1944_v3, %v1948_v4  ;;  %v8606_v4 = vcombine.low %v1984_v29, %v1988_v57 }
 0x3bb   :  { %7070 = vmatprep.subr.bf16.mxu0 %v8517_v8  ;;  %7316 = vmatprep.subr.bf16.mxu1 %v8519_v25  ;;  %v8543_v43 = vcombine.high %v1920_v62, %v1924_v17  ;;  %v8542_v48 = vcombine.low %v1920_v62, %v1924_v17  ;;  %v1951_v8 = vld [vmem:[#allocation11 + $0x210] sm:$0xff]  ;;  %v8582_v17 = vcombine.low %v1960_v34, %v1964_v55  ;;  %v1996_v2 = vld [vmem:[#allocation11 + $0x378] sm:$0xff] }
 0x3bc   :  { %v1955_v25 = vld [vmem:[#allocation11 + $0x230] sm:$0xff] }
 0x3bd   :  { %7071 = vmatpush1.bf16.msra.mxu0 %v8516_v26  ;;  %v8573_v26 = vcombine.high %v1951_v8, %v1955_v25  ;;  %v8572_v37 = vcombine.low %v1951_v8, %v1955_v25  ;;  %v2000_v8 = vld [vmem:[#allocation11 + $0x398] sm:$0xff] }
 0x3be   :  { %7317 = vmatpush1.bf16.msra.mxu1 %v8518_v31  ;;  %7072 = vmatprep.subr.bf16.mxu0 %v8525_v32  ;;  %v8575_v31 = vcombine.high %v1952_v11, %v1956_v12  ;;  %v1959_v32 = vld [vmem:[#allocation11 + $0x250] sm:$0xff]  ;;  %v2004_v25 = vld [vmem:[#allocation11 + $0x3b8] sm:$0xff]  ;;  %v8614_v12 = vcombine.low %v1992_v0, %v1996_v2 }
 0x3bf   :  { %7318 = vmatprep.subr.bf16.mxu1 %v8527_v33  ;;  %v1963_v33 = vld [vmem:[#allocation11 + $0x270] sm:$0xff] }
 0x3c0   :  { %v8580_v62 = vcombine.low %v1959_v32, %v1963_v33 }
 0x3c1   :  { %7073 = vmatpush1.bf16.msra.mxu0 %v8524_v21  ;;  %v8581_v21 = vcombine.high %v1959_v32, %v1963_v33  ;;  %v2008_v32 = vld [vmem:[#allocation11 + $0x3d8] sm:$0xff] }
 0x3c2   :  { %7319 = vmatpush1.bf16.msra.mxu1 %v8526_v39  ;;  %7074 = vmatprep.subr.bf16.mxu0 %v8533_v40  ;;  %v8583_v39 = vcombine.high %v1960_v34, %v1964_v55  ;;  %v1967_v40 = vld [vmem:[#allocation11 + $0x290] sm:$0xff]  ;;  %v2012_v33 = vld [vmem:[#allocation11 + $0x3f8] sm:$0xff]  ;;  %v8622_v55 = vcombine.low %v2000_v8, %v2004_v25 }
 0x3c3   :  { %7320 = vmatprep.subr.bf16.mxu1 %v8535_v18  ;;  %v1971_v18 = vld [vmem:[#allocation11 + $0x2b0] sm:$0xff] }
 0x3c4   :  { %v8588_v38 = vcombine.low %v1967_v40, %v1971_v18 }
 0x3c5   :  { %7075 = vmatpush1.bf16.msra.mxu0 %v8532_v19  ;;  %v8589_v19 = vcombine.high %v1967_v40, %v1971_v18  ;;  %v2016_v40 = vld [vmem:[#allocation11 + $0x418] sm:$0xff] }
 0x3c6   :  { %7321 = vmatpush1.bf16.msra.mxu1 %v8534_v20  ;;  %7076 = vmatprep.subr.bf16.mxu0 %v8541_v23  ;;  %v8591_v20 = vcombine.high %v1968_v52, %v1972_v16  ;;  %v1975_v23 = vld [vmem:[#allocation11 + $0x2d0] sm:$0xff]  ;;  %v2020_v18 = vld [vmem:[#allocation11 + $0x438] sm:$0xff]  ;;  %v8630_v16 = vcombine.low %v2008_v32, %v2012_v33 }
 0x3c7   :  { %7322 = vmatprep.subr.bf16.mxu1 %v8543_v43  ;;  %v1979_v43 = vld [vmem:[#allocation11 + $0x2f0] sm:$0xff] }
 0x3c8   :  { %v8596_v51 = vcombine.low %v1975_v23, %v1979_v43 }
 0x3c9   :  { %7077 = vmatpush1.bf16.msra.mxu0 %v8540_v49  ;;  %v8597_v49 = vcombine.high %v1975_v23, %v1979_v43  ;;  %v2024_v43 = vld [vmem:[#allocation11 + $0x458] sm:$0xff] }
 0x3ca   :  { %7323 = vmatpush1.bf16.msra.mxu1 %v8542_v48  ;;  %7078 = vmatprep.subr.bf16.mxu0 %v8549_v50  ;;  %v8599_v48 = vcombine.high %v1976_v47, %v1980_v61  ;;  %v1983_v50 = vld [vmem:[#allocation11 + $0x310] sm:$0xff]  ;;  %v2028_v47 = vld [vmem:[#allocation11 + $0x478] sm:$0xff]  ;;  %v8638_v61 = vcombine.low %v2016_v40, %v2020_v18 }
 0x3cb   :  { %7324 = vmatprep.subr.bf16.mxu1 %v8551_v10  ;;  %v1987_v10 = vld [vmem:[#allocation11 + $0x330] sm:$0xff] }
 0x3cc   :  { %v8604_v3 = vcombine.low %v1983_v50, %v1987_v10 }
 0x3cd   :  { %7079 = vmatpush1.bf16.msra.mxu0 %v8548_v45  ;;  %v8605_v45 = vcombine.high %v1983_v50, %v1987_v10  ;;  %v2032_v50 = vld [vmem:[#allocation11 + $0x498] sm:$0xff] }
 0x3ce   :  { %7325 = vmatpush1.bf16.msra.mxu1 %v8550_v56  ;;  %7080 = vmatprep.subr.bf16.mxu0 %v8557_v59  ;;  %v8607_v56 = vcombine.high %v1984_v29, %v1988_v57  ;;  %v1991_v59 = vld [vmem:[#allocation11 + $0x350] sm:$0xff]  ;;  %v2036_v10 = vld [vmem:[#allocation11 + $0x4b8] sm:$0xff]  ;;  %v8646_v57 = vcombine.low %v2024_v43, %v2028_v47 }
 0x3cf   :  { %7326 = vmatprep.subr.bf16.mxu1 %v8559_v63  ;;  %v1995_v63 = vld [vmem:[#allocation11 + $0x370] sm:$0xff] }
 0x3d0   :  { %v8612_v11 = vcombine.low %v1991_v59, %v1995_v63 }
 0x3d1   :  { %7081 = vmatpush1.bf16.msra.mxu0 %v8556_v5  ;;  %v8613_v5 = vcombine.high %v1991_v59, %v1995_v63  ;;  %v2040_v59 = vld [vmem:[#allocation11 + $0x4d8] sm:$0xff] }
 0x3d2   :  { %7327 = vmatpush1.bf16.msra.mxu1 %v8558_v35  ;;  %7082 = vmatprep.subr.bf16.mxu0 %v8565_v6  ;;  %v8615_v35 = vcombine.high %v1992_v0, %v1996_v2  ;;  %v1999_v6 = vld [vmem:[#allocation11 + $0x390] sm:$0xff]  ;;  %v2044_v63 = vld [vmem:[#allocation11 + $0x4f8] sm:$0xff] }
 0x3d3   :  { %7328 = vmatprep.subr.bf16.mxu1 %v8567_v54  ;;  %v2003_v54 = vld [vmem:[#allocation11 + $0x3b0] sm:$0xff] }
 0x3d4   :  { %v8620_v34 = vcombine.low %v1999_v6, %v2003_v54 }
 0x3d5   :  { %7083 = vmatpush1.bf16.msra.mxu0 %v8564_v22  ;;  %v8621_v22 = vcombine.high %v1999_v6, %v2003_v54  ;;  %v2052_v6 = vld [vmem:[#allocation11 + $0x538] sm:$0xff]  ;;  %v8662_v54 = vcombine.low %v2040_v59, %v2044_v63 }
 0x3d6   :  { %7329 = vmatpush1.bf16.msra.mxu1 %v8566_v24  ;;  %7084 = vmatprep.subr.bf16.mxu0 %v8573_v26  ;;  %v8623_v24 = vcombine.high %v2000_v8, %v2004_v25  ;;  %v2007_v26 = vld [vmem:[#allocation11 + $0x3d0] sm:$0xff] }
 0x3d7   :  { %7330 = vmatprep.subr.bf16.mxu1 %v8575_v31  ;;  %v2011_v31 = vld [vmem:[#allocation11 + $0x3f0] sm:$0xff] }
 0x3d8   :  { %v8628_v52 = vcombine.low %v2007_v26, %v2011_v31 }
 0x3d9   :  { %7085 = vmatpush1.bf16.msra.mxu0 %v8572_v37  ;;  %v8629_v37 = vcombine.high %v2007_v26, %v2011_v31 }
 0x3da   :  { %7331 = vmatpush1.bf16.msra.mxu1 %v8574_v42  ;;  %7086 = vmatprep.subr.bf16.mxu0 %v8581_v21  ;;  %v8631_v42 = vcombine.high %v2008_v32, %v2012_v33  ;;  %v2015_v21 = vld [vmem:[#allocation11 + $0x410] sm:$0xff] }
 0x3db   :  { %7332 = vmatprep.subr.bf16.mxu1 %v8583_v39  ;;  %v2019_v39 = vld [vmem:[#allocation11 + $0x430] sm:$0xff] }
 0x3dc   :  { %v8636_v23 = vcombine.low %v2015_v21, %v2019_v39 }
 0x3dd   :  { %7087 = vmatpush1.bf16.msra.mxu0 %v8580_v62  ;;  %v8637_v62 = vcombine.high %v2015_v21, %v2019_v39 }
 0x3de   :  { %7333 = vmatpush1.bf16.msra.mxu1 %v8582_v17  ;;  %7088 = vmatprep.subr.bf16.mxu0 %v8589_v19  ;;  %v8639_v17 = vcombine.high %v2016_v40, %v2020_v18  ;;  %v2023_v19 = vld [vmem:[#allocation11 + $0x450] sm:$0xff] }
 0x3df   :  { %7334 = vmatprep.subr.bf16.mxu1 %v8591_v20  ;;  %v2027_v20 = vld [vmem:[#allocation11 + $0x470] sm:$0xff] }
 0x3e0   :  { %v8644_v29 = vcombine.low %v2023_v19, %v2027_v20 }
 0x3e1   :  { %7089 = vmatpush1.bf16.msra.mxu0 %v8588_v38  ;;  %v8645_v38 = vcombine.high %v2023_v19, %v2027_v20 }
 0x3e2   :  { %7335 = vmatpush1.bf16.msra.mxu1 %v8590_v41  ;;  %7090 = vmatprep.subr.bf16.mxu0 %v8597_v49  ;;  %v2031_v41 = vld [vmem:[#allocation11 + $0x490] sm:$0xff] }
 0x3e3   :  { %7336 = vmatprep.subr.bf16.mxu1 %v8599_v48  ;;  %v2035_v49 = vld [vmem:[#allocation11 + $0x4b0] sm:$0xff]  ;;  %v8647_v48 = vcombine.high %v2024_v43, %v2028_v47 }
 0x3e4   :  { %v8652_v0 = vcombine.low %v2031_v41, %v2035_v49  ;;  %v2079_v47 = vld [vmem:[#allocation11 + $0x610] sm:$0xff] }
 0x3e5   :  { %7091 = vmatpush1.bf16.msra.mxu0 %v8596_v51  ;;  %v8653_v51 = vcombine.high %v2031_v41, %v2035_v49  ;;  %v2084_v41 = vld [vmem:[#allocation11 + $0x638] sm:$0xff] }
 0x3e6   :  { %7337 = vmatpush1.bf16.msra.mxu1 %v8598_v53  ;;  %7092 = vmatprep.subr.bf16.mxu0 %v8605_v45  ;;  %v8655_v53 = vcombine.high %v2032_v50, %v2036_v10  ;;  %v2039_v45 = vld [vmem:[#allocation11 + $0x4d0] sm:$0xff] }
 0x3e7   :  { %7338 = vmatprep.subr.bf16.mxu1 %v8607_v56  ;;  %v2043_v56 = vld [vmem:[#allocation11 + $0x4f0] sm:$0xff] }
 0x3e8   :  { %v8661_v2 = vcombine.high %v2039_v45, %v2043_v56 }
 0x3e9   :  { %7093 = vmatpush1.bf16.msra.mxu0 %v8604_v3  ;;  %v8663_v3 = vcombine.high %v2040_v59, %v2044_v63 }
 0x3ea   :  { %7339 = vmatpush1.bf16.msra.mxu1 %v8606_v4  ;;  %7094 = vmatprep.subr.bf16.mxu0 %v8613_v5  ;;  %v2047_v4 = vld [vmem:[#allocation11 + $0x510] sm:$0xff] }
 0x3eb   :  { %7340 = vmatprep.subr.bf16.mxu1 %v8615_v35  ;;  %v2051_v5 = vld [vmem:[#allocation11 + $0x530] sm:$0xff]  ;;  %v2048_v35 = vld [vmem:[#allocation11 + $0x518] sm:$0xff] }
 0x3ec   :  { %v8669_v8 = vcombine.high %v2047_v4, %v2051_v5  ;;  %v8671_v25 = vcombine.high %v2048_v35, %v2052_v6  ;;  %v8668_v26 = vcombine.low %v2047_v4, %v2051_v5  ;;  %v8670_v31 = vcombine.low %v2048_v35, %v2052_v6 }
 0x3ed   :  { %7095 = vmatpush1.bf16.msra.mxu0 %v8612_v11  ;;  %v2055_v11 = vld [vmem:[#allocation11 + $0x550] sm:$0xff] }
 0x3ee   :  { %7341 = vmatpush1.bf16.msra.mxu1 %v8614_v12  ;;  %7096 = vmatprep.subr.bf16.mxu0 %v8621_v22  ;;  %v2059_v12 = vld [vmem:[#allocation11 + $0x570] sm:$0xff]  ;;  %v2056_v22 = vld [vmem:[#allocation11 + $0x558] sm:$0xff] }
 0x3ef   :  { %7342 = vmatprep.subr.bf16.mxu1 %v8623_v24  ;;  %v2060_v24 = vld [vmem:[#allocation11 + $0x578] sm:$0xff]  ;;  %v8677_v32 = vcombine.high %v2055_v11, %v2059_v12  ;;  %v8676_v21 = vcombine.low %v2055_v11, %v2059_v12 }
 0x3f0   :  { %v8679_v33 = vcombine.high %v2056_v22, %v2060_v24  ;;  %v8678_v39 = vcombine.low %v2056_v22, %v2060_v24 }
 0x3f1   :  { %7097 = vmatpush1.bf16.msra.mxu0 %v8620_v34  ;;  %v2063_v34 = vld [vmem:[#allocation11 + $0x590] sm:$0xff] }
 0x3f2   :  { %7343 = vmatpush1.bf16.msra.mxu1 %v8622_v55  ;;  %7098 = vmatprep.subr.bf16.mxu0 %v8629_v37  ;;  %v2067_v55 = vld [vmem:[#allocation11 + $0x5b0] sm:$0xff]  ;;  %v2064_v37 = vld [vmem:[#allocation11 + $0x598] sm:$0xff] }
 0x3f3   :  { %7344 = vmatprep.subr.bf16.mxu1 %v8631_v42  ;;  %v2068_v42 = vld [vmem:[#allocation11 + $0x5b8] sm:$0xff]  ;;  %v8685_v40 = vcombine.high %v2063_v34, %v2067_v55  ;;  %v8684_v19 = vcombine.low %v2063_v34, %v2067_v55 }
 0x3f4   :  { %v8687_v18 = vcombine.high %v2064_v37, %v2068_v42  ;;  %v8686_v20 = vcombine.low %v2064_v37, %v2068_v42 }
 0x3f5   :  { %7099 = vmatpush1.bf16.msra.mxu0 %v8628_v52  ;;  %v2071_v52 = vld [vmem:[#allocation11 + $0x5d0] sm:$0xff] }
 0x3f6   :  { %7345 = vmatpush1.bf16.msra.mxu1 %v8630_v16  ;;  %7109 = vmatprep.subr.bf16.mxu0 %v8637_v62  ;;  %v2075_v16 = vld [vmem:[#allocation11 + $0x5f0] sm:$0xff]  ;;  %v2072_v62 = vld [vmem:[#allocation11 + $0x5d8] sm:$0xff] }
 0x3f7   :  { %7355 = vmatprep.subr.bf16.mxu1 %v8639_v17  ;;  %v2076_v17 = vld [vmem:[#allocation11 + $0x5f8] sm:$0xff]  ;;  %v8692_v49 = vcombine.low %v2071_v52, %v2075_v16 }
 0x3f8   :  { %7101 = vmatmul.mubr.bf16.vlgmr.msra.gmra.mrb[16].mxu0 %v10370_v1  ;;  %v8695_v43 = vcombine.high %v2072_v62, %v2076_v17 }
 0x3f9   :  { %7347 = vmatmul.mubr.bf16.vlgmr.msra.gmra.mrb[16].mxu1 %v10370_v1  ;;  %7110 = vmatpush1.bf16.msra.mxu0 %v8636_v23  ;;  %v8654_v1 = vcombine.low %v2032_v50, %v2036_v10  ;;  %v8693_v23 = vcombine.high %v2071_v52, %v2075_v16 }
 0x3fa   :  { %7141 = vmatprep.mubr.bf16.mxu0 %v10376_v9  ;;  %7356 = vmatpush1.bf16.msra.mxu1 %v8638_v61  ;;  %v2083_v61 = vld [vmem:[#allocation11 + $0x630] sm:$0xff] }
 0x3fb   :  { %7387 = vmatprep.mubr.bf16.mxu1 %v10376_v9  ;;  %7111 = vmatprep.subr.bf16.mxu0 %v8645_v38  ;;  %v8660_v9 = vcombine.low %v2039_v45, %v2043_v56  ;;  %v2080_v38 = vld [vmem:[#allocation11 + $0x618] sm:$0xff]  ;;  %v8701_v50 = vcombine.high %v2079_v47, %v2083_v61  ;;  %v8700_v45 = vcombine.low %v2079_v47, %v2083_v61 }
 0x3fc   :  { %7357 = vmatprep.subr.bf16.mxu1 %v8647_v48  ;;  %v8694_v48 = vcombine.low %v2072_v62, %v2076_v17  ;;  %v8703_v10 = vcombine.high %v2080_v38, %v2084_v41  ;;  %v8702_v56 = vcombine.low %v2080_v38, %v2084_v41 }
 0x3fd   :  { %7112 = vmatpush1.bf16.msra.mxu0 %v8644_v29  ;;  %v2087_v29 = vld [vmem:[#allocation11 + $0x650] sm:$0xff] }
 0x3fe   :  { %7358 = vmatpush1.bf16.msra.mxu1 %v8646_v57  ;;  %7113 = vmatprep.subr.bf16.mxu0 %v8653_v51  ;;  %v2091_v57 = vld [vmem:[#allocation11 + $0x670] sm:$0xff]  ;;  %v2088_v51 = vld [vmem:[#allocation11 + $0x658] sm:$0xff] }
 0x3ff   :  { %7359 = vmatprep.subr.bf16.mxu1 %v8655_v53  ;;  %v2092_v53 = vld [vmem:[#allocation11 + $0x678] sm:$0xff]  ;;  %v8709_v59 = vcombine.high %v2087_v29, %v2091_v57  ;;  %v8708_v4 = vcombine.low %v2087_v29, %v2091_v57 }
 0x400   :  { %v8711_v63 = vcombine.high %v2088_v51, %v2092_v53  ;;  %v8710_v5 = vcombine.low %v2088_v51, %v2092_v53 }
 0x401   :  { %7114 = vmatpush1.bf16.msra.mxu0 %v8652_v0  ;;  %v2095_v0 = vld [vmem:[#allocation11 + $0x690] sm:$0xff] }
 0x402   :  { %7360 = vmatpush1.bf16.msra.mxu1 %v8654_v1  ;;  %7115 = vmatprep.subr.bf16.mxu0 %v8661_v2  ;;  %v2099_v1 = vld [vmem:[#allocation11 + $0x6b0] sm:$0xff]  ;;  %v2096_v2 = vld [vmem:[#allocation11 + $0x698] sm:$0xff] }
 0x403   :  { %7361 = vmatprep.subr.bf16.mxu1 %v8663_v3  ;;  %v2100_v3 = vld [vmem:[#allocation11 + $0x6b8] sm:$0xff]  ;;  %v8717_v35 = vcombine.high %v2095_v0, %v2099_v1  ;;  %v8716_v11 = vcombine.low %v2095_v0, %v2099_v1 }
 0x404   :  { %v8719_v6 = vcombine.high %v2096_v2, %v2100_v3  ;;  %v8718_v12 = vcombine.low %v2096_v2, %v2100_v3 }
 0x405   :  { %7116 = vmatpush1.bf16.msra.mxu0 %v8660_v9  ;;  %v2103_v9 = vld [vmem:[#allocation11 + $0x6d0] sm:$0xff] }
 0x406   :  { %7362 = vmatpush1.bf16.msra.mxu1 %v8662_v54  ;;  %7117 = vmatprep.subr.bf16.mxu0 %v8669_v8  ;;  %v2107_v54 = vld [vmem:[#allocation11 + $0x6f0] sm:$0xff]  ;;  %v2104_v8 = vld [vmem:[#allocation11 + $0x6d8] sm:$0xff] }
 0x407   :  { %7363 = vmatprep.subr.bf16.mxu1 %v8671_v25  ;;  %v2108_v25 = vld [vmem:[#allocation11 + $0x6f8] sm:$0xff]  ;;  %v8725_v22 = vcombine.high %v2103_v9, %v2107_v54  ;;  %v8724_v34 = vcombine.low %v2103_v9, %v2107_v54 }
 0x408   :  { %v8727_v24 = vcombine.high %v2104_v8, %v2108_v25  ;;  %v8726_v55 = vcombine.low %v2104_v8, %v2108_v25  ;;  %v2156_v9 = vld [vmem:[#allocation11 + $0x878] sm:$0xff]  ;;  %v2159_v25 = vld [vmem:[#allocation11 + $0x890] sm:$0xff] }
 0x409   :  { %7118 = vmatpush1.bf16.msra.mxu0 %v8668_v26  ;;  %v2111_v26 = vld [vmem:[#allocation11 + $0x710] sm:$0xff] }
 0x40a   :  { %7364 = vmatpush1.bf16.msra.mxu1 %v8670_v31  ;;  %7119 = vmatprep.subr.bf16.mxu0 %v8677_v32  ;;  %v2115_v31 = vld [vmem:[#allocation11 + $0x730] sm:$0xff]  ;;  %v2112_v32 = vld [vmem:[#allocation11 + $0x718] sm:$0xff] }
 0x40b   :  { %7365 = vmatprep.subr.bf16.mxu1 %v8679_v33  ;;  %v2116_v33 = vld [vmem:[#allocation11 + $0x738] sm:$0xff]  ;;  %v8733_v37 = vcombine.high %v2111_v26, %v2115_v31  ;;  %v8732_v52 = vcombine.low %v2111_v26, %v2115_v31 }
 0x40c   :  { %v8735_v42 = vcombine.high %v2112_v32, %v2116_v33  ;;  %v8734_v16 = vcombine.low %v2112_v32, %v2116_v33 }
 0x40d   :  { %7120 = vmatpush1.bf16.msra.mxu0 %v8676_v21  ;;  %v2119_v21 = vld [vmem:[#allocation11 + $0x750] sm:$0xff] }
 0x40e   :  { %7366 = vmatpush1.bf16.msra.mxu1 %v8678_v39  ;;  %7121 = vmatprep.subr.bf16.mxu0 %v8685_v40  ;;  %v2123_v39 = vld [vmem:[#allocation11 + $0x770] sm:$0xff]  ;;  %v2120_v40 = vld [vmem:[#allocation11 + $0x758] sm:$0xff] }
 0x40f   :  { %7367 = vmatprep.subr.bf16.mxu1 %v8687_v18  ;;  %v2124_v18 = vld [vmem:[#allocation11 + $0x778] sm:$0xff]  ;;  %v8741_v62 = vcombine.high %v2119_v21, %v2123_v39  ;;  %v8740_v47 = vcombine.low %v2119_v21, %v2123_v39 }
 0x410   :  { %v8743_v17 = vcombine.high %v2120_v40, %v2124_v18  ;;  %v8742_v61 = vcombine.low %v2120_v40, %v2124_v18  ;;  %v2175_v18 = vld [vmem:[#allocation11 + $0x910] sm:$0xff] }
 0x411   :  { %7122 = vmatpush1.bf16.msra.mxu0 %v8684_v19  ;;  %v2127_v19 = vld [vmem:[#allocation11 + $0x790] sm:$0xff] }
 0x412   :  { %7368 = vmatpush1.bf16.msra.mxu1 %v8686_v20  ;;  %7123 = vmatprep.subr.bf16.mxu0 %v8693_v23  ;;  %v2131_v20 = vld [vmem:[#allocation11 + $0x7b0] sm:$0xff]  ;;  %v2128_v23 = vld [vmem:[#allocation11 + $0x798] sm:$0xff] }
 0x413   :  { %7369 = vmatprep.subr.bf16.mxu1 %v8695_v43  ;;  %v2132_v43 = vld [vmem:[#allocation11 + $0x7b8] sm:$0xff]  ;;  %v8749_v38 = vcombine.high %v2127_v19, %v2131_v20  ;;  %v8748_v29 = vcombine.low %v2127_v19, %v2131_v20 }
 0x414   :  { %v8751_v41 = vcombine.high %v2128_v23, %v2132_v43  ;;  %v8750_v57 = vcombine.low %v2128_v23, %v2132_v43  ;;  %v2183_v23 = vld [vmem:[#allocation11 + $0x950] sm:$0xff] }
 0x415   :  { %7124 = vmatpush1.bf16.msra.mxu0 %v8692_v49  ;;  %v2135_v49 = vld [vmem:[#allocation11 + $0x7d0] sm:$0xff] }
 0x416   :  { %7370 = vmatpush1.bf16.msra.mxu1 %v8694_v48  ;;  %7125 = vmatprep.subr.bf16.mxu0 %v8701_v50  ;;  %v2139_v48 = vld [vmem:[#allocation11 + $0x7f0] sm:$0xff]  ;;  %v2136_v50 = vld [vmem:[#allocation11 + $0x7d8] sm:$0xff] }
 0x417   :  { %7371 = vmatprep.subr.bf16.mxu1 %v8703_v10  ;;  %v2140_v10 = vld [vmem:[#allocation11 + $0x7f8] sm:$0xff]  ;;  %v8757_v51 = vcombine.high %v2135_v49, %v2139_v48  ;;  %v8756_v0 = vcombine.low %v2135_v49, %v2139_v48  ;;  %v2187_v43 = vld [vmem:[#allocation11 + $0x970] sm:$0xff] }
 0x418   :  { %v8759_v53 = vcombine.high %v2136_v50, %v2140_v10  ;;  %v8758_v1 = vcombine.low %v2136_v50, %v2140_v10  ;;  %v8805_v49 = vcombine.high %v2183_v23, %v2187_v43  ;;  %v2191_v50 = vld [vmem:[#allocation11 + $0x990] sm:$0xff] }
 0x419   :  { %7126 = vmatpush1.bf16.msra.mxu0 %v8700_v45  ;;  %v2143_v45 = vld [vmem:[#allocation11 + $0x810] sm:$0xff] }
 0x41a   :  { %7372 = vmatpush1.bf16.msra.mxu1 %v8702_v56  ;;  %7127 = vmatprep.subr.bf16.mxu0 %v8709_v59  ;;  %v2147_v56 = vld [vmem:[#allocation11 + $0x830] sm:$0xff]  ;;  %v2144_v59 = vld [vmem:[#allocation11 + $0x818] sm:$0xff] }
 0x41b   :  { %7373 = vmatprep.subr.bf16.mxu1 %v8711_v63  ;;  %v2148_v63 = vld [vmem:[#allocation11 + $0x838] sm:$0xff]  ;;  %v8765_v2 = vcombine.high %v2143_v45, %v2147_v56  ;;  %v2195_v10 = vld [vmem:[#allocation11 + $0x9b0] sm:$0xff] }
 0x41c   :  { %v8767_v3 = vcombine.high %v2144_v59, %v2148_v63  ;;  %v8766_v54 = vcombine.low %v2144_v59, %v2148_v63  ;;  %v2199_v59 = vld [vmem:[#allocation11 + $0x9d0] sm:$0xff] }
 0x41d   :  { %7128 = vmatpush1.bf16.msra.mxu0 %v8708_v4  ;;  %v2151_v4 = vld [vmem:[#allocation11 + $0x850] sm:$0xff] }
 0x41e   :  { %7374 = vmatpush1.bf16.msra.mxu1 %v8710_v5  ;;  %7129 = vmatprep.subr.bf16.mxu0 %v8717_v35  ;;  %v2155_v5 = vld [vmem:[#allocation11 + $0x870] sm:$0xff]  ;;  %v8764_v35 = vcombine.low %v2143_v45, %v2147_v56  ;;  %v8813_v45 = vcombine.high %v2191_v50, %v2195_v10 }
 0x41f   :  { %7375 = vmatprep.subr.bf16.mxu1 %v8719_v6  ;;  %v2152_v6 = vld [vmem:[#allocation11 + $0x858] sm:$0xff]  ;;  %v8773_v8 = vcombine.high %v2151_v4, %v2155_v5  ;;  %v8772_v26 = vcombine.low %v2151_v4, %v2155_v5  ;;  %v2203_v63 = vld [vmem:[#allocation11 + $0x9f0] sm:$0xff] }
 0x420   :  { %v8774_v31 = vcombine.low %v2152_v6, %v2156_v9  ;;  %v8821_v4 = vcombine.high %v2199_v59, %v2203_v63 }
 0x421   :  { %7130 = vmatpush1.bf16.msra.mxu0 %v8716_v11  ;;  %v2163_v11 = vld [vmem:[#allocation11 + $0x8b0] sm:$0xff] }
 0x422   :  { %7376 = vmatpush1.bf16.msra.mxu1 %v8718_v12  ;;  %7131 = vmatprep.subr.bf16.mxu0 %v8725_v22  ;;  %v8775_v12 = vcombine.high %v2152_v6, %v2156_v9  ;;  %v2160_v22 = vld [vmem:[#allocation11 + $0x898] sm:$0xff]  ;;  %v8781_v32 = vcombine.high %v2159_v25, %v2163_v11  ;;  %v8780_v21 = vcombine.low %v2159_v25, %v2163_v11  ;;  %v2211_v6 = vld [vmem:[#allocation11 + $0xa30] sm:$0xff] }
 0x423   :  { %7377 = vmatprep.subr.bf16.mxu1 %v8727_v24  ;;  %v2164_v24 = vld [vmem:[#allocation11 + $0x8b8] sm:$0xff] }
 0x424   :  { %v8783_v33 = vcombine.high %v2160_v22, %v2164_v24  ;;  %v2208_v9 = vld [vmem:[#allocation11 + $0xa18] sm:$0xff] }
 0x425   :  { %7132 = vmatpush1.bf16.msra.mxu0 %v8724_v34  ;;  %v2167_v34 = vld [vmem:[#allocation11 + $0x8d0] sm:$0xff] }
 0x426   :  { %7378 = vmatpush1.bf16.msra.mxu1 %v8726_v55  ;;  %7133 = vmatprep.subr.bf16.mxu0 %v8733_v37  ;;  %v2171_v55 = vld [vmem:[#allocation11 + $0x8f0] sm:$0xff]  ;;  %v2168_v37 = vld [vmem:[#allocation11 + $0x8d8] sm:$0xff] }
 0x427   :  { %7379 = vmatprep.subr.bf16.mxu1 %v8735_v42  ;;  %v2172_v42 = vld [vmem:[#allocation11 + $0x8f8] sm:$0xff]  ;;  %v8789_v39 = vcombine.high %v2167_v34, %v2171_v55 }
 0x428   :  { %v8791_v40 = vcombine.high %v2168_v37, %v2172_v42 }
 0x429   :  { %7134 = vmatpush1.bf16.msra.mxu0 %v8732_v52  ;;  %v2179_v52 = vld [vmem:[#allocation11 + $0x930] sm:$0xff] }
 0x42a   :  { %7380 = vmatpush1.bf16.msra.mxu1 %v8734_v16  ;;  %7135 = vmatprep.subr.bf16.mxu0 %v8741_v62  ;;  %v2176_v16 = vld [vmem:[#allocation11 + $0x918] sm:$0xff]  ;;  %v8797_v19 = vcombine.high %v2175_v18, %v2179_v52 }
 0x42b   :  { %7381 = vmatprep.subr.bf16.mxu1 %v8743_v17  ;;  %v2180_v62 = vld [vmem:[#allocation11 + $0x938] sm:$0xff]  ;;  %v8790_v17 = vcombine.low %v2168_v37, %v2172_v42  ;;  %v2223_v37 = vld [vmem:[#allocation11 + $0xa90] sm:$0xff] }
 0x42c   :  { %v8799_v20 = vcombine.high %v2176_v16, %v2180_v62  ;;  %v2227_v42 = vld [vmem:[#allocation11 + $0xab0] sm:$0xff] }
 0x42d   :  { %7136 = vmatpush1.bf16.msra.mxu0 %v8740_v47  ;;  %v2184_v47 = vld [vmem:[#allocation11 + $0x958] sm:$0xff] }
 0x42e   :  { %7382 = vmatpush1.bf16.msra.mxu1 %v8742_v61  ;;  %7137 = vmatprep.subr.bf16.mxu0 %v8749_v38  ;;  %v2188_v61 = vld [vmem:[#allocation11 + $0x978] sm:$0xff]  ;;  %v8796_v38 = vcombine.low %v2175_v18, %v2179_v52  ;;  %v8845_v18 = vcombine.high %v2223_v37, %v2227_v42 }
 0x42f   :  { %7383 = vmatprep.subr.bf16.mxu1 %v8751_v41  ;;  %v8798_v41 = vcombine.low %v2176_v16, %v2180_v62  ;;  %v8807_v48 = vcombine.high %v2184_v47, %v2188_v61  ;;  %v2231_v16 = vld [vmem:[#allocation11 + $0xad0] sm:$0xff] }
 0x430   :  { %v2235_v62 = vld [vmem:[#allocation11 + $0xaf0] sm:$0xff] }
 0x431   :  { %7138 = vmatpush1.bf16.msra.mxu0 %v8748_v29  ;;  %v2192_v29 = vld [vmem:[#allocation11 + $0x998] sm:$0xff] }
 0x432   :  { %7384 = vmatpush1.bf16.msra.mxu1 %v8750_v57  ;;  %7139 = vmatprep.subr.bf16.mxu0 %v8757_v51  ;;  %v2196_v57 = vld [vmem:[#allocation11 + $0x9b8] sm:$0xff]  ;;  %v8804_v51 = vcombine.low %v2183_v23, %v2187_v43  ;;  %v8853_v23 = vcombine.high %v2231_v16, %v2235_v62 }
 0x433   :  { %7385 = vmatprep.subr.bf16.mxu1 %v8759_v53  ;;  %v8806_v53 = vcombine.low %v2184_v47, %v2188_v61  ;;  %v8815_v56 = vcombine.high %v2192_v29, %v2196_v57  ;;  %v2239_v47 = vld [vmem:[#allocation11 + $0xb10] sm:$0xff] }
 0x434   :  { %v2243_v61 = vld [vmem:[#allocation11 + $0xb30] sm:$0xff] }
 0x435   :  { %7140 = vmatpush1.bf16.msra.mxu0 %v8756_v0  ;;  %v2200_v0 = vld [vmem:[#allocation11 + $0x9d8] sm:$0xff] }
 0x436   :  { %7386 = vmatpush1.bf16.msra.mxu1 %v8758_v1  ;;  %7150 = vmatprep.subr.bf16.mxu0 %v8765_v2  ;;  %v2204_v1 = vld [vmem:[#allocation11 + $0x9f8] sm:$0xff]  ;;  %v8812_v2 = vcombine.low %v2191_v50, %v2195_v10  ;;  %v8861_v50 = vcombine.high %v2239_v47, %v2243_v61 }
 0x437   :  { %7396 = vmatprep.subr.bf16.mxu1 %v8767_v3  ;;  %v8814_v3 = vcombine.low %v2192_v29, %v2196_v57  ;;  %v8823_v5 = vcombine.high %v2200_v0, %v2204_v1  ;;  %v8822_v25 = vcombine.low %v2200_v0, %v2204_v1  ;;  %v2247_v29 = vld [vmem:[#allocation11 + $0xb50] sm:$0xff] }
 0x438   :  { %7142 = vmatmul.mubr.bf16.vlgmr.msra.gmra.mrb[16].mxu0 %v10399_v46  ;;  %v2251_v57 = vld [vmem:[#allocation11 + $0xb70] sm:$0xff] }
 0x439   :  { %7388 = vmatmul.mubr.bf16.vlgmr.msra.gmra.mrb[16].mxu1 %v10399_v46  ;;  %7151 = vmatpush1.bf16.msra.mxu0 %v8764_v35  ;;  %v8782_v46 = vcombine.low %v2160_v22, %v2164_v24  ;;  %v2207_v35 = vld [vmem:[#allocation11 + $0xa10] sm:$0xff] }
 0x43a   :  { %7182 = vmatprep.mubr.bf16.mxu0 %v10397_v44  ;;  %7397 = vmatpush1.bf16.msra.mxu1 %v8766_v54  ;;  %v2212_v54 = vld [vmem:[#allocation11 + $0xa38] sm:$0xff]  ;;  %v8829_v11 = vcombine.high %v2207_v35, %v2211_v6  ;;  %v2215_v22 = vld [vmem:[#allocation11 + $0xa50] sm:$0xff] }
 0x43b   :  { %7428 = vmatprep.mubr.bf16.mxu1 %v10397_v44  ;;  %7152 = vmatprep.subr.bf16.mxu0 %v8773_v8  ;;  %v8788_v44 = vcombine.low %v2167_v34, %v2171_v55  ;;  %v8820_v8 = vcombine.low %v2199_v59, %v2203_v63  ;;  %v2219_v24 = vld [vmem:[#allocation11 + $0xa70] sm:$0xff]  ;;  %v8869_v59 = vcombine.high %v2247_v29, %v2251_v57 }
 0x43c   :  { %7398 = vmatprep.subr.bf16.mxu1 %v8775_v12  ;;  %v8831_v12 = vcombine.high %v2208_v9, %v2212_v54  ;;  %v8837_v34 = vcombine.high %v2215_v22, %v2219_v24  ;;  %v2255_v0 = vld [vmem:[#allocation11 + $0xb90] sm:$0xff] }
 0x43d   :  { %7153 = vmatpush1.bf16.msra.mxu0 %v8772_v26  ;;  %v2216_v26 = vld [vmem:[#allocation11 + $0xa58] sm:$0xff]  ;;  %v2259_v1 = vld [vmem:[#allocation11 + $0xbb0] sm:$0xff] }
 0x43e   :  { %7399 = vmatpush1.bf16.msra.mxu1 %v8774_v31  ;;  %7154 = vmatprep.subr.bf16.mxu0 %v8781_v32  ;;  %v2220_v31 = vld [vmem:[#allocation11 + $0xa78] sm:$0xff]  ;;  %v8828_v32 = vcombine.low %v2207_v35, %v2211_v6  ;;  %v8877_v35 = vcombine.high %v2255_v0, %v2259_v1 }
 0x43f   :  { %7400 = vmatprep.subr.bf16.mxu1 %v8783_v33  ;;  %v8830_v33 = vcombine.low %v2208_v9, %v2212_v54  ;;  %v8839_v55 = vcombine.high %v2216_v26, %v2220_v31  ;;  %v2263_v9 = vld [vmem:[#allocation11 + $0xbd0] sm:$0xff] }
 0x440   :  { %v2267_v54 = vld [vmem:[#allocation11 + $0xbf0] sm:$0xff] }
 0x441   :  { %7155 = vmatpush1.bf16.msra.mxu0 %v8780_v21  ;;  %v2224_v21 = vld [vmem:[#allocation11 + $0xa98] sm:$0xff] }
 0x442   :  { %7401 = vmatpush1.bf16.msra.mxu1 %v8782_v46  ;;  %7156 = vmatprep.subr.bf16.mxu0 %v8789_v39  ;;  %v2228_v46 = vld [vmem:[#allocation11 + $0xab8] sm:$0xff]  ;;  %v8836_v39 = vcombine.low %v2215_v22, %v2219_v24  ;;  %v8885_v22 = vcombine.high %v2263_v9, %v2267_v54 }
 0x443   :  { %7402 = vmatprep.subr.bf16.mxu1 %v8791_v40  ;;  %v8838_v40 = vcombine.low %v2216_v26, %v2220_v31  ;;  %v8847_v52 = vcombine.high %v2224_v21, %v2228_v46  ;;  %v2271_v26 = vld [vmem:[#allocation11 + $0xc10] sm:$0xff] }
 0x444   :  { %v2275_v31 = vld [vmem:[#allocation11 + $0xc30] sm:$0xff] }
 0x445   :  { %7157 = vmatpush1.bf16.msra.mxu0 %v8788_v44  ;;  %v2232_v44 = vld [vmem:[#allocation11 + $0xad8] sm:$0xff] }
 0x446   :  { %7403 = vmatpush1.bf16.msra.mxu1 %v8790_v17  ;;  %7158 = vmatprep.subr.bf16.mxu0 %v8797_v19  ;;  %v2236_v17 = vld [vmem:[#allocation11 + $0xaf8] sm:$0xff]  ;;  %v8844_v19 = vcombine.low %v2223_v37, %v2227_v42  ;;  %v8893_v37 = vcombine.high %v2271_v26, %v2275_v31 }
 0x447   :  { %7404 = vmatprep.subr.bf16.mxu1 %v8799_v20  ;;  %v8846_v20 = vcombine.low %v2224_v21, %v2228_v46  ;;  %v8855_v43 = vcombine.high %v2232_v44, %v2236_v17  ;;  %v2279_v21 = vld [vmem:[#allocation11 + $0xc50] sm:$0xff] }
 0x448   :  { %v2283_v46 = vld [vmem:[#allocation11 + $0xc70] sm:$0xff] }
 0x449   :  { %7159 = vmatpush1.bf16.msra.mxu0 %v8796_v38  ;;  %v2240_v38 = vld [vmem:[#allocation11 + $0xb18] sm:$0xff] }
 0x44a   :  { %7405 = vmatpush1.bf16.msra.mxu1 %v8798_v41  ;;  %7160 = vmatprep.subr.bf16.mxu0 %v8805_v49  ;;  %v2244_v41 = vld [vmem:[#allocation11 + $0xb38] sm:$0xff]  ;;  %v8852_v49 = vcombine.low %v2231_v16, %v2235_v62  ;;  %v8901_v16 = vcombine.high %v2279_v21, %v2283_v46  ;;  %v2287_v62 = vld [vmem:[#allocation11 + $0xc90] sm:$0xff] }
 0x44b   :  { %7406 = vmatprep.subr.bf16.mxu1 %v8807_v48  ;;  %v8854_v48 = vcombine.low %v2232_v44, %v2236_v17  ;;  %v8863_v10 = vcombine.high %v2240_v38, %v2244_v41  ;;  %v2291_v44 = vld [vmem:[#allocation11 + $0xcb0] sm:$0xff] }
 0x44d   :  { %7161 = vmatpush1.bf16.msra.mxu0 %v8804_v51  ;;  %v2248_v51 = vld [vmem:[#allocation11 + $0xb58] sm:$0xff] }
 0x44e   :  { %7407 = vmatpush1.bf16.msra.mxu1 %v8806_v53  ;;  %7162 = vmatprep.subr.bf16.mxu0 %v8813_v45  ;;  %v2252_v53 = vld [vmem:[#allocation11 + $0xb78] sm:$0xff]  ;;  %v8860_v45 = vcombine.low %v2239_v47, %v2243_v61  ;;  %v8909_v47 = vcombine.high %v2287_v62, %v2291_v44 }
 0x44f   :  { %7408 = vmatprep.subr.bf16.mxu1 %v8815_v56  ;;  %v8862_v56 = vcombine.low %v2240_v38, %v2244_v41  ;;  %v8871_v63 = vcombine.high %v2248_v51, %v2252_v53  ;;  %v2295_v38 = vld [vmem:[#allocation11 + $0xcd0] sm:$0xff] }
 0x450   :  { %v2299_v41 = vld [vmem:[#allocation11 + $0xcf0] sm:$0xff] }
 0x451   :  { %7163 = vmatpush1.bf16.msra.mxu0 %v8812_v2  ;;  %v2256_v2 = vld [vmem:[#allocation11 + $0xb98] sm:$0xff] }
 0x452   :  { %7409 = vmatpush1.bf16.msra.mxu1 %v8814_v3  ;;  %7164 = vmatprep.subr.bf16.mxu0 %v8821_v4  ;;  %v2260_v3 = vld [vmem:[#allocation11 + $0xbb8] sm:$0xff]  ;;  %v8868_v4 = vcombine.low %v2247_v29, %v2251_v57  ;;  %v2303_v57 = vld [vmem:[#allocation11 + $0xd10] sm:$0xff] }
 0x453   :  { %7410 = vmatprep.subr.bf16.mxu1 %v8823_v5  ;;  %v8870_v5 = vcombine.low %v2248_v51, %v2252_v53  ;;  %v8879_v6 = vcombine.high %v2256_v2, %v2260_v3  ;;  %v2307_v51 = vld [vmem:[#allocation11 + $0xd30] sm:$0xff]  ;;  %v2304_v53 = vld [vmem:[#allocation11 + $0xd18] sm:$0xff] }
 0x455   :  { %7165 = vmatpush1.bf16.msra.mxu0 %v8820_v8  ;;  %v2264_v8 = vld [vmem:[#allocation11 + $0xbd8] sm:$0xff] }
 0x456   :  { %7411 = vmatpush1.bf16.msra.mxu1 %v8822_v25  ;;  %7166 = vmatprep.subr.bf16.mxu0 %v8829_v11  ;;  %v2268_v25 = vld [vmem:[#allocation11 + $0xbf8] sm:$0xff]  ;;  %v8876_v11 = vcombine.low %v2255_v0, %v2259_v1  ;;  %v2311_v0 = vld [vmem:[#allocation11 + $0xd50] sm:$0xff] }
 0x457   :  { %7412 = vmatprep.subr.bf16.mxu1 %v8831_v12  ;;  %v8878_v12 = vcombine.low %v2256_v2, %v2260_v3  ;;  %v8887_v24 = vcombine.high %v2264_v8, %v2268_v25  ;;  %v2315_v1 = vld [vmem:[#allocation11 + $0xd70] sm:$0xff]  ;;  %v2312_v2 = vld [vmem:[#allocation11 + $0xd58] sm:$0xff] }
 0x458   :  { %v2316_v3 = vld [vmem:[#allocation11 + $0xd78] sm:$0xff] }
 0x459   :  { %7167 = vmatpush1.bf16.msra.mxu0 %v8828_v32  ;;  %v2272_v32 = vld [vmem:[#allocation11 + $0xc18] sm:$0xff] }
 0x45a   :  { %7413 = vmatpush1.bf16.msra.mxu1 %v8830_v33  ;;  %7168 = vmatprep.subr.bf16.mxu0 %v8837_v34  ;;  %v2276_v33 = vld [vmem:[#allocation11 + $0xc38] sm:$0xff]  ;;  %v8884_v34 = vcombine.low %v2263_v9, %v2267_v54  ;;  %v2319_v9 = vld [vmem:[#allocation11 + $0xd90] sm:$0xff] }
 0x45b   :  { %7414 = vmatprep.subr.bf16.mxu1 %v8839_v55  ;;  %v8886_v55 = vcombine.low %v2264_v8, %v2268_v25  ;;  %v8895_v42 = vcombine.high %v2272_v32, %v2276_v33  ;;  %v2323_v54 = vld [vmem:[#allocation11 + $0xdb0] sm:$0xff]  ;;  %v2320_v8 = vld [vmem:[#allocation11 + $0xd98] sm:$0xff] }
 0x45c   :  { %v2324_v25 = vld [vmem:[#allocation11 + $0xdb8] sm:$0xff] }
 0x45d   :  { %7169 = vmatpush1.bf16.msra.mxu0 %v8836_v39  ;;  %v8892_v39 = vcombine.low %v2271_v26, %v2275_v31  ;;  %v8943_v31 = vcombine.high %v2320_v8, %v2324_v25 }
 0x45e   :  { %7415 = vmatpush1.bf16.msra.mxu1 %v8838_v40  ;;  %7170 = vmatprep.subr.bf16.mxu0 %v8845_v18  ;;  %v2280_v40 = vld [vmem:[#allocation11 + $0xc58] sm:$0xff] }
 0x45f   :  { %7416 = vmatprep.subr.bf16.mxu1 %v8847_v52  ;;  %v2284_v18 = vld [vmem:[#allocation11 + $0xc78] sm:$0xff]  ;;  %v8894_v52 = vcombine.low %v2272_v32, %v2276_v33  ;;  %v2327_v32 = vld [vmem:[#allocation11 + $0xdd0] sm:$0xff] }
 0x460   :  { %v8903_v17 = vcombine.high %v2280_v40, %v2284_v18  ;;  %v2331_v33 = vld [vmem:[#allocation11 + $0xdf0] sm:$0xff] }
 0x461   :  { %7171 = vmatpush1.bf16.msra.mxu0 %v8844_v19  ;;  %v2288_v19 = vld [vmem:[#allocation11 + $0xc98] sm:$0xff] }
 0x462   :  { %7417 = vmatpush1.bf16.msra.mxu1 %v8846_v20  ;;  %7172 = vmatprep.subr.bf16.mxu0 %v8853_v23  ;;  %v2292_v20 = vld [vmem:[#allocation11 + $0xcb8] sm:$0xff]  ;;  %v8900_v23 = vcombine.low %v2279_v21, %v2283_v46 }
 0x463   :  { %7418 = vmatprep.subr.bf16.mxu1 %v8855_v43  ;;  %v8902_v43 = vcombine.low %v2280_v40, %v2284_v18  ;;  %v8911_v61 = vcombine.high %v2288_v19, %v2292_v20 }
 0x465   :  { %7173 = vmatpush1.bf16.msra.mxu0 %v8852_v49  ;;  %v2296_v49 = vld [vmem:[#allocation11 + $0xcd8] sm:$0xff] }
 0x466   :  { %7419 = vmatpush1.bf16.msra.mxu1 %v8854_v48  ;;  %7174 = vmatprep.subr.bf16.mxu0 %v8861_v50  ;;  %v2300_v48 = vld [vmem:[#allocation11 + $0xcf8] sm:$0xff]  ;;  %v8908_v50 = vcombine.low %v2287_v62, %v2291_v44  ;;  %v2335_v44 = vld [vmem:[#allocation11 + $0xe10] sm:$0xff] }
 0x467   :  { %7420 = vmatprep.subr.bf16.mxu1 %v8863_v10  ;;  %v8917_v10 = vcombine.high %v2295_v38, %v2299_v41  ;;  %v8919_v29 = vcombine.high %v2296_v49, %v2300_v48 }
 0x469   :  { %7175 = vmatpush1.bf16.msra.mxu0 %v8860_v45  ;;  %v2308_v45 = vld [vmem:[#allocation11 + $0xd38] sm:$0xff] }
 0x46a   :  { %7421 = vmatpush1.bf16.msra.mxu1 %v8862_v56  ;;  %7176 = vmatprep.subr.bf16.mxu0 %v8869_v59  ;;  %v8918_v56 = vcombine.low %v2296_v49, %v2300_v48  ;;  %v8925_v59 = vcombine.high %v2303_v57, %v2307_v51  ;;  %v2344_v49 = vld [vmem:[#allocation11 + $0xe58] sm:$0xff] }
 0x46b   :  { %7422 = vmatprep.subr.bf16.mxu1 %v8871_v63  ;;  %v8927_v63 = vcombine.high %v2304_v53, %v2308_v45  ;;  %v2348_v48 = vld [vmem:[#allocation11 + $0xe78] sm:$0xff] }
 0x46d   :  { %7177 = vmatpush1.bf16.msra.mxu0 %v8868_v4  ;;  %v8924_v4 = vcombine.low %v2303_v57, %v2307_v51  ;;  %v2351_v57 = vld [vmem:[#allocation11 + $0xe90] sm:$0xff] }
 0x46e   :  { %7423 = vmatpush1.bf16.msra.mxu1 %v8870_v5  ;;  %7178 = vmatprep.subr.bf16.mxu0 %v8877_v35  ;;  %v8926_v5 = vcombine.low %v2304_v53, %v2308_v45  ;;  %v8933_v35 = vcombine.high %v2311_v0, %v2315_v1  ;;  %v2355_v51 = vld [vmem:[#allocation11 + $0xeb0] sm:$0xff]  ;;  %v2352_v53 = vld [vmem:[#allocation11 + $0xe98] sm:$0xff] }
 0x46f   :  { %7424 = vmatprep.subr.bf16.mxu1 %v8879_v6  ;;  %v8935_v6 = vcombine.high %v2312_v2, %v2316_v3  ;;  %v2356_v45 = vld [vmem:[#allocation11 + $0xeb8] sm:$0xff] }
 0x471   :  { %7179 = vmatpush1.bf16.msra.mxu0 %v8876_v11  ;;  %v8932_v11 = vcombine.low %v2311_v0, %v2315_v1  ;;  %v2359_v0 = vld [vmem:[#allocation11 + $0xed0] sm:$0xff] }
 0x472   :  { %7425 = vmatpush1.bf16.msra.mxu1 %v8878_v12  ;;  %7180 = vmatprep.subr.bf16.mxu0 %v8885_v22  ;;  %v8934_v12 = vcombine.low %v2312_v2, %v2316_v3  ;;  %v8941_v22 = vcombine.high %v2319_v9, %v2323_v54  ;;  %v2363_v1 = vld [vmem:[#allocation11 + $0xef0] sm:$0xff]  ;;  %v2360_v2 = vld [vmem:[#allocation11 + $0xed8] sm:$0xff] }
 0x473   :  { %7426 = vmatprep.subr.bf16.mxu1 %v8887_v24  ;;  %v2364_v3 = vld [vmem:[#allocation11 + $0xef8] sm:$0xff] }
 0x475   :  { %7181 = vmatpush1.bf16.msra.mxu0 %v8884_v34 }
 0x476   :  { %7427 = vmatpush1.bf16.msra.mxu1 %v8886_v55  ;;  %7191 = vmatprep.subr.bf16.mxu0 %v8893_v37  ;;  %v2328_v37 = vld [vmem:[#allocation11 + $0xdd8] sm:$0xff] }
 0x477   :  { %7437 = vmatprep.subr.bf16.mxu1 %v8895_v42  ;;  %v2332_v42 = vld [vmem:[#allocation11 + $0xdf8] sm:$0xff] }
 0x478   :  { %7183 = vmatmul.mubr.bf16.vlgmr.msra.gmra.mrb[16].mxu0 %v10437_v14  ;;  %v8951_v62 = vcombine.high %v2328_v37, %v2332_v42 }
 0x479   :  { %7429 = vmatmul.mubr.bf16.vlgmr.msra.gmra.mrb[16].mxu1 %v10437_v14  ;;  %7192 = vmatpush1.bf16.msra.mxu0 %v8892_v39  ;;  %v8910_v14 = vcombine.low %v2288_v19, %v2292_v20  ;;  %v8940_v39 = vcombine.low %v2319_v9, %v2323_v54  ;;  %v2336_v19 = vld [vmem:[#allocation11 + $0xe18] sm:$0xff]  ;;  %v2367_v9 = vld [vmem:[#allocation11 + $0xf10] sm:$0xff] }
 0x47a   :  { %7223 = vmatprep.mubr.bf16.mxu0 %v10439_v60  ;;  %7438 = vmatpush1.bf16.msra.mxu1 %v8894_v52  ;;  %v8942_v52 = vcombine.low %v2320_v8, %v2324_v25  ;;  %v2340_v20 = vld [vmem:[#allocation11 + $0xe38] sm:$0xff]  ;;  %v2371_v54 = vld [vmem:[#allocation11 + $0xf30] sm:$0xff] }
 0x47b   :  { %7469 = vmatprep.mubr.bf16.mxu1 %v10439_v60  ;;  %7193 = vmatprep.subr.bf16.mxu0 %v8901_v16  ;;  %v8916_v60 = vcombine.low %v2295_v38, %v2299_v41  ;;  %v8949_v16 = vcombine.high %v2327_v32, %v2331_v33  ;;  %v2343_v38 = vld [vmem:[#allocation11 + $0xe50] sm:$0xff]  ;;  %v2368_v8 = vld [vmem:[#allocation11 + $0xf18] sm:$0xff] }
 0x47c   :  { %7439 = vmatprep.subr.bf16.mxu1 %v8903_v17  ;;  %v2339_v17 = vld [vmem:[#allocation11 + $0xe30] sm:$0xff]  ;;  %v2372_v25 = vld [vmem:[#allocation11 + $0xf38] sm:$0xff] }
 0x47d   :  { %7194 = vmatpush1.bf16.msra.mxu0 %v8900_v23  ;;  %v8948_v23 = vcombine.low %v2327_v32, %v2331_v33  ;;  %v2347_v41 = vld [vmem:[#allocation11 + $0xe70] sm:$0xff] }
 0x47e   :  { %7440 = vmatpush1.bf16.msra.mxu1 %v8902_v43  ;;  %7195 = vmatprep.subr.bf16.mxu0 %v8909_v47  ;;  %v8950_v43 = vcombine.low %v2328_v37, %v2332_v42  ;;  %v8957_v47 = vcombine.high %v2335_v44, %v2339_v17  ;;  %v2375_v32 = vld [vmem:[#allocation11 + $0xf50] sm:$0xff]  ;;  %v2376_v37 = vld [vmem:[#allocation11 + $0xf58] sm:$0xff] }
 0x47f   :  { %7441 = vmatprep.subr.bf16.mxu1 %v8911_v61  ;;  %v8959_v61 = vcombine.high %v2336_v19, %v2340_v20  ;;  %v2379_v33 = vld [vmem:[#allocation11 + $0xf70] sm:$0xff]  ;;  %v2380_v42 = vld [vmem:[#allocation11 + $0xf78] sm:$0xff] }
 0x481   :  { %7196 = vmatpush1.bf16.msra.mxu0 %v8908_v50  ;;  %v8956_v50 = vcombine.low %v2335_v44, %v2339_v17  ;;  %v8996_v44 = vcombine.low %v2375_v32, %v2379_v33  ;;  %v8998_v17 = vcombine.low %v2376_v37, %v2380_v42 }
 0x482   :  { %7442 = vmatpush1.bf16.msra.mxu1 %v8910_v14  ;;  %7197 = vmatprep.subr.bf16.mxu0 %v8917_v10  ;;  %v8958_v14 = vcombine.low %v2336_v19, %v2340_v20  ;;  %v8965_v10 = vcombine.high %v2343_v38, %v2347_v41 }
 0x483   :  { %7443 = vmatprep.subr.bf16.mxu1 %v8919_v29  ;;  %v8967_v29 = vcombine.high %v2344_v49, %v2348_v48 }
 0x485   :  { %7198 = vmatpush1.bf16.msra.mxu0 %v8916_v60  ;;  %v8964_v60 = vcombine.low %v2343_v38, %v2347_v41 }
 0x486   :  { %7444 = vmatpush1.bf16.msra.mxu1 %v8918_v56  ;;  %7199 = vmatprep.subr.bf16.mxu0 %v8925_v59  ;;  %v8966_v56 = vcombine.low %v2344_v49, %v2348_v48  ;;  %v8973_v59 = vcombine.high %v2351_v57, %v2355_v51 }
 0x487   :  { %7445 = vmatprep.subr.bf16.mxu1 %v8927_v63  ;;  %v8975_v63 = vcombine.high %v2352_v53, %v2356_v45 }
 0x489   :  { %7200 = vmatpush1.bf16.msra.mxu0 %v8924_v4  ;;  %v8972_v4 = vcombine.low %v2351_v57, %v2355_v51 }
 0x48a   :  { %7446 = vmatpush1.bf16.msra.mxu1 %v8926_v5  ;;  %7201 = vmatprep.subr.bf16.mxu0 %v8933_v35  ;;  %v8974_v5 = vcombine.low %v2352_v53, %v2356_v45  ;;  %v8981_v35 = vcombine.high %v2359_v0, %v2363_v1 }
 0x48b   :  { %v10556_v24 = vpop.f32.mrb[12].mxu0  ;;  %v10558_v26 = vpop.f32.mrb[12].mxu1  ;;  %7447 = vmatprep.subr.bf16.mxu1 %v8935_v6  ;;  %v8983_v6 = vcombine.high %v2360_v2, %v2364_v3 }
 0x48c   :  { %v10560_v34 = vpop.f32.mrb[13].mxu0  ;;  %v10562_v55 = vpop.f32.mrb[13].mxu1 }
 0x48d   :  { %v6819_v21 = vpop.f32.mrb[14].mxu0  ;;  %v7065_v46 = vpop.f32.mrb[14].mxu1  ;;  %7202 = vmatpush1.bf16.msra.mxu0 %v8932_v11  ;;  %v8980_v11 = vcombine.low %v2359_v0, %v2363_v1  ;;  %v2412_v0 = vld [vmem:[#allocation11 + $0x1078] sm:$0xff] }
 0x48e   :  { %7448 = vmatpush1.bf16.msra.mxu1 %v8934_v12  ;;  %v6820_v40 = vpop.f32.mrb[15].mxu0  ;;  %v7066_v18 = vpop.f32.mrb[15].mxu1  ;;  %7203 = vmatprep.subr.bf16.mxu0 %v8941_v22  ;;  %v8982_v12 = vcombine.low %v2360_v2, %v2364_v3  ;;  %v8989_v22 = vcombine.high %v2367_v9, %v2371_v54  ;;  %v8988_v21 = vcombine.low %v2367_v9, %v2371_v54  ;;  %v2415_v3 = vld [vmem:[#allocation11 + $0x1090] sm:$0xff] }
 0x48f   :  { %7449 = vmatprep.subr.bf16.mxu1 %v8943_v31  ;;  %v8991_v31 = vcombine.high %v2368_v8, %v2372_v25  ;;  %v8990_v46 = vcombine.low %v2368_v8, %v2372_v25  ;;  %v8999_v40 = vcombine.high %v2376_v37, %v2380_v42  ;;  %v2383_v18 = vld [vmem:[#allocation11 + $0xf90] sm:$0xff] }
 0x490   :  { %v2431_v42 = vld [vmem:[#allocation11 + $0x1110] sm:$0xff] }
 0x491   :  { %7204 = vmatpush1.bf16.msra.mxu0 %v8940_v39  ;;  %v8997_v39 = vcombine.high %v2375_v32, %v2379_v33 }
 0x492   :  { %7450 = vmatpush1.bf16.msra.mxu1 %v8942_v52  ;;  %7205 = vmatprep.subr.bf16.mxu0 %v8949_v16  ;;  %v2387_v52 = vld [vmem:[#allocation11 + $0xfb0] sm:$0xff]  ;;  %v2384_v16 = vld [vmem:[#allocation11 + $0xf98] sm:$0xff] }
 0x493   :  { %7451 = vmatprep.subr.bf16.mxu1 %v8951_v62  ;;  %v2388_v62 = vld [vmem:[#allocation11 + $0xfb8] sm:$0xff]  ;;  %v9005_v19 = vcombine.high %v2383_v18, %v2387_v52  ;;  %v9004_v38 = vcombine.low %v2383_v18, %v2387_v52 }
 0x494   :  { %v9007_v20 = vcombine.high %v2384_v16, %v2388_v62  ;;  %v9006_v41 = vcombine.low %v2384_v16, %v2388_v62  ;;  %v2439_v16 = vld [vmem:[#allocation11 + $0x1150] sm:$0xff] }
 0x495   :  { %7206 = vmatpush1.bf16.msra.mxu0 %v8948_v23  ;;  %v2391_v23 = vld [vmem:[#allocation11 + $0xfd0] sm:$0xff] }
 0x496   :  { %7452 = vmatpush1.bf16.msra.mxu1 %v8950_v43  ;;  %7207 = vmatprep.subr.bf16.mxu0 %v8957_v47  ;;  %v2395_v43 = vld [vmem:[#allocation11 + $0xff0] sm:$0xff]  ;;  %v2392_v47 = vld [vmem:[#allocation11 + $0xfd8] sm:$0xff] }
 0x497   :  { %7453 = vmatprep.subr.bf16.mxu1 %v8959_v61  ;;  %v2396_v61 = vld [vmem:[#allocation11 + $0xff8] sm:$0xff]  ;;  %v9013_v49 = vcombine.high %v2391_v23, %v2395_v43  ;;  %v9012_v57 = vcombine.low %v2391_v23, %v2395_v43  ;;  %v2443_v62 = vld [vmem:[#allocation11 + $0x1170] sm:$0xff] }
 0x498   :  { %v9015_v48 = vcombine.high %v2392_v47, %v2396_v61  ;;  %v9014_v51 = vcombine.low %v2392_v47, %v2396_v61  ;;  %v9061_v23 = vcombine.high %v2439_v16, %v2443_v62  ;;  %v2447_v47 = vld [vmem:[#allocation11 + $0x1190] sm:$0xff] }
 0x499   :  { %7208 = vmatpush1.bf16.msra.mxu0 %v8956_v50  ;;  %v2399_v50 = vld [vmem:[#allocation11 + $0x1010] sm:$0xff] }
 0x49a   :  { %7454 = vmatpush1.bf16.msra.mxu1 %v8958_v14  ;;  %7209 = vmatprep.subr.bf16.mxu0 %v8965_v10  ;;  %v2403_v14 = vld [vmem:[#allocation11 + $0x1030] sm:$0xff]  ;;  %v2400_v10 = vld [vmem:[#allocation11 + $0x1018] sm:$0xff] }
 0x49b   :  { %7455 = vmatprep.subr.bf16.mxu1 %v8967_v29  ;;  %v2404_v29 = vld [vmem:[#allocation11 + $0x1038] sm:$0xff]  ;;  %v9021_v53 = vcombine.high %v2399_v50, %v2403_v14  ;;  %v2451_v61 = vld [vmem:[#allocation11 + $0x11b0] sm:$0xff] }
 0x49c   :  { %v9023_v45 = vcombine.high %v2400_v10, %v2404_v29  ;;  %v9022_v1 = vcombine.low %v2400_v10, %v2404_v29  ;;  %v2455_v10 = vld [vmem:[#allocation11 + $0x11d0] sm:$0xff] }
 0x49d   :  { %7210 = vmatpush1.bf16.msra.mxu0 %v8964_v60  ;;  %v2407_v60 = vld [vmem:[#allocation11 + $0x1050] sm:$0xff] }
 0x49e   :  { %7456 = vmatpush1.bf16.msra.mxu1 %v8966_v56  ;;  %7211 = vmatprep.subr.bf16.mxu0 %v8973_v59  ;;  %v2411_v56 = vld [vmem:[#allocation11 + $0x1070] sm:$0xff]  ;;  %v9020_v59 = vcombine.low %v2399_v50, %v2403_v14  ;;  %v9069_v50 = vcombine.high %v2447_v47, %v2451_v61 }
 0x49f   :  { %7457 = vmatprep.subr.bf16.mxu1 %v8975_v63  ;;  %v2408_v63 = vld [vmem:[#allocation11 + $0x1058] sm:$0xff]  ;;  %v9029_v2 = vcombine.high %v2407_v60, %v2411_v56  ;;  %v9028_v9 = vcombine.low %v2407_v60, %v2411_v56  ;;  %v2459_v29 = vld [vmem:[#allocation11 + $0x11f0] sm:$0xff] }
 0x4a0   :  { %v9030_v54 = vcombine.low %v2408_v63, %v2412_v0  ;;  %v9077_v60 = vcombine.high %v2455_v10, %v2459_v29 }
 0x4a1   :  { %7212 = vmatpush1.bf16.msra.mxu0 %v8972_v4  ;;  %v2419_v4 = vld [vmem:[#allocation11 + $0x10b0] sm:$0xff] }
 0x4a2   :  { %7458 = vmatpush1.bf16.msra.mxu1 %v8974_v5  ;;  %7213 = vmatprep.subr.bf16.mxu0 %v8981_v35  ;;  %v9031_v5 = vcombine.high %v2408_v63, %v2412_v0  ;;  %v2416_v35 = vld [vmem:[#allocation11 + $0x1098] sm:$0xff]  ;;  %v9037_v8 = vcombine.high %v2415_v3, %v2419_v4  ;;  %v9036_v32 = vcombine.low %v2415_v3, %v2419_v4  ;;  %v2467_v63 = vld [vmem:[#allocation11 + $0x1230] sm:$0xff] }
 0x4a3   :  { %7459 = vmatprep.subr.bf16.mxu1 %v8983_v6  ;;  %v2420_v6 = vld [vmem:[#allocation11 + $0x10b8] sm:$0xff] }
 0x4a4   :  { %v9039_v25 = vcombine.high %v2416_v35, %v2420_v6  ;;  %v2464_v0 = vld [vmem:[#allocation11 + $0x1218] sm:$0xff] }
 0x4a5   :  { %7214 = vmatpush1.bf16.msra.mxu0 %v8980_v11  ;;  %v2423_v11 = vld [vmem:[#allocation11 + $0x10d0] sm:$0xff] }
 0x4a6   :  { %7460 = vmatpush1.bf16.msra.mxu1 %v8982_v12  ;;  %7215 = vmatprep.subr.bf16.mxu0 %v8989_v22  ;;  %v2427_v12 = vld [vmem:[#allocation11 + $0x10f0] sm:$0xff]  ;;  %v2424_v22 = vld [vmem:[#allocation11 + $0x10d8] sm:$0xff] }
 0x4a7   :  { %7461 = vmatprep.subr.bf16.mxu1 %v8991_v31  ;;  %v2428_v31 = vld [vmem:[#allocation11 + $0x10f8] sm:$0xff]  ;;  %v9045_v33 = vcombine.high %v2423_v11, %v2427_v12 }
 0x4a8   :  { %v9047_v37 = vcombine.high %v2424_v22, %v2428_v31 }
 0x4a9   :  { %7216 = vmatpush1.bf16.msra.mxu0 %v8988_v21  ;;  %v2435_v21 = vld [vmem:[#allocation11 + $0x1130] sm:$0xff] }
 0x4aa   :  { %7462 = vmatpush1.bf16.msra.mxu1 %v8990_v46  ;;  %7217 = vmatprep.subr.bf16.mxu0 %v8997_v39  ;;  %v2432_v46 = vld [vmem:[#allocation11 + $0x1118] sm:$0xff]  ;;  %v9053_v18 = vcombine.high %v2431_v42, %v2435_v21 }
 0x4ab   :  { %7463 = vmatprep.subr.bf16.mxu1 %v8999_v40  ;;  %v2436_v39 = vld [vmem:[#allocation11 + $0x1138] sm:$0xff]  ;;  %v9046_v40 = vcombine.low %v2424_v22, %v2428_v31  ;;  %v2479_v22 = vld [vmem:[#allocation11 + $0x1290] sm:$0xff] }
 0x4ac   :  { %v9055_v52 = vcombine.high %v2432_v46, %v2436_v39  ;;  %v2483_v31 = vld [vmem:[#allocation11 + $0x12b0] sm:$0xff] }
 0x4ad   :  { %7218 = vmatpush1.bf16.msra.mxu0 %v8996_v44  ;;  %v2440_v44 = vld [vmem:[#allocation11 + $0x1158] sm:$0xff] }
 0x4ae   :  { %7464 = vmatpush1.bf16.msra.mxu1 %v8998_v17  ;;  %7219 = vmatprep.subr.bf16.mxu0 %v9005_v19  ;;  %v2444_v17 = vld [vmem:[#allocation11 + $0x1178] sm:$0xff]  ;;  %v9052_v19 = vcombine.low %v2431_v42, %v2435_v21  ;;  %v9101_v42 = vcombine.high %v2479_v22, %v2483_v31 }
 0x4af   :  { %7465 = vmatprep.subr.bf16.mxu1 %v9007_v20  ;;  %v9054_v20 = vcombine.low %v2432_v46, %v2436_v39  ;;  %v9063_v43 = vcombine.high %v2440_v44, %v2444_v17  ;;  %v2487_v46 = vld [vmem:[#allocation11 + $0x12d0] sm:$0xff] }
 0x4b0   :  { %v2491_v39 = vld [vmem:[#allocation11 + $0x12f0] sm:$0xff] }
 0x4b1   :  { %7220 = vmatpush1.bf16.msra.mxu0 %v9004_v38  ;;  %v2448_v38 = vld [vmem:[#allocation11 + $0x1198] sm:$0xff] }
 0x4b2   :  { %7466 = vmatpush1.bf16.msra.mxu1 %v9006_v41  ;;  %7221 = vmatprep.subr.bf16.mxu0 %v9013_v49  ;;  %v2452_v41 = vld [vmem:[#allocation11 + $0x11b8] sm:$0xff]  ;;  %v9060_v49 = vcombine.low %v2439_v16, %v2443_v62  ;;  %v9109_v16 = vcombine.high %v2487_v46, %v2491_v39 }
 0x4b3   :  { %7467 = vmatprep.subr.bf16.mxu1 %v9015_v48  ;;  %v9062_v48 = vcombine.low %v2440_v44, %v2444_v17  ;;  %v9071_v14 = vcombine.high %v2448_v38, %v2452_v41  ;;  %v2495_v44 = vld [vmem:[#allocation11 + $0x1310] sm:$0xff] }
 0x4b4   :  { %v2499_v17 = vld [vmem:[#allocation11 + $0x1330] sm:$0xff] }
 0x4b5   :  { %7222 = vmatpush1.bf16.msra.mxu0 %v9012_v57  ;;  %v2456_v57 = vld [vmem:[#allocation11 + $0x11d8] sm:$0xff] }
 0x4b6   :  { %7468 = vmatpush1.bf16.msra.mxu1 %v9014_v51  ;;  %7232 = vmatprep.subr.bf16.mxu0 %v9021_v53  ;;  %v2460_v51 = vld [vmem:[#allocation11 + $0x11f8] sm:$0xff]  ;;  %v9068_v53 = vcombine.low %v2447_v47, %v2451_v61  ;;  %v9117_v47 = vcombine.high %v2495_v44, %v2499_v17 }
 0x4b7   :  { %7478 = vmatprep.subr.bf16.mxu1 %v9023_v45  ;;  %v9070_v45 = vcombine.low %v2448_v38, %v2452_v41  ;;  %v9079_v56 = vcombine.high %v2456_v57, %v2460_v51  ;;  %v9078_v3 = vcombine.low %v2456_v57, %v2460_v51  ;;  %v2503_v38 = vld [vmem:[#allocation11 + $0x1350] sm:$0xff] }
 0x4b8   :  { %7224 = vmatmul.mubr.bf16.vlgmr.msra.gmra.mrb[16].mxu0 %v10452_v15  ;;  %v2507_v41 = vld [vmem:[#allocation11 + $0x1370] sm:$0xff] }
 0x4b9   :  { %7470 = vmatmul.mubr.bf16.vlgmr.msra.gmra.mrb[16].mxu1 %v10452_v15  ;;  %7233 = vmatpush1.bf16.msra.mxu0 %v9020_v59  ;;  %v9038_v15 = vcombine.low %v2416_v35, %v2420_v6  ;;  %v2463_v59 = vld [vmem:[#allocation11 + $0x1210] sm:$0xff] }
 0x4ba   :  { %7264 = vmatprep.mubr.bf16.mxu0 %v10510_v13  ;;  %7479 = vmatpush1.bf16.msra.mxu1 %v9022_v1  ;;  %v2468_v1 = vld [vmem:[#allocation11 + $0x1238] sm:$0xff]  ;;  %v9085_v4 = vcombine.high %v2463_v59, %v2467_v63  ;;  %v2471_v35 = vld [vmem:[#allocation11 + $0x1250] sm:$0xff] }
 0x4bb   :  { %7510 = vmatprep.mubr.bf16.mxu1 %v10510_v13  ;;  %7234 = vmatprep.subr.bf16.mxu0 %v9029_v2  ;;  %v9044_v13 = vcombine.low %v2423_v11, %v2427_v12  ;;  %v9076_v2 = vcombine.low %v2455_v10, %v2459_v29  ;;  %v2475_v6 = vld [vmem:[#allocation11 + $0x1270] sm:$0xff]  ;;  %v9125_v10 = vcombine.high %v2503_v38, %v2507_v41 }
 0x4bc   :  { %7480 = vmatprep.subr.bf16.mxu1 %v9031_v5  ;;  %v9087_v5 = vcombine.high %v2464_v0, %v2468_v1  ;;  %v9093_v11 = vcombine.high %v2471_v35, %v2475_v6  ;;  %v2511_v57 = vld [vmem:[#allocation11 + $0x1390] sm:$0xff] }
 0x4bd   :  { %7235 = vmatpush1.bf16.msra.mxu0 %v9028_v9  ;;  %v2472_v9 = vld [vmem:[#allocation11 + $0x1258] sm:$0xff]  ;;  %v2515_v51 = vld [vmem:[#allocation11 + $0x13b0] sm:$0xff] }
 0x4be   :  { %7481 = vmatpush1.bf16.msra.mxu1 %v9030_v54  ;;  %7236 = vmatprep.subr.bf16.mxu0 %v9037_v8  ;;  %v2476_v54 = vld [vmem:[#allocation11 + $0x1278] sm:$0xff]  ;;  %v9084_v8 = vcombine.low %v2463_v59, %v2467_v63  ;;  %v9133_v59 = vcombine.high %v2511_v57, %v2515_v51 }
 0x4bf   :  { %7482 = vmatprep.subr.bf16.mxu1 %v9039_v25  ;;  %v9086_v25 = vcombine.low %v2464_v0, %v2468_v1  ;;  %v9095_v12 = vcombine.high %v2472_v9, %v2476_v54  ;;  %v2519_v0 = vld [vmem:[#allocation11 + $0x13d0] sm:$0xff] }
 0x4c0   :  { %v2523_v1 = vld [vmem:[#allocation11 + $0x13f0] sm:$0xff] }
 0x4c1   :  { %7237 = vmatpush1.bf16.msra.mxu0 %v9036_v32  ;;  %v2480_v32 = vld [vmem:[#allocation11 + $0x1298] sm:$0xff] }
 0x4c2   :  { %7483 = vmatpush1.bf16.msra.mxu1 %v9038_v15  ;;  %7238 = vmatprep.subr.bf16.mxu0 %v9045_v33  ;;  %v2484_v15 = vld [vmem:[#allocation11 + $0x12b8] sm:$0xff]  ;;  %v9092_v33 = vcombine.low %v2471_v35, %v2475_v6  ;;  %v9141_v35 = vcombine.high %v2519_v0, %v2523_v1 }
 0x4c3   :  { %7484 = vmatprep.subr.bf16.mxu1 %v9047_v37  ;;  %v9094_v37 = vcombine.low %v2472_v9, %v2476_v54  ;;  %v9103_v21 = vcombine.high %v2480_v32, %v2484_v15  ;;  %v2527_v9 = vld [vmem:[#allocation11 + $0x1410] sm:$0xff] }
 0x4c4   :  { %v2531_v54 = vld [vmem:[#allocation11 + $0x1430] sm:$0xff] }
 0x4c5   :  { %7239 = vmatpush1.bf16.msra.mxu0 %v9044_v13  ;;  %v2488_v13 = vld [vmem:[#allocation11 + $0x12d8] sm:$0xff] }
 0x4c6   :  { %7485 = vmatpush1.bf16.msra.mxu1 %v9046_v40  ;;  %7240 = vmatprep.subr.bf16.mxu0 %v9053_v18  ;;  %v2492_v40 = vld [vmem:[#allocation11 + $0x12f8] sm:$0xff]  ;;  %v9100_v18 = vcombine.low %v2479_v22, %v2483_v31  ;;  %v9149_v22 = vcombine.high %v2527_v9, %v2531_v54 }
 0x4c7   :  { %7486 = vmatprep.subr.bf16.mxu1 %v9055_v52  ;;  %v9102_v52 = vcombine.low %v2480_v32, %v2484_v15  ;;  %v9111_v62 = vcombine.high %v2488_v13, %v2492_v40  ;;  %v2535_v32 = vld [vmem:[#allocation11 + $0x1450] sm:$0xff] }
 0x4c8   :  { %v2539_v15 = vld [vmem:[#allocation11 + $0x1470] sm:$0xff] }
 0x4c9   :  { %7241 = vmatpush1.bf16.msra.mxu0 %v9052_v19  ;;  %v2496_v19 = vld [vmem:[#allocation11 + $0x1318] sm:$0xff] }
 0x4ca   :  { %7487 = vmatpush1.bf16.msra.mxu1 %v9054_v20  ;;  %7242 = vmatprep.subr.bf16.mxu0 %v9061_v23  ;;  %v2500_v20 = vld [vmem:[#allocation11 + $0x1338] sm:$0xff]  ;;  %v9108_v23 = vcombine.low %v2487_v46, %v2491_v39  ;;  %v9157_v46 = vcombine.high %v2535_v32, %v2539_v15  ;;  %v2543_v39 = vld [vmem:[#allocation11 + $0x1490] sm:$0xff] }
 0x4cb   :  { %7488 = vmatprep.subr.bf16.mxu1 %v9063_v43  ;;  %v9110_v43 = vcombine.low %v2488_v13, %v2492_v40  ;;  %v9119_v61 = vcombine.high %v2496_v19, %v2500_v20  ;;  %v2547_v13 = vld [vmem:[#allocation11 + $0x14b0] sm:$0xff] }
 0x4cd   :  { %7243 = vmatpush1.bf16.msra.mxu0 %v9060_v49  ;;  %v2504_v49 = vld [vmem:[#allocation11 + $0x1358] sm:$0xff] }
 0x4ce   :  { %7489 = vmatpush1.bf16.msra.mxu1 %v9062_v48  ;;  %7244 = vmatprep.subr.bf16.mxu0 %v9069_v50  ;;  %v2508_v48 = vld [vmem:[#allocation11 + $0x1378] sm:$0xff]  ;;  %v9116_v50 = vcombine.low %v2495_v44, %v2499_v17  ;;  %v9165_v44 = vcombine.high %v2543_v39, %v2547_v13 }
 0x4cf   :  { %7490 = vmatprep.subr.bf16.mxu1 %v9071_v14  ;;  %v9118_v14 = vcombine.low %v2496_v19, %v2500_v20  ;;  %v9127_v29 = vcombine.high %v2504_v49, %v2508_v48  ;;  %v2551_v19 = vld [vmem:[#allocation11 + $0x14d0] sm:$0xff] }
 0x4d0   :  { %v2555_v20 = vld [vmem:[#allocation11 + $0x14f0] sm:$0xff] }
 0x4d1   :  { %7245 = vmatpush1.bf16.msra.mxu0 %v9068_v53  ;;  %v2512_v53 = vld [vmem:[#allocation11 + $0x1398] sm:$0xff] }
 0x4d2   :  { %7491 = vmatpush1.bf16.msra.mxu1 %v9070_v45  ;;  %7246 = vmatprep.subr.bf16.mxu0 %v9077_v60  ;;  %v2516_v45 = vld [vmem:[#allocation11 + $0x13b8] sm:$0xff]  ;;  %v9124_v60 = vcombine.low %v2503_v38, %v2507_v41  ;;  %v2559_v41 = vld [vmem:[#allocation11 + $0x1510] sm:$0xff] }
 0x4d3   :  { %7492 = vmatprep.subr.bf16.mxu1 %v9079_v56  ;;  %v9126_v56 = vcombine.low %v2504_v49, %v2508_v48  ;;  %v9135_v63 = vcombine.high %v2512_v53, %v2516_v45  ;;  %v2563_v49 = vld [vmem:[#allocation11 + $0x1530] sm:$0xff]  ;;  %v2560_v48 = vld [vmem:[#allocation11 + $0x1518] sm:$0xff] }
 0x4d5   :  { %7247 = vmatpush1.bf16.msra.mxu0 %v9076_v2  ;;  %v2520_v2 = vld [vmem:[#allocation11 + $0x13d8] sm:$0xff] }
 0x4d6   :  { %7493 = vmatpush1.bf16.msra.mxu1 %v9078_v3  ;;  %7248 = vmatprep.subr.bf16.mxu0 %v9085_v4  ;;  %v2524_v3 = vld [vmem:[#allocation11 + $0x13f8] sm:$0xff]  ;;  %v9132_v4 = vcombine.low %v2511_v57, %v2515_v51  ;;  %v2567_v57 = vld [vmem:[#allocation11 + $0x1550] sm:$0xff] }
 0x4d7   :  { %7494 = vmatprep.subr.bf16.mxu1 %v9087_v5  ;;  %v9134_v5 = vcombine.low %v2512_v53, %v2516_v45  ;;  %v9143_v6 = vcombine.high %v2520_v2, %v2524_v3  ;;  %v2571_v51 = vld [vmem:[#allocation11 + $0x1570] sm:$0xff]  ;;  %v2568_v53 = vld [vmem:[#allocation11 + $0x1558] sm:$0xff] }
 0x4d8   :  { %v2572_v45 = vld [vmem:[#allocation11 + $0x1578] sm:$0xff] }
 0x4d9   :  { %7249 = vmatpush1.bf16.msra.mxu0 %v9084_v8  ;;  %v2528_v8 = vld [vmem:[#allocation11 + $0x1418] sm:$0xff] }
 0x4da   :  { %7495 = vmatpush1.bf16.msra.mxu1 %v9086_v25  ;;  %7250 = vmatprep.subr.bf16.mxu0 %v9093_v11  ;;  %v2532_v25 = vld [vmem:[#allocation11 + $0x1438] sm:$0xff]  ;;  %v9140_v11 = vcombine.low %v2519_v0, %v2523_v1  ;;  %v2575_v0 = vld [vmem:[#allocation11 + $0x1590] sm:$0xff] }
 0x4db   :  { %7496 = vmatprep.subr.bf16.mxu1 %v9095_v12  ;;  %v9142_v12 = vcombine.low %v2520_v2, %v2524_v3  ;;  %v9151_v31 = vcombine.high %v2528_v8, %v2532_v25  ;;  %v2579_v1 = vld [vmem:[#allocation11 + $0x15b0] sm:$0xff]  ;;  %v2576_v2 = vld [vmem:[#allocation11 + $0x1598] sm:$0xff] }
 0x4dc   :  { %v2580_v3 = vld [vmem:[#allocation11 + $0x15b8] sm:$0xff] }
 0x4dd   :  { %7251 = vmatpush1.bf16.msra.mxu0 %v9092_v33  ;;  %v9148_v33 = vcombine.low %v2527_v9, %v2531_v54  ;;  %v2583_v9 = vld [vmem:[#allocation11 + $0x15d0] sm:$0xff] }
 0x4de   :  { %7497 = vmatpush1.bf16.msra.mxu1 %v9094_v37  ;;  %7252 = vmatprep.subr.bf16.mxu0 %v9101_v42  ;;  %v2536_v37 = vld [vmem:[#allocation11 + $0x1458] sm:$0xff]  ;;  %v2587_v54 = vld [vmem:[#allocation11 + $0x15f0] sm:$0xff] }
 0x4df   :  { %7498 = vmatprep.subr.bf16.mxu1 %v9103_v21  ;;  %v2540_v42 = vld [vmem:[#allocation11 + $0x1478] sm:$0xff]  ;;  %v9150_v21 = vcombine.low %v2528_v8, %v2532_v25 }
 0x4e0   :  { %v9159_v40 = vcombine.high %v2536_v37, %v2540_v42  ;;  %v2584_v8 = vld [vmem:[#allocation11 + $0x15d8] sm:$0xff] }
 0x4e1   :  { %7253 = vmatpush1.bf16.msra.mxu0 %v9100_v18  ;;  %v2544_v18 = vld [vmem:[#allocation11 + $0x1498] sm:$0xff] }
 0x4e2   :  { %7499 = vmatpush1.bf16.msra.mxu1 %v9102_v52  ;;  %7254 = vmatprep.subr.bf16.mxu0 %v9109_v16  ;;  %v2548_v52 = vld [vmem:[#allocation11 + $0x14b8] sm:$0xff]  ;;  %v9156_v16 = vcombine.low %v2535_v32, %v2539_v15  ;;  %v2591_v32 = vld [vmem:[#allocation11 + $0x1610] sm:$0xff] }
 0x4e3   :  { %7500 = vmatprep.subr.bf16.mxu1 %v9111_v62  ;;  %v9158_v62 = vcombine.low %v2536_v37, %v2540_v42  ;;  %v9167_v17 = vcombine.high %v2544_v18, %v2548_v52  ;;  %v2588_v25 = vld [vmem:[#allocation11 + $0x15f8] sm:$0xff]  ;;  %v2595_v15 = vld [vmem:[#allocation11 + $0x1630] sm:$0xff]  ;;  %v9204_v42 = vcombine.low %v2583_v9, %v2587_v54 }
 0x4e4   :  { %v2596_v37 = vld [vmem:[#allocation11 + $0x1638] sm:$0xff] }
 0x4e5   :  { %7255 = vmatpush1.bf16.msra.mxu0 %v9108_v23  ;;  %v2552_v23 = vld [vmem:[#allocation11 + $0x14d8] sm:$0xff] }
 0x4e6   :  { %7501 = vmatpush1.bf16.msra.mxu1 %v9110_v43  ;;  %7256 = vmatprep.subr.bf16.mxu0 %v9117_v47  ;;  %v2556_v43 = vld [vmem:[#allocation11 + $0x14f8] sm:$0xff]  ;;  %v9164_v47 = vcombine.low %v2543_v39, %v2547_v13  ;;  %v2599_v13 = vld [vmem:[#allocation11 + $0x1650] sm:$0xff] }
 0x4e7   :  { %7502 = vmatprep.subr.bf16.mxu1 %v9119_v61  ;;  %v9173_v61 = vcombine.high %v2551_v19, %v2555_v20  ;;  %v9175_v38 = vcombine.high %v2552_v23, %v2556_v43 }
 0x4e9   :  { %7257 = vmatpush1.bf16.msra.mxu0 %v9116_v50  ;;  %v2564_v50 = vld [vmem:[#allocation11 + $0x1538] sm:$0xff] }
 0x4ea   :  { %7503 = vmatpush1.bf16.msra.mxu1 %v9118_v14  ;;  %7258 = vmatprep.subr.bf16.mxu0 %v9125_v10  ;;  %v9174_v14 = vcombine.low %v2552_v23, %v2556_v43  ;;  %v9181_v10 = vcombine.high %v2559_v41, %v2563_v49  ;;  %v2608_v23 = vld [vmem:[#allocation11 + $0x1698] sm:$0xff] }
 0x4eb   :  { %7504 = vmatprep.subr.bf16.mxu1 %v9127_v29  ;;  %v9183_v29 = vcombine.high %v2560_v48, %v2564_v50  ;;  %v2612_v43 = vld [vmem:[#allocation11 + $0x16b8] sm:$0xff] }
 0x4ed   :  { %7259 = vmatpush1.bf16.msra.mxu0 %v9124_v60  ;;  %v9180_v60 = vcombine.low %v2559_v41, %v2563_v49  ;;  %v2615_v41 = vld [vmem:[#allocation11 + $0x16d0] sm:$0xff] }
 0x4ee   :  { %7505 = vmatpush1.bf16.msra.mxu1 %v9126_v56  ;;  %7260 = vmatprep.subr.bf16.mxu0 %v9133_v59  ;;  %v9182_v56 = vcombine.low %v2560_v48, %v2564_v50  ;;  %v9189_v59 = vcombine.high %v2567_v57, %v2571_v51  ;;  %v2619_v49 = vld [vmem:[#allocation11 + $0x16f0] sm:$0xff]  ;;  %v2616_v48 = vld [vmem:[#allocation11 + $0x16d8] sm:$0xff] }
 0x4ef   :  { %7506 = vmatprep.subr.bf16.mxu1 %v9135_v63  ;;  %v9191_v63 = vcombine.high %v2568_v53, %v2572_v45  ;;  %v2620_v50 = vld [vmem:[#allocation11 + $0x16f8] sm:$0xff] }
 0x4f1   :  { %7261 = vmatpush1.bf16.msra.mxu0 %v9132_v4  ;;  %v9188_v4 = vcombine.low %v2567_v57, %v2571_v51  ;;  %v2623_v57 = vld [vmem:[#allocation11 + $0x1710] sm:$0xff] }
 0x4f2   :  { %7507 = vmatpush1.bf16.msra.mxu1 %v9134_v5  ;;  %7262 = vmatprep.subr.bf16.mxu0 %v9141_v35  ;;  %v9190_v5 = vcombine.low %v2568_v53, %v2572_v45  ;;  %v9197_v35 = vcombine.high %v2575_v0, %v2579_v1  ;;  %v2627_v51 = vld [vmem:[#allocation11 + $0x1730] sm:$0xff]  ;;  %v2624_v53 = vld [vmem:[#allocation11 + $0x1718] sm:$0xff] }
 0x4f3   :  { %7508 = vmatprep.subr.bf16.mxu1 %v9143_v6  ;;  %v9199_v6 = vcombine.high %v2576_v2, %v2580_v3  ;;  %v2628_v45 = vld [vmem:[#allocation11 + $0x1738] sm:$0xff] }
 0x4f5   :  { %7263 = vmatpush1.bf16.msra.mxu0 %v9140_v11  ;;  %v9196_v11 = vcombine.low %v2575_v0, %v2579_v1  ;;  %v2631_v0 = vld [vmem:[#allocation11 + $0x1750] sm:$0xff] }
 0x4f6   :  { %7509 = vmatpush1.bf16.msra.mxu1 %v9142_v12  ;;  %7273 = vmatprep.subr.bf16.mxu0 %v9149_v22  ;;  %v9198_v12 = vcombine.low %v2576_v2, %v2580_v3  ;;  %v9205_v22 = vcombine.high %v2583_v9, %v2587_v54  ;;  %v2635_v1 = vld [vmem:[#allocation11 + $0x1770] sm:$0xff]  ;;  %v2632_v2 = vld [vmem:[#allocation11 + $0x1758] sm:$0xff] }
 0x4f7   :  { %7519 = vmatprep.subr.bf16.mxu1 %v9151_v31  ;;  %v9207_v31 = vcombine.high %v2584_v8, %v2588_v25  ;;  %v2636_v3 = vld [vmem:[#allocation11 + $0x1778] sm:$0xff]  ;;  %v2639_v9 = vld [vmem:[#allocation11 + $0x1790] sm:$0xff] }
 0x4f8   :  { %7265 = vmatmul.mubr.bf16.vlgmr.msra.gmra.mrb[16].mxu0 %v10512_v58  ;;  %v2643_v54 = vld [vmem:[#allocation11 + $0x17b0] sm:$0xff] }
 0x4f9   :  { %7511 = vmatmul.mubr.bf16.vlgmr.msra.gmra.mrb[16].mxu1 %v10512_v58  ;;  %7274 = vmatpush1.bf16.msra.mxu0 %v9148_v33  ;;  %v9166_v58 = vcombine.low %v2544_v18, %v2548_v52  ;;  %v2592_v33 = vld [vmem:[#allocation11 + $0x1618] sm:$0xff] }
 0x4fa   :  { %7305 = vmatprep.mubr.bf16.mxu0 %v10524_v36  ;;  %7520 = vmatpush1.bf16.msra.mxu1 %v9150_v21  ;;  %v9206_v21 = vcombine.low %v2584_v8, %v2588_v25  ;;  %v9215_v39 = vcombine.high %v2592_v33, %v2596_v37  ;;  %v2600_v18 = vld [vmem:[#allocation11 + $0x1658] sm:$0xff] }
 0x4fb   :  { %7551 = vmatprep.mubr.bf16.mxu1 %v10524_v36  ;;  %7275 = vmatprep.subr.bf16.mxu0 %v9157_v46  ;;  %v9172_v36 = vcombine.low %v2551_v19, %v2555_v20  ;;  %v9213_v46 = vcombine.high %v2591_v32, %v2595_v15  ;;  %v2604_v52 = vld [vmem:[#allocation11 + $0x1678] sm:$0xff]  ;;  %v2607_v19 = vld [vmem:[#allocation11 + $0x1690] sm:$0xff] }
 0x4fc   :  { %7521 = vmatprep.subr.bf16.mxu1 %v9159_v40  ;;  %v2603_v40 = vld [vmem:[#allocation11 + $0x1670] sm:$0xff]  ;;  %v2640_v8 = vld [vmem:[#allocation11 + $0x1798] sm:$0xff] }
 0x4fd   :  { %7276 = vmatpush1.bf16.msra.mxu0 %v9156_v16  ;;  %v9212_v16 = vcombine.low %v2591_v32, %v2595_v15  ;;  %v2611_v20 = vld [vmem:[#allocation11 + $0x16b0] sm:$0xff]  ;;  %v2644_v25 = vld [vmem:[#allocation11 + $0x17b8] sm:$0xff]  ;;  %v9261_v32 = vcombine.high %v2639_v9, %v2643_v54 }
 0x4fe   :  { %7522 = vmatpush1.bf16.msra.mxu1 %v9158_v62  ;;  %7277 = vmatprep.subr.bf16.mxu0 %v9165_v44  ;;  %v9214_v62 = vcombine.low %v2592_v33, %v2596_v37  ;;  %v9221_v44 = vcombine.high %v2599_v13, %v2603_v40  ;;  %v9263_v15 = vcombine.high %v2640_v8, %v2644_v25  ;;  %v2647_v33 = vld [vmem:[#allocation11 + $0x17d0] sm:$0xff] }
 0x4ff   :  { %7523 = vmatprep.subr.bf16.mxu1 %v9167_v17  ;;  %v9223_v17 = vcombine.high %v2600_v18, %v2604_v52  ;;  %v2651_v37 = vld [vmem:[#allocation11 + $0x17f0] sm:$0xff] }
 0x501   :  { %7278 = vmatpush1.bf16.msra.mxu0 %v9164_v47  ;;  %v9220_v47 = vcombine.low %v2599_v13, %v2603_v40  ;;  %v9260_v13 = vcombine.low %v2639_v9, %v2643_v54  ;;  %v9262_v40 = vcombine.low %v2640_v8, %v2644_v25  ;;  %v9876_v9 = vld [vmem:[#allocation13 + $0x78] sm:$0xff]  }
 0x502   :  { %7524 = vmatpush1.bf16.msra.mxu1 %v9166_v58  ;;  %7279 = vmatprep.subr.bf16.mxu0 %v9173_v61  ;;  %v9222_v58 = vcombine.low %v2600_v18, %v2604_v52  ;;  %v9229_v61 = vcombine.high %v2607_v19, %v2611_v20  ;;  %v9269_v18 = vcombine.high %v2647_v33, %v2651_v37  ;;  %v9878_v8 = vld [vmem:[#allocation13 + $0x38] sm:$0xff]  }
 0x503   :  { %7525 = vmatprep.subr.bf16.mxu1 %v9175_v38  ;;  %v9231_v38 = vcombine.high %v2608_v23, %v2612_v43 }
 0x505   :  { %7280 = vmatpush1.bf16.msra.mxu0 %v9172_v36  ;;  %v9228_v36 = vcombine.low %v2607_v19, %v2611_v20  ;;  %v9849_v19 = vld [vmem:[#allocation13 + $0xc0] sm:$0xff]  }
 0x506   :  { %7526 = vmatpush1.bf16.msra.mxu1 %v9174_v14  ;;  %7281 = vmatprep.subr.bf16.mxu0 %v9181_v10  ;;  %v9230_v14 = vcombine.low %v2608_v23, %v2612_v43  ;;  %v9237_v10 = vcombine.high %v2615_v41, %v2619_v49  ;;  %v9850_v43 = vld [vmem:[#allocation13] sm:$0xff]  }
 0x507   :  { %7527 = vmatprep.subr.bf16.mxu1 %v9183_v29  ;;  %v9239_v29 = vcombine.high %v2616_v48, %v2620_v50 }
 0x509   :  { %7282 = vmatpush1.bf16.msra.mxu0 %v9180_v60  ;;  %v9236_v60 = vcombine.low %v2615_v41, %v2619_v49  ;;  %v9855_v41 = vld [vmem:[#allocation13 + $0x88] sm:$0xff]   ;;  %v9856_v49 = vld [vmem:[#allocation13 + $0x50] sm:$0xff]  }
 0x50a   :  { %7528 = vmatpush1.bf16.msra.mxu1 %v9182_v56  ;;  %7283 = vmatprep.subr.bf16.mxu0 %v9189_v59  ;;  %v9238_v56 = vcombine.low %v2616_v48, %v2620_v50  ;;  %v9245_v59 = vcombine.high %v2623_v57, %v2627_v51  ;;  %v9857_v48 = vld [vmem:[#allocation13 + $0xd0] sm:$0xff]  }
 0x50b   :  { %7529 = vmatprep.subr.bf16.mxu1 %v9191_v63  ;;  %v9247_v63 = vcombine.high %v2624_v53, %v2628_v45  ;;  %v9858_v50 = vld [vmem:[#allocation13 + $0x10] sm:$0xff]  }
 0x50d   :  { %7284 = vmatpush1.bf16.msra.mxu0 %v9188_v4  ;;  %v9244_v4 = vcombine.low %v2623_v57, %v2627_v51  ;;  %v9864_v57 = vld [vmem:[#allocation13 + $0x60] sm:$0xff]  }
 0x50e   :  { %7530 = vmatpush1.bf16.msra.mxu1 %v9190_v5  ;;  %7285 = vmatprep.subr.bf16.mxu0 %v9197_v35  ;;  %v9246_v5 = vcombine.low %v2624_v53, %v2628_v45  ;;  %v9253_v35 = vcombine.high %v2631_v0, %v2635_v1  ;;  %v9865_v51 = vld [vmem:[#allocation13 + $0xe0] sm:$0xff]  }
 0x50f   :  { %7531 = vmatprep.subr.bf16.mxu1 %v9199_v6  ;;  %v9255_v6 = vcombine.high %v2632_v2, %v2636_v3  ;;  %v9866_v53 = vld [vmem:[#allocation13 + $0x20] sm:$0xff]  }
 0x510   :  { %v9867_v45 = vld [vmem:[#allocation13 + $0xa0] sm:$0xff]  }
 0x511   :  { %7286 = vmatpush1.bf16.msra.mxu0 %v9196_v11  ;;  %v10572_v11 = vld [vmem:[#allocation14] sm:$0xff] }
 0x512   :  { %7532 = vmatpush1.bf16.msra.mxu1 %v9198_v12  ;;  %7287 = vmatprep.subr.bf16.mxu0 %v9205_v22  ;;  %v2668_v12 = vsub.s32 3, %v10348_v27  ;;  %v9252_v22 = vcombine.low %v2631_v0, %v2635_v1  ;;  %v2657_v0 = vrot.slane %v10572_v11, %v10351_v28  ;;  %v9871_v1 = vld [vmem:[#allocation13 + $0xa8] sm:$0xff]   ;;  %v9877_v28 = vld [vmem:[#allocation13 + $0xf8] sm:$0xff]  }
 0x513   :  { %7533 = vmatprep.subr.bf16.mxu1 %v9207_v31  ;;  %v9254_v31 = vcombine.low %v2632_v2, %v2636_v3  ;;  %v9872_v2 = vld [vmem:[#allocation13 + $0x70] sm:$0xff]  }
 0x515   :  { %7288 = vmatpush1.bf16.msra.mxu0 %v9204_v42  ;;  %v2661_v42 = vrot.slane %v10572_v11, %v10354_v30 }
 0x516   :  { %7534 = vmatpush1.bf16.msra.mxu1 %v9206_v21  ;;  %7289 = vmatprep.subr.bf16.mxu0 %v9213_v46  ;;  %v2648_v21 = vld [vmem:[#allocation11 + $0x17d8] sm:$0xff] }
 0x517   :  { %7535 = vmatprep.subr.bf16.mxu1 %v9215_v39  ;;  %v2652_v46 = vld [vmem:[#allocation11 + $0x17f8] sm:$0xff]  ;;  %v2669_v39 = vrot.slane %v10572_v11, %v2668_v12 }
 0x518   :  { %v9271_v52 = vcombine.high %v2648_v21, %v2652_v46  ;;  %v9270_v30 = vcombine.low %v2648_v21, %v2652_v46  ;;  %v9879_v12 = vld [vmem:[#allocation13 + $0xb8] sm:$0xff]   ;;  %v9886_v21 = vld [vmem:[#allocation13 + $0x108] sm:$0xff]  }
 0x519   :  { %7290 = vmatpush1.bf16.msra.mxu0 %v9212_v16  ;;  %v9446_v16 = vadd.f32 %v10560_v34, %v2661_v42  ;;  %v9885_v42 = vld [vmem:[#allocation13 + $0x1c8] sm:$0xff]  }
 0x51a   :  { %7536 = vmatpush1.bf16.msra.mxu1 %v9214_v62  ;;  %7291 = vmatprep.subr.bf16.mxu0 %v9221_v44  ;;  %v9448_v62 = vadd.f32 %v10562_v55, %v2669_v39  ;;  %v9268_v44 = vcombine.low %v2647_v33, %v2651_v37  ;;  %v9853_v55 = vld [vmem:[#allocation13 + $0xc8] sm:$0xff]   ;;  %v9883_v33 = vld [vmem:[#allocation13 + $0x180] sm:$0xff]   ;;  %v9888_v39 = vld [vmem:[#allocation13 + $0x150] sm:$0xff]  }
 0x51b   :  { %7537 = vmatprep.subr.bf16.mxu1 %v9223_v17  ;;  %v9848_v17 = vld [vmem:[#allocation13 + $0x40] sm:$0xff]   ;;  %v7561_v20 = vmax.f32 %v9446_v16, 0.0  ;;  %v9884_v37 = vld [vmem:[#allocation13 + $0x148] sm:$0xff]   ;;  %v9893_v16 = vld [vmem:[#allocation13 + $0x1d8] sm:$0xff]  }
 0x51c   :  { %v7563_v23 = vmax.f32 %v9448_v62, 0.0  ;;  %v9887_v46 = vld [vmem:[#allocation13 + $0x188] sm:$0xff]   ;;  %v9894_v62 = vld [vmem:[#allocation13 + $0x118] sm:$0xff]  }
 0x51d   :  { %7292 = vmatpush1.bf16.msra.mxu0 %v9220_v47  ;;  %v9851_v47 = vld [vmem:[#allocation13 + $0x80] sm:$0xff]   ;;  %v7569_v34 = vpack.c.bf16 %v7561_v20, %v7561_v20 }
 0x51e   :  { %7538 = vmatpush1.bf16.msra.mxu1 %v9222_v58  ;;  %7293 = vmatprep.subr.bf16.mxu0 %v9229_v61  ;;  %v9852_v58 = vld [vmem:[#allocation13 + $0x48] sm:$0xff]   ;;  %v7571_v61 = vpack.c.bf16 %v7563_v23, %v7563_v23  ;;  %v9899_v20 = vld [vmem:[#allocation13 + $0x1a0] sm:$0xff]  }
 0x51f   :  { %7539 = vmatprep.subr.bf16.mxu1 %v9231_v38  ;;  %v9854_v38 = vld [vmem:[#allocation13 + $0x8] sm:$0xff]  }
 0x520   :  { %v9900_v23 = vld [vmem:[#allocation13 + $0x168] sm:$0xff]  }
 0x521   :  { %7294 = vmatpush1.bf16.msra.mxu0 %v9228_v36  ;;  %v9859_v36 = vld [vmem:[#allocation13 + $0x90] sm:$0xff]  }
 0x522   :  { %7540 = vmatpush1.bf16.msra.mxu1 %v9230_v14  ;;  %7295 = vmatprep.subr.bf16.mxu0 %v9237_v10  ;;  %v9860_v14 = vld [vmem:[#allocation13 + $0x58] sm:$0xff]  }
 0x523   :  { %7541 = vmatprep.subr.bf16.mxu1 %v9239_v29  ;;  %v9861_v10 = vld [vmem:[#allocation13 + $0xd8] sm:$0xff]  }
 0x524   :  { %v9863_v29 = vld [vmem:[#allocation13 + $0x98] sm:$0xff]  }
 0x525   :  { %7296 = vmatpush1.bf16.msra.mxu0 %v9236_v60  ;;  %v9868_v60 = vld [vmem:[#allocation13 + $0x68] sm:$0xff]  }
 0x526   :  { %7542 = vmatpush1.bf16.msra.mxu1 %v9238_v56  ;;  %7297 = vmatprep.subr.bf16.mxu0 %v9245_v59  ;;  %v2664_v56 = vsub.s32 2, %v10348_v27  ;;  %v9869_v59 = vld [vmem:[#allocation13 + $0xe8] sm:$0xff]  }
 0x527   :  { %7543 = vmatprep.subr.bf16.mxu1 %v9247_v63  ;;  %v9870_v63 = vld [vmem:[#allocation13 + $0x28] sm:$0xff]  }
 0x528   :  { %v2665_v3 = vrot.slane %v10572_v11, %v2664_v56 }
 0x529   :  { %7298 = vmatpush1.bf16.msra.mxu0 %v9244_v4  ;;  %v9873_v4 = vld [vmem:[#allocation13 + $0xf0] sm:$0xff]  }
 0x52a   :  { %7544 = vmatpush1.bf16.msra.mxu1 %v9246_v5  ;;  %7299 = vmatprep.subr.bf16.mxu0 %v9253_v35  ;;  %v9874_v5 = vld [vmem:[#allocation13 + $0x30] sm:$0xff]   ;;  %v9445_v35 = vadd.f32 %v10556_v24, %v2657_v0  ;;  %v9447_v54 = vadd.f32 %v10558_v26, %v2665_v3  ;;  %v9882_v24 = vld [vmem:[#allocation13 + $0x100] sm:$0xff]  }
 0x52b   :  { %7545 = vmatprep.subr.bf16.mxu1 %v9255_v6  ;;  %v9875_v6 = vld [vmem:[#allocation13 + $0xb0] sm:$0xff]  }
 0x52c   :  { %v7560_v25 = vmax.f32 %v9445_v35, 0.0 }
 0x52d   :  { %7300 = vmatpush1.bf16.msra.mxu0 %v9252_v22  ;;  %v9880_v22 = vld [vmem:[#allocation13 + $0x140] sm:$0xff]  }
 0x52e   :  { %7546 = vmatpush1.bf16.msra.mxu1 %v9254_v31  ;;  %7301 = vmatprep.subr.bf16.mxu0 %v9261_v32  ;;  %v7562_v31 = vmax.f32 %v9447_v54, 0.0  ;;  %v9881_v32 = vld [vmem:[#allocation13 + $0x1c0] sm:$0xff]  }
 0x52f   :  { %7547 = vmatprep.subr.bf16.mxu1 %v9263_v15  ;;  %v7568_v15 = vpack.c.bf16 %v7560_v25, %v7560_v25 }
 0x530   :  { %v7570_v26 = vpack.c.bf16 %v7562_v31, %v7562_v31  ;;  %v9272_v31 = vld [vmem:[#allocation14 + $0x8] ss:$0 sm:$0xff] }
 0x531   :  { %7302 = vmatpush1.bf16.msra.mxu0 %v9260_v13  ;;  %v9889_v13 = vld [vmem:[#allocation13 + $0x1d0] sm:$0xff]  }
 0x532   :  { %7548 = vmatpush1.bf16.msra.mxu1 %v9262_v40  ;;  %7303 = vmatprep.subr.bf16.mxu0 %v9269_v18  ;;  %v9890_v40 = vld [vmem:[#allocation13 + $0x110] sm:$0xff]  }
 0x533   :  { %7549 = vmatprep.subr.bf16.mxu1 %v9271_v52  ;;  %v9891_v18 = vld [vmem:[#allocation13 + $0x190] sm:$0xff]   ;;  %v9892_v52 = vld [vmem:[#allocation13 + $0x158] sm:$0xff]  }
 0x535   :  { %7304 = vmatpush1.bf16.msra.mxu0 %v9268_v44  ;;  %v9895_v44 = vld [vmem:[#allocation13 + $0x198] sm:$0xff]  }
 0x536   :  { %7550 = vmatpush1.bf16.msra.mxu1 %v9270_v30  ;;  %9357 = vmatprep.subr.bf16.mxu0 %v9848_v17  ;;  %v9896_v30 = vld [vmem:[#allocation13 + $0x160] sm:$0xff]  }
 0x537   :  { %9379 = vmatprep.subr.bf16.mxu1 %v9849_v19  ;;  %v9897_v17 = vld [vmem:[#allocation13 + $0x1e0] sm:$0xff]  }
 0x538   :  { %7306 = vmatmul.mubr.bf16.vlgmr.msra.gmra.mrb[16].mxu0 %v10538_v7  ;;  %v9898_v19 = vld [vmem:[#allocation13 + $0x120] sm:$0xff]  }
 0x539   :  { %7552 = vmatmul.mubr.bf16.vlgmr.msra.gmra.mrb[16].mxu1 %v10538_v7  ;;  %9358 = vmatpush3.bf16.msra.mxu0 %v9850_v43  ;;  %v9862_v7 = vld [vmem:[#allocation13 + $0x18] sm:$0xff]   ;;  %v9901_v43 = vld [vmem:[#allocation13 + $0x1e8] sm:$0xff]  }
 0x53a   :  { %8126 = vmatprep.mubr.bf16.mxu0 %v7569_v34  ;;  %9380 = vmatpush3.bf16.msra.mxu1 %v9851_v47  ;;  %v9902_v47 = vld [vmem:[#allocation13 + $0x128] sm:$0xff]   ;;  %v9904_v34 = vld [vmem:[#allocation13 + $0x170] sm:$0xff]  }
 0x53b   :  { %8166 = vmatprep.mubr.bf16.mxu1 %v7571_v61  ;;  %9359 = vmatprep.subr.bf16.mxu0 %v9852_v58  ;;  %v9903_v58 = vld [vmem:[#allocation13 + $0x1a8] sm:$0xff]   ;;  %v9906_v61 = vld [vmem:[#allocation13 + $0x130] sm:$0xff]  }
 0x53c   :  { %9381 = vmatprep.subr.bf16.mxu1 %v9853_v55  ;;  %v9905_v55 = vld [vmem:[#allocation13 + $0x1f0] sm:$0xff]  }
 0x53d   :  { %9360 = vmatpush3.bf16.msra.mxu0 %v9854_v38  ;;  %v9907_v38 = vld [vmem:[#allocation13 + $0x1b0] sm:$0xff]  }
 0x53e   :  { %9382 = vmatpush3.bf16.msra.mxu1 %v9855_v41  ;;  %9361 = vmatprep.subr.bf16.mxu0 %v9856_v49  ;;  %v9908_v41 = vld [vmem:[#allocation13 + $0x178] sm:$0xff]  }
 0x53f   :  { %9383 = vmatprep.subr.bf16.mxu1 %v9857_v48  ;;  %v9909_v49 = vld [vmem:[#allocation13 + $0x1f8] sm:$0xff]  }
 0x540   :  { %v9910_v48 = vld [vmem:[#allocation13 + $0x138] sm:$0xff]  }
 0x541   :  { %9362 = vmatpush3.bf16.msra.mxu0 %v9858_v50  ;;  %v9911_v50 = vld [vmem:[#allocation13 + $0x1b8] sm:$0xff]  }
 0x542   :  { %9384 = vmatpush3.bf16.msra.mxu1 %v9859_v36  ;;  %9363 = vmatprep.subr.bf16.mxu0 %v9860_v14  ;;  %v2672_v36 = vsub.s32 4, %v10348_v27  ;;  %v2680_v14 = vsub.s32 6, %v10348_v27 }
 0x543   :  { %9385 = vmatprep.subr.bf16.mxu1 %v9861_v10  ;;  %v2676_v10 = vsub.s32 5, %v10348_v27 }
 0x545   :  { %9364 = vmatpush3.bf16.msra.mxu0 %v9862_v7  ;;  %v2684_v7 = vsub.s32 7, %v10348_v27 }
 0x546   :  { %9386 = vmatpush3.bf16.msra.mxu1 %v9863_v29  ;;  %9365 = vmatprep.subr.bf16.mxu0 %v9864_v57  ;;  %v2673_v29 = vrot.slane %v10572_v11, %v2672_v36  ;;  %v2681_v57 = vrot.slane %v10572_v11, %v2680_v14 }
 0x547   :  { %9387 = vmatprep.subr.bf16.mxu1 %v9865_v51  ;;  %v2677_v51 = vrot.slane %v10572_v11, %v2676_v10 }
 0x549   :  { %9366 = vmatpush3.bf16.msra.mxu0 %v9866_v53  ;;  %v2685_v53 = vrot.slane %v10572_v11, %v2684_v7 }
 0x54a   :  { %9388 = vmatpush3.bf16.msra.mxu1 %v9867_v45  ;;  %9367 = vmatprep.subr.bf16.mxu0 %v9868_v60 }
 0x54b   :  { %9389 = vmatprep.subr.bf16.mxu1 %v9869_v59 }
 0x54d   :  { %9368 = vmatpush3.bf16.msra.mxu0 %v9870_v63 }
 0x54e   :  { %9390 = vmatpush3.bf16.msra.mxu1 %v9871_v1  ;;  %9369 = vmatprep.subr.bf16.mxu0 %v9872_v2 }
 0x54f   :  { %9391 = vmatprep.subr.bf16.mxu1 %v9873_v4 }
 0x551   :  { %9370 = vmatpush3.bf16.msra.mxu0 %v9874_v5 }
 0x552   :  { %9392 = vmatpush3.bf16.msra.mxu1 %v9875_v6  ;;  %9371 = vmatprep.subr.bf16.mxu0 %v9876_v9 }
 0x553   :  { %9393 = vmatprep.subr.bf16.mxu1 %v9877_v28 }
 0x555   :  { %9372 = vmatpush3.bf16.msra.mxu0 %v9878_v8 }
 0x556   :  { %9394 = vmatpush3.bf16.msra.mxu1 %v9879_v12  ;;  %9401 = vmatprep.subr.bf16.mxu0 %v9880_v22 }
 0x557   :  { %9423 = vmatprep.subr.bf16.mxu1 %v9881_v32 }
 0x558   :  { %8127 = vmatmul.mubr.bf16.vlgmr.msra.gmra.mrb[20].mxu0 %v7568_v15 }
 0x559   :  { %8167 = vmatmul.mubr.bf16.vlgmr.msra.gmra.mrb[20].mxu1 %v7570_v26  ;;  %9402 = vmatpush3.bf16.msra.mxu0 %v9882_v24 }
 0x55a   :  { %9424 = vmatpush3.bf16.msra.mxu1 %v9883_v33  ;;  %9403 = vmatprep.subr.bf16.mxu0 %v9884_v37 }
 0x55b   :  { %9425 = vmatprep.subr.bf16.mxu1 %v9885_v42 }
 0x55d   :  { %9404 = vmatpush3.bf16.msra.mxu0 %v9886_v21 }
 0x55e   :  { %9426 = vmatpush3.bf16.msra.mxu1 %v9887_v46  ;;  %9405 = vmatprep.subr.bf16.mxu0 %v9888_v39 }
 0x55f   :  { %9427 = vmatprep.subr.bf16.mxu1 %v9889_v13 }
 0x561   :  { %9406 = vmatpush3.bf16.msra.mxu0 %v9890_v40 }
 0x562   :  { %9428 = vmatpush3.bf16.msra.mxu1 %v9891_v18  ;;  %9407 = vmatprep.subr.bf16.mxu0 %v9892_v52 }
 0x563   :  { %9429 = vmatprep.subr.bf16.mxu1 %v9893_v16 }
 0x565   :  { %9408 = vmatpush3.bf16.msra.mxu0 %v9894_v62 }
 0x566   :  { %9430 = vmatpush3.bf16.msra.mxu1 %v9895_v44  ;;  %9409 = vmatprep.subr.bf16.mxu0 %v9896_v30 }
 0x567   :  { %9431 = vmatprep.subr.bf16.mxu1 %v9897_v17 }
 0x569   :  { %9410 = vmatpush3.bf16.msra.mxu0 %v9898_v19 }
 0x56a   :  { %9432 = vmatpush3.bf16.msra.mxu1 %v9899_v20  ;;  %9411 = vmatprep.subr.bf16.mxu0 %v9900_v23 }
 0x56b   :  { %9433 = vmatprep.subr.bf16.mxu1 %v9901_v43  ;;  %v9337_v43 = vld [vmem:[#allocation14 + $0x9] ss:$0 sm:$0xff] }
 0x56d   :  { %9412 = vmatpush3.bf16.msra.mxu0 %v9902_v47 }
 0x56e   :  { %9434 = vmatpush3.bf16.msra.mxu1 %v9903_v58  ;;  %9413 = vmatprep.subr.bf16.mxu0 %v9904_v34  ;;  %v9338_v34 = vld [vmem:[#allocation14 + $0xa] ss:$0 sm:$0xff] }
 0x56f   :  { %9435 = vmatprep.subr.bf16.mxu1 %v9905_v55 }
 0x571   :  { %9414 = vmatpush3.bf16.msra.mxu0 %v9906_v61 }
 0x572   :  { %9436 = vmatpush3.bf16.msra.mxu1 %v9907_v38  ;;  %9415 = vmatprep.subr.bf16.mxu0 %v9908_v41 }
 0x573   :  { %9437 = vmatprep.subr.bf16.mxu1 %v9909_v49 }
 0x575   :  { %9416 = vmatpush3.bf16.msra.mxu0 %v9910_v48 }
 0x576   :  { %9438 = vmatpush3.bf16.msra.mxu1 %v9911_v50 }
 0x60b   :  { %v7307_v45 = vpop.f32.mrb[16].mxu0 }
 0x60c   :  { %v9449_v60 = vadd.f32 %v7307_v45, %v2673_v29  ;;  %v7553_v56 = vpop.f32.mrb[16].mxu1  ;;  %v7309_v59 = vpop.f32.mrb[17].mxu0 }
 0x60d   :  { %v9451_v63 = vadd.f32 %v7553_v56, %v2681_v57  ;;  %v9450_v0 = vadd.f32 %v7309_v59, %v2677_v51  ;;  %v7555_v1 = vpop.f32.mrb[17].mxu1  ;;  %v7311_v2 = vpop.f32.mrb[18].mxu0 }
 0x60e   :  { %v7564_v3 = vmax.f32 %v9449_v60, 0.0  ;;  %v9452_v4 = vadd.f32 %v7555_v1, %v2685_v53  ;;  %v7557_v5 = vpop.f32.mrb[18].mxu1  ;;  %v7312_v27 = vpop.f32.mrb[19].mxu0 }
 0x60f   :  { %v7566_v35 = vmax.f32 %v9451_v63, 0.0  ;;  %v7565_v6 = vmax.f32 %v9450_v0, 0.0  ;;  %v7558_v9 = vpop.f32.mrb[19].mxu1 }
 0x610   :  { %v7567_v54 = vmax.f32 %v9452_v4, 0.0  ;;  %v7572_v8 = vpack.c.bf16 %v7564_v3, %v7564_v3 }
 0x611   :  { %v7573_v28 = vpack.c.bf16 %v7565_v6, %v7565_v6  ;;  %v7574_v11 = vpack.c.bf16 %v7566_v35, %v7566_v35 }
 0x612   :  { %v7575_v25 = vpack.c.bf16 %v7567_v54, %v7567_v54 }
 0x613   :  { %8206 = vmatprep.mubr.bf16.mxu0 %v7573_v28 }
 0x614   :  { %8246 = vmatprep.mubr.bf16.mxu1 %v7575_v25  ;;  %8207 = vmatmul.mubr.bf16.vlgmr.msra.gmra.mrb[24].mxu0 %v7572_v8 }
 0x615   :  { %8247 = vmatmul.mubr.bf16.vlgmr.msra.gmra.mrb[24].mxu1 %v7574_v11 }
 0x62b   :  { %v9373_v12 = vpop.f32.mrb[20].mxu0 }
 0x62c   :  { %v9395_v22 = vpop.f32.mrb[20].mxu1  ;;  %v9374_v32 = vpop.f32.mrb[21].mxu0 }
 0x62d   :  { %v9375_v24 = vadd.f32 %v9374_v32, %v9373_v12  ;;  %v9396_v15 = vpop.f32.mrb[21].mxu1  ;;  %v9376_v33 = vpop.f32.mrb[22].mxu0 }
 0x62e   :  { %v9397_v37 = vadd.f32 %v9396_v15, %v9395_v22  ;;  %v9398_v26 = vpop.f32.mrb[22].mxu1  ;;  %v9377_v42 = vpop.f32.mrb[23].mxu0 }
 0x62f   :  { %v8129_v21 = vadd.f32 %v9375_v24, %v9272_v31  ;;  %v9399_v46 = vpop.f32.mrb[23].mxu1 }
 0x631   :  { %v8169_v39 = vadd.f32 %v9397_v37, %v8129_v21 }
 0x6e7   :  { %v9417_v13 = vpop.f32.mrb[24].mxu0 }
 0x6e8   :  { %v9439_v40 = vpop.f32.mrb[24].mxu1  ;;  %v9418_v18 = vpop.f32.mrb[25].mxu0 }
 0x6e9   :  { %v9419_v52 = vadd.f32 %v9418_v18, %v9417_v13  ;;  %v9440_v16 = vpop.f32.mrb[25].mxu1  ;;  %v9420_v62 = vpop.f32.mrb[26].mxu0 }
 0x6ea   :  { %v9441_v44 = vadd.f32 %v9440_v16, %v9439_v40  ;;  %v9442_v30 = vpop.f32.mrb[26].mxu1  ;;  %v9421_v17 = vpop.f32.mrb[27].mxu0 }
 0x6eb   :  { %v8209_v19 = vadd.f32 %v9419_v52, %v8169_v39  ;;  %v9443_v20 = vpop.f32.mrb[27].mxu1 }
 0x6ed   :  { %v8249_v23 = vadd.f32 %v9441_v44, %v8209_v19 }
 0x6ef   :  { %v8254_v47 = vmax.f32 %v8249_v23, 0.0 }
 0x6f1   :  { %v8261_v58 = vmul.f32 %v9337_v43, %v8254_v47 }
 0x6f3   :  { %8262 = vadd.xlane.f32.xlu0 %v8261_v58 }
 0x780   :  { %v8263_v55 = vpop.xlane.xlu0 %8262 }
 0x781   :  { %v8270_v61 = vadd.f32 %v9338_v34, %v8263_v55 }
 0x783   :  { %8272 = vst.msk [vmem:[%s10607_s8] sm:$0xff] %vm8271_vm0, %v8270_v61 }
 0x784   :  { %8277 = vsyncpa [#allocation4], 1 }
 0x785   :  { %8278 = vsyncpa [#allocation6], 1 }
 0x786   :  { %8279 = vsyncpa [#allocation9], 1 }
 0x787   :  { %8280 = vsyncpa [#allocation12], 1 }
 0x788   :  { %8281 = vsyncpa [#allocation15], 1 }

</bundles_post_ra>
